<compile_context>
chip_gen: v5e
topology: v5e:2x2
jax: 0.10.0
libtpu: 0.0.40
codegen_flags: <defaults>
</compile_context>

<pallas_src>
import jax
import jax.numpy as jnp
from jax.experimental import pallas as pl
from jax.experimental.pallas import tpu as pltpu

EPS = 1e-5
PADW = 8  # column pad of the dw-conv scratch: interior stores stay 8-aligned


def _ln_project_in(x_f32, ln_w, ln_b, w_a, w_b):
    """Channel LayerNorm (WithBias) + the two halves of the 1x1 project_in.

    x_f32: (R, W, C) f32.  Returns two (R, W, Hd) f32 tensors.
    """
    R, W, C = x_f32.shape
    Hd = w_a.shape[1]
    mu = jnp.mean(x_f32, axis=-1, keepdims=True)
    var = jnp.mean(x_f32 * x_f32, axis=-1, keepdims=True) - mu * mu
    y = (x_f32 - mu) * jax.lax.rsqrt(var + EPS)           # rsqrt -> EUP slot
    y = (y * ln_w + ln_b).astype(jnp.bfloat16)            # bf16 MXU operands
    yf = y.reshape(R * W, C)
    ya = jnp.dot(yf, w_a, preferred_element_type=jnp.float32).reshape(R, W, Hd)
    yb = jnp.dot(yf, w_b, preferred_element_type=jnp.float32).reshape(R, W, Hd)
    return ya, yb


def transformer_block_kernel(x_ref, x_hbm_ref, ln_w_ref, ln_b_ref,
                             w_in_a_ref, w_in_b_ref, w_dw_a_ref, w_dw_b_ref,
                             w_out_ref, o_ref, halo_ref, pad_ref, sem_ref):
    _, TH, W, C = x_ref.shape
    Hd = w_in_a_ref.shape[1]
    dwdt = pad_ref.dtype

    b = pl.program_id(0)
    h = pl.program_id(1)
    nH = pl.num_programs(1)
    H = TH * nH

    # ---- kick off the two 1-row halo DMAs (overlap with interior compute) ----
    top_row = jnp.maximum(h * TH - 1, 0)
    bot_row = jnp.minimum(h * TH + TH, H - 1)
    cp_top = pltpu.make_async_copy(x_hbm_ref.at[b, pl.ds(top_row, 1)],
                                   halo_ref.at[pl.ds(0, 1)], sem_ref.at[0])
    cp_bot = pltpu.make_async_copy(x_hbm_ref.at[b, pl.ds(bot_row, 1)],
                                   halo_ref.at[pl.ds(1, 1)], sem_ref.at[1])
    cp_top.start()
    cp_bot.start()

    ln_w = ln_w_ref[...]
    ln_b = ln_b_ref[...]
    w_a = w_in_a_ref[...]
    w_b = w_in_b_ref[...]

    # ---- norm2 + project_in on the TH interior rows ----
    ya_m, yb_m = _ln_project_in(x_ref[0].astype(jnp.float32), ln_w, ln_b, w_a, w_b)

    # ---- same for the two halo rows (recompute; outside the image -> zero) ----
    cp_top.wait()
    cp_bot.wait()
    ya_h, yb_h = _ln_project_in(halo_ref[...].astype(jnp.float32),
                                ln_w, ln_b, w_a, w_b)
    top_s = jnp.where(h > 0, 1.0, 0.0)        # conv zero-padding at image top
    bot_s = jnp.where(h + 1 < nH, 1.0, 0.0)   # ... and at image bottom

    # ---- depthwise 3x3, stride 1, zero pad 1 — one gate half at a time ----
    def dw_half(y_mid, y_top, y_bot, w_dw):
        # Every scratch row that is read gets written this step; only the two
        # halo columns are zero-filled (no full-scratch memset).
        pad_ref[0:1, PADW:PADW + W, :] = (y_top * top_s).astype(dwdt)
        pad_ref[1:TH + 1, PADW:PADW + W, :] = y_mid.astype(dwdt)
        pad_ref[TH + 1:TH + 2, PADW:PADW + W, :] = (y_bot * bot_s).astype(dwdt)
        zcol = jnp.zeros((TH + 2, 1, Hd), dwdt)
        pad_ref[:, PADW - 1:PADW, :] = zcol           # left zero pad
        pad_ref[:, PADW + W:PADW + W + 1, :] = zcol   # right zero pad
        acc = jnp.zeros((TH, W, Hd), dwdt)
        for dy in range(3):
            for dx in range(3):
                win = pad_ref[dy:dy + TH, PADW - 1 + dx:PADW - 1 + dx + W, :]
                acc = acc + win * w_dw[dy, dx]
        return acc

    acc_a = dw_half(ya_m, ya_h[0:1], ya_h[1:2], w_dw_a_ref[...])
    acc_b = dw_half(yb_m, yb_h[0:1], yb_h[1:2], w_dw_b_ref[...])

    # ---- SimpleGate + project_out ----
    # TODO(synk): the reference `x1 * self.sg(x2)` is shape-inconsistent (and
    # SimpleGate() is built without its required `dim` arg); we implement the
    # intended gate x1 * x2, which matches project_out's input width.
    g = (acc_a * acc_b).astype(jnp.bfloat16)
    ffn = jnp.dot(g.reshape(TH * W, Hd), w_out_ref[...],
                  preferred_element_type=jnp.float32).reshape(TH, W, C)

    # ---- residual add: re-read x here instead of holding it live ----
    o_ref[0] = (x_ref[0].astype(jnp.float32) + ffn).astype(o_ref.dtype)


def _round_up(v, m):
    return ((v + m - 1) // m) * m


def _pick_row_tile(h, target=64):
    th = min(h, target)
    while h % th:
        th -= 1
    return max(th, 1)


def _dwconv_dtype():
    # bf16 VALU exists on v6e / v7x; keep the depthwise conv in f32 on v5e and
    # on anything we do not recognize.
    try:
        kind = jax.devices()[0].device_kind.lower()
    except Exception:
        return jnp.float32
    if any(tag in kind for tag in ("v6", "6e", "trillium", "v7", "7x")):
        return jnp.bfloat16
    return jnp.float32


def transformer_block_nhwc(x, params, row_tile=None):
    """Preferred entry point: x is (B, H, W, C); no layout round trips."""
    B, H, W, C = x.shape
    w_in = params["w_in"]
    C2 = w_in.shape[1]
    Hd = C2 // 2
    TH = _pick_row_tile(H) if row_tile is None else int(row_tile)
    assert H % TH == 0, "row_tile must divide H"  # TODO(synk): mask ragged tiles
    nH = H // TH
    dwdt = _dwconv_dtype()

    # Weight prep (in a real model these casts / splits are done once, offline).
    w_in_a = w_in[:, :Hd].astype(jnp.bfloat16)
    w_in_b = w_in[:, Hd:].astype(jnp.bfloat16)
    w_dw_a = params["w_dw"][..., :Hd].astype(dwdt)
    w_dw_b = params["w_dw"][..., Hd:].astype(dwdt)
    w_out = params["w_out"].astype(jnp.bfloat16)
    ln_w = params["ln_w"].reshape(1, C).astype(jnp.float32)
    ln_b = params["ln_b"].reshape(1, C).astype(jnp.float32)

    # ---- explicit VMEM budget (lane/sublane padded, double-buffered I/O) ----
    lane_c, lane_hd = _round_up(C, 128), _round_up(Hd, 128)
    sub_w = _round_up(W, 8)
    io_blk = TH * sub_w * lane_c * 4
    pad_blk = (TH + 2) * _round_up(W + 2 * PADW, 8) * lane_hd * jnp.dtype(dwdt).itemsize
    live = 6 * TH * sub_w * lane_hd * 4          # ya/yb/acc_a/acc_b/g/ffn headroom
    wts = (2 * _round_up(C, 8) * lane_hd + 2 * 24 * lane_hd
           + _round_up(Hd, 8) * lane_c + 16 * lane_c) * 4
    halo_b = 2 * sub_w * lane_c * 4
    est = 2 * 2 * io_blk + pad_blk + halo_b + live + 2 * wts
    vmem_limit = int(min(max(est + (4 << 20), 16 << 20), 48 << 20))

    cost = pl.CostEstimate(
        flops=int(B * H * W * (2 * C * C2 + 2 * Hd * C + 18 * C2 + 10 * C)),
        transcendentals=int(B * H * W),
        bytes_accessed=int(2 * B * H * W * C * 4
                           + (C * C2 + 9 * C2 + Hd * C + 2 * C) * 4),
    )

    grid_spec = pltpu.PrefetchScalarGridSpec(
        num_scalar_prefetch=0,
        grid=(B, nH),
        in_specs=[
            pl.BlockSpec((1, TH, W, C), lambda b, h: (b, h, 0, 0)),   # x row tile
            pl.BlockSpec(memory_space=pl.ANY),                        # x (halo DMA)
            pl.BlockSpec((1, C), lambda b, h: (0, 0)),                # LN weight
            pl.BlockSpec((1, C), lambda b, h: (0, 0)),                # LN bias
            pl.BlockSpec((C, Hd), lambda b, h: (0, 0)),               # project_in a
            pl.BlockSpec((C, Hd), lambda b, h: (0, 0)),               # project_in b
            pl.BlockSpec((3, 3, Hd), lambda b, h: (0, 0, 0)),         # dwconv a
            pl.BlockSpec((3, 3, Hd), lambda b, h: (0, 0, 0)),         # dwconv b
            pl.BlockSpec((Hd, C), lambda b, h: (0, 0)),               # project_out
        ],
        out_specs=pl.BlockSpec((1, TH, W, C), lambda b, h: (b, h, 0, 0)),
        scratch_shapes=[
            pltpu.VMEM((2, W, C), x.dtype),                    # halo x rows
            pltpu.VMEM((TH + 2, W + 2 * PADW, Hd), dwdt),      # padded dw scratch
            pltpu.SemaphoreType.DMA((2,)),
        ],
    )
    return pl.pallas_call(
        transformer_block_kernel,
        out_shape=jax.ShapeDtypeStruct((B, H, W, C), x.dtype),
        grid_spec=grid_spec,
        compiler_params=pltpu.CompilerParams(
            dimension_semantics=("parallel", "parallel"),
            vmem_limit_bytes=vmem_limit),
        cost_estimate=cost,
    )(x, x, ln_w, ln_b, w_in_a, w_in_b, w_dw_a, w_dw_b, w_out)


def transformer_block(x_nchw, params, row_tile=None):
    """PyTorch-parity wrapper: (B, C, H, W) in / out.

    TODO(synk): at the model level keep activations NHWC across layers so these
    two HBM-bound transposes disappear (perf-review item).
    """
    out = transformer_block_nhwc(jnp.transpose(x_nchw, (0, 2, 3, 1)), params,
                                 row_tile=row_tile)
    return jnp.transpose(out, (0, 3, 1, 2))


def reference(x_nchw, p):
    """Pure-f32 JAX reference of the same forward pass (NCHW)."""
    x = x_nchw.astype(jnp.float32)
    B, C, H, W = x.shape
    mu = jnp.mean(x, axis=1, keepdims=True)
    var = jnp.mean((x - mu) ** 2, axis=1, keepdims=True)
    y = (x - mu) / jnp.sqrt(var + EPS)
    y = y * p["ln_w"].reshape(1, C, 1, 1) + p["ln_b"].reshape(1, C, 1, 1)
    y2 = jnp.einsum("bchw,cd->bdhw", y, p["w_in"])
    C2 = y2.shape[1]
    Hd = C2 // 2
    yp = jnp.pad(y2, ((0, 0), (0, 0), (1, 1), (1, 1)))
    acc = jnp.zeros_like(y2)
    for dy in range(3):
        for dx in range(3):
            acc = acc + yp[:, :, dy:dy + H, dx:dx + W] * \
                p["w_dw"][dy, dx].reshape(1, C2, 1, 1)
    g = acc[:, :Hd] * acc[:, Hd:]
    ffn = jnp.einsum("bchw,cd->bdhw", g, p["w_out"])
    return x + ffn


if __name__ == "__main__":
    key = jax.random.PRNGKey(0)
    B, C, H, W = 2, 16, 16, 16          # dim = 16, ffn_expansion_factor = 1
    hidden = C
    C2 = 2 * hidden
    ks = jax.random.split(key, 6)
    x = jax.random.normal(ks[0], (B, C, H, W), jnp.float32)
    params = {
        "ln_w": 1.0 + 0.1 * jax.random.normal(ks[1], (1, C), jnp.float32),
        "ln_b": 0.1 * jax.random.normal(ks[2], (1, C), jnp.float32),
        "w_in": 0.2 * jax.random.normal(ks[3], (C, C2), jnp.float32),
        "w_dw": 0.2 * jax.random.normal(ks[4], (3, 3, C2), jnp.float32),
        "w_out": 0.2 * jax.random.normal(ks[5], (hidden, C), jnp.float32),
    }

    ref = reference(x, params)
    # bf16 MXU (+ bf16 dwconv on v6e/v7x) -> bf16-level tolerances.
    MAX_TOL, MEAN_TOL = 3e-2, 5e-3

    # Multi-tile path: exercises the row-halo logic (grid = (B, 2)).
    out_tiled = jax.block_until_ready(transformer_block(x, params, row_tile=8))
    assert out_tiled.shape == x.shape and out_tiled.dtype == x.dtype
    d_t = jnp.abs(out_tiled - ref)
    # Default tiling: a single row tile per image (grid = (B, 1)).
    out_full = jax.block_until_ready(transformer_block(x, params))
    d_f = jnp.abs(out_full - ref)

    max_err = float(jnp.maximum(jnp.max(d_t), jnp.max(d_f)))
    mean_err = float(jnp.maximum(jnp.mean(d_t), jnp.mean(d_f)))
    if max_err > MAX_TOL or mean_err > MEAN_TOL:
        raise SystemExit(f"mismatch: max abs err = {max_err:e}, "
                         f"mean abs err = {mean_err:e}")
    print("KERNEL_OK")
</pallas_src>

<mosaic_0001>
module attributes {stable_mosaic.version = 11 : i64} {
  func.func @transformer_block_kernel(%arg0: i32, %arg1: i32, %arg2: memref<1x8x16x16xf32, #tpu.memory_space<vmem>>, %arg3: memref<2x16x16x16xf32, #tpu.memory_space<any>>, %arg4: memref<1x16xf32, #tpu.memory_space<vmem>>, %arg5: memref<1x16xf32, #tpu.memory_space<vmem>>, %arg6: memref<16x16xbf16, #tpu.memory_space<vmem>>, %arg7: memref<16x16xbf16, #tpu.memory_space<vmem>>, %arg8: memref<3x3x16xf32, #tpu.memory_space<vmem>>, %arg9: memref<3x3x16xf32, #tpu.memory_space<vmem>>, %arg10: memref<16x16xbf16, #tpu.memory_space<vmem>>, %arg11: memref<1x8x16x16xf32, #tpu.memory_space<vmem>>, %arg12: memref<2x16x16xf32, #tpu.memory_space<vmem>>, %arg13: memref<10x32x16xf32, #tpu.memory_space<vmem>>, %arg14: memref<2x!tpu.dma_semaphore, #tpu.memory_space<semaphore_mem>>) attributes {dimension_semantics = [#tpu.dimension_semantics<parallel>, #tpu.dimension_semantics<parallel>], iteration_bounds = array<i64: 2, 2>, scalar_prefetch = 0 : i64, scratch_operands = 3 : i64, tpu.core_type = #tpu.core_type<tc>, window_params = [{transform_indices = @transform_0, window_bounds = array<i64: 1, 8, 16, 16>}, {}, {pipeline_mode = #tpu.pipeline_mode<synchronous>, transform_indices = @transform_2, window_bounds = array<i64: 1, 16>}, {pipeline_mode = #tpu.pipeline_mode<synchronous>, transform_indices = @transform_3, window_bounds = array<i64: 1, 16>}, {pipeline_mode = #tpu.pipeline_mode<synchronous>, transform_indices = @transform_4, window_bounds = array<i64: 16, 16>}, {pipeline_mode = #tpu.pipeline_mode<synchronous>, transform_indices = @transform_5, window_bounds = array<i64: 16, 16>}, {pipeline_mode = #tpu.pipeline_mode<synchronous>, transform_indices = @transform_6, window_bounds = array<i64: 3, 3, 16>}, {pipeline_mode = #tpu.pipeline_mode<synchronous>, transform_indices = @transform_7, window_bounds = array<i64: 3, 3, 16>}, {pipeline_mode = #tpu.pipeline_mode<synchronous>, transform_indices = @transform_8, window_bounds = array<i64: 16, 16>}, {transform_indices = @transform_9, window_bounds = array<i64: 1, 8, 16, 16>}]} {
    %c8_i32 = arith.constant 8 : i32
    %0 = arith.muli %arg1, %c8_i32 : i32
    %c1_i32 = arith.constant 1 : i32
    %1 = arith.subi %0, %c1_i32 : i32
    %c0_i32 = arith.constant 0 : i32
    %2 = arith.maxsi %1, %c0_i32 : i32
    %c8_i32_0 = arith.constant 8 : i32
    %3 = arith.muli %arg1, %c8_i32_0 : i32
    %c8_i32_1 = arith.constant 8 : i32
    %4 = arith.addi %3, %c8_i32_1 : i32
    %c15_i32 = arith.constant 15 : i32
    %5 = arith.minsi %4, %c15_i32 : i32
    %c0_i32_2 = arith.constant 0 : i32
    %c0_i32_3 = arith.constant 0 : i32
    %c0_i32_4 = arith.constant 0 : i32
    %6 = tpu.memref_slice %arg3[%arg0, %2, %c0_i32_3, %c0_i32_4] : memref<2x16x16x16xf32, #tpu.memory_space<any>> -> memref<1x1x16x16xf32, #tpu.memory_space<any>>
    %7 = tpu.memref_squeeze %6 : memref<1x1x16x16xf32, #tpu.memory_space<any>> -> memref<1x16x16xf32, #tpu.memory_space<any>>
    %c0_i32_5 = arith.constant 0 : i32
    %c0_i32_6 = arith.constant 0 : i32
    %c0_i32_7 = arith.constant 0 : i32
    %8 = tpu.memref_slice %arg12[%c0_i32_5, %c0_i32_6, %c0_i32_7] : memref<2x16x16xf32, #tpu.memory_space<vmem>> -> memref<1x16x16xf32, #tpu.memory_space<vmem>>
    %9 = tpu.memref_slice %arg14[%c0_i32_2] : memref<2x!tpu.dma_semaphore, #tpu.memory_space<semaphore_mem>> -> memref<1x!tpu.dma_semaphore, #tpu.memory_space<semaphore_mem>>
    %10 = tpu.memref_squeeze %9 : memref<1x!tpu.dma_semaphore, #tpu.memory_space<semaphore_mem>> -> memref<!tpu.dma_semaphore, #tpu.memory_space<semaphore_mem>>
    tpu.enqueue_dma source(%7 : memref<1x16x16xf32, #tpu.memory_space<any>>) target(%8 : memref<1x16x16xf32, #tpu.memory_space<vmem>>) target_semaphore(%10 : memref<!tpu.dma_semaphore, #tpu.memory_space<semaphore_mem>>)
    %c1_i32_8 = arith.constant 1 : i32
    %c0_i32_9 = arith.constant 0 : i32
    %c0_i32_10 = arith.constant 0 : i32
    %11 = tpu.memref_slice %arg3[%arg0, %5, %c0_i32_9, %c0_i32_10] : memref<2x16x16x16xf32, #tpu.memory_space<any>> -> memref<1x1x16x16xf32, #tpu.memory_space<any>>
    %12 = tpu.memref_squeeze %11 : memref<1x1x16x16xf32, #tpu.memory_space<any>> -> memref<1x16x16xf32, #tpu.memory_space<any>>
    %c1_i32_11 = arith.constant 1 : i32
    %c0_i32_12 = arith.constant 0 : i32
    %c0_i32_13 = arith.constant 0 : i32
    %13 = tpu.memref_slice %arg12[%c1_i32_11, %c0_i32_12, %c0_i32_13] : memref<2x16x16xf32, #tpu.memory_space<vmem>> -> memref<1x16x16xf32, #tpu.memory_space<vmem>>
    %14 = tpu.memref_slice %arg14[%c1_i32_8] : memref<2x!tpu.dma_semaphore, #tpu.memory_space<semaphore_mem>> -> memref<1x!tpu.dma_semaphore, #tpu.memory_space<semaphore_mem>>
    %15 = tpu.memref_squeeze %14 : memref<1x!tpu.dma_semaphore, #tpu.memory_space<semaphore_mem>> -> memref<!tpu.dma_semaphore, #tpu.memory_space<semaphore_mem>>
    tpu.enqueue_dma source(%12 : memref<1x16x16xf32, #tpu.memory_space<any>>) target(%13 : memref<1x16x16xf32, #tpu.memory_space<vmem>>) target_semaphore(%15 : memref<!tpu.dma_semaphore, #tpu.memory_space<semaphore_mem>>)
    %c0 = arith.constant 0 : index
    %c0_14 = arith.constant 0 : index
    %16 = vector.load %arg4[%c0, %c0_14] : memref<1x16xf32, #tpu.memory_space<vmem>>, vector<1x16xf32>
    %c0_15 = arith.constant 0 : index
    %c0_16 = arith.constant 0 : index
    %17 = vector.load %arg5[%c0_15, %c0_16] : memref<1x16xf32, #tpu.memory_space<vmem>>, vector<1x16xf32>
    %c0_17 = arith.constant 0 : index
    %c0_18 = arith.constant 0 : index
    %18 = vector.load %arg6[%c0_17, %c0_18] : memref<16x16xbf16, #tpu.memory_space<vmem>>, vector<16x16xbf16>
    %c0_19 = arith.constant 0 : index
    %c0_20 = arith.constant 0 : index
    %19 = vector.load %arg7[%c0_19, %c0_20] : memref<16x16xbf16, #tpu.memory_space<vmem>>, vector<16x16xbf16>
    %c0_21 = arith.constant 0 : index
    %c0_22 = arith.constant 0 : index
    %c0_23 = arith.constant 0 : index
    %c0_24 = arith.constant 0 : index
    %20 = vector.load %arg2[%c0_21, %c0_22, %c0_23, %c0_24] : memref<1x8x16x16xf32, #tpu.memory_space<vmem>>, vector<1x8x16x16xf32>
    %21 = vector.shape_cast %20 : vector<1x8x16x16xf32> to vector<8x16x16xf32>
    %cst = arith.constant dense<0.000000e+00> : vector<8x16xf32>
    %22 = vector.multi_reduction <add>, %21, %cst [2] : vector<8x16x16xf32> to vector<8x16xf32>
    %23 = vector.shape_cast %22 : vector<8x16xf32> to vector<8x16x1xf32>
    %cst_25 = arith.constant 1.600000e+01 : f32
    %24 = vector.broadcast %cst_25 : f32 to vector<8x16x1xf32>
    %25 = arith.divf %23, %24 : vector<8x16x1xf32>
    %26 = arith.mulf %21, %21 : vector<8x16x16xf32>
    %cst_26 = arith.constant dense<0.000000e+00> : vector<8x16xf32>
    %27 = vector.multi_reduction <add>, %26, %cst_26 [2] : vector<8x16x16xf32> to vector<8x16xf32>
    %28 = vector.shape_cast %27 : vector<8x16xf32> to vector<8x16x1xf32>
    %cst_27 = arith.constant 1.600000e+01 : f32
    %29 = vector.broadcast %cst_27 : f32 to vector<8x16x1xf32>
    %30 = arith.divf %28, %29 : vector<8x16x1xf32>
    %31 = arith.mulf %25, %25 : vector<8x16x1xf32>
    %32 = arith.subf %30, %31 : vector<8x16x1xf32>
    %33 = vector.broadcast %25 : vector<8x16x1xf32> to vector<8x16x16xf32>
    %34 = arith.subf %21, %33 : vector<8x16x16xf32>
    %cst_28 = arith.constant 9.99999974E-6 : f32
    %35 = vector.broadcast %cst_28 : f32 to vector<8x16x1xf32>
    %36 = arith.addf %32, %35 : vector<8x16x1xf32>
    %37 = math.rsqrt %36 : vector<8x16x1xf32>
    %38 = vector.broadcast %37 : vector<8x16x1xf32> to vector<8x16x16xf32>
    %39 = arith.mulf %34, %38 : vector<8x16x16xf32>
    %40 = vector.shape_cast %16 : vector<1x16xf32> to vector<1x1x16xf32>
    %41 = vector.broadcast %40 : vector<1x1x16xf32> to vector<8x16x16xf32>
    %42 = arith.mulf %39, %41 : vector<8x16x16xf32>
    %43 = vector.shape_cast %17 : vector<1x16xf32> to vector<1x1x16xf32>
    %44 = vector.broadcast %43 : vector<1x1x16xf32> to vector<8x16x16xf32>
    %45 = arith.addf %42, %44 : vector<8x16x16xf32>
    %46 = arith.truncf %45 : vector<8x16x16xf32> to vector<8x16x16xbf16>
    %47 = vector.shape_cast %46 : vector<8x16x16xbf16> to vector<128x16xbf16>
    %cst_29 = arith.constant dense<0.000000e+00> : vector<128x16xf32>
    %48 = tpu.matmul %47, %18, %cst_29 {dimension_numbers = #tpu.dot_dimension_numbers<[1], [0], [0], [1], [0, 0, 1, 1], [], []>} : vector<128x16xbf16>, vector<16x16xbf16>, vector<128x16xf32> -> vector<128x16xf32>
    %49 = vector.shape_cast %48 : vector<128x16xf32> to vector<8x16x16xf32>
    %cst_30 = arith.constant dense<0.000000e+00> : vector<128x16xf32>
    %50 = tpu.matmul %47, %19, %cst_30 {dimension_numbers = #tpu.dot_dimension_numbers<[1], [0], [0], [1], [0, 0, 1, 1], [], []>} : vector<128x16xbf16>, vector<16x16xbf16>, vector<128x16xf32> -> vector<128x16xf32>
    %51 = vector.shape_cast %50 : vector<128x16xf32> to vector<8x16x16xf32>
    %c0_i32_31 = arith.constant 0 : i32
    %c0_i32_32 = arith.constant 0 : i32
    %c0_i32_33 = arith.constant 0 : i32
    %52 = tpu.memref_slice %arg3[%arg0, %2, %c0_i32_32, %c0_i32_33] : memref<2x16x16x16xf32, #tpu.memory_space<any>> -> memref<1x1x16x16xf32, #tpu.memory_space<any>>
    %53 = tpu.memref_squeeze %52 : memref<1x1x16x16xf32, #tpu.memory_space<any>> -> memref<1x16x16xf32, #tpu.memory_space<any>>
    %c0_i32_34 = arith.constant 0 : i32
    %c0_i32_35 = arith.constant 0 : i32
    %c0_i32_36 = arith.constant 0 : i32
    %54 = tpu.memref_slice %arg12[%c0_i32_34, %c0_i32_35, %c0_i32_36] : memref<2x16x16xf32, #tpu.memory_space<vmem>> -> memref<1x16x16xf32, #tpu.memory_space<vmem>>
    %55 = tpu.memref_slice %arg14[%c0_i32_31] : memref<2x!tpu.dma_semaphore, #tpu.memory_space<semaphore_mem>> -> memref<1x!tpu.dma_semaphore, #tpu.memory_space<semaphore_mem>>
    %56 = tpu.memref_squeeze %55 : memref<1x!tpu.dma_semaphore, #tpu.memory_space<semaphore_mem>> -> memref<!tpu.dma_semaphore, #tpu.memory_space<semaphore_mem>>
    tpu.wait_dma2 semaphore(%56 : memref<!tpu.dma_semaphore, #tpu.memory_space<semaphore_mem>>) src(%53 : memref<1x16x16xf32, #tpu.memory_space<any>>) dst(%54 : memref<1x16x16xf32, #tpu.memory_space<vmem>>)
    %c1_i32_37 = arith.constant 1 : i32
    %c0_i32_38 = arith.constant 0 : i32
    %c0_i32_39 = arith.constant 0 : i32
    %57 = tpu.memref_slice %arg3[%arg0, %5, %c0_i32_38, %c0_i32_39] : memref<2x16x16x16xf32, #tpu.memory_space<any>> -> memref<1x1x16x16xf32, #tpu.memory_space<any>>
    %58 = tpu.memref_squeeze %57 : memref<1x1x16x16xf32, #tpu.memory_space<any>> -> memref<1x16x16xf32, #tpu.memory_space<any>>
    %c1_i32_40 = arith.constant 1 : i32
    %c0_i32_41 = arith.constant 0 : i32
    %c0_i32_42 = arith.constant 0 : i32
    %59 = tpu.memref_slice %arg12[%c1_i32_40, %c0_i32_41, %c0_i32_42] : memref<2x16x16xf32, #tpu.memory_space<vmem>> -> memref<1x16x16xf32, #tpu.memory_space<vmem>>
    %60 = tpu.memref_slice %arg14[%c1_i32_37] : memref<2x!tpu.dma_semaphore, #tpu.memory_space<semaphore_mem>> -> memref<1x!tpu.dma_semaphore, #tpu.memory_space<semaphore_mem>>
    %61 = tpu.memref_squeeze %60 : memref<1x!tpu.dma_semaphore, #tpu.memory_space<semaphore_mem>> -> memref<!tpu.dma_semaphore, #tpu.memory_space<semaphore_mem>>
    tpu.wait_dma2 semaphore(%61 : memref<!tpu.dma_semaphore, #tpu.memory_space<semaphore_mem>>) src(%58 : memref<1x16x16xf32, #tpu.memory_space<any>>) dst(%59 : memref<1x16x16xf32, #tpu.memory_space<vmem>>)
    %c0_43 = arith.constant 0 : index
    %c0_44 = arith.constant 0 : index
    %c0_45 = arith.constant 0 : index
    %62 = vector.load %arg12[%c0_43, %c0_44, %c0_45] : memref<2x16x16xf32, #tpu.memory_space<vmem>>, vector<2x16x16xf32>
    %cst_46 = arith.constant dense<0.000000e+00> : vector<2x16xf32>
    %63 = vector.multi_reduction <add>, %62, %cst_46 [2] : vector<2x16x16xf32> to vector<2x16xf32>
    %64 = vector.shape_cast %63 : vector<2x16xf32> to vector<2x16x1xf32>
    %cst_47 = arith.constant 1.600000e+01 : f32
    %65 = vector.broadcast %cst_47 : f32 to vector<2x16x1xf32>
    %66 = arith.divf %64, %65 : vector<2x16x1xf32>
    %67 = arith.mulf %62, %62 : vector<2x16x16xf32>
    %cst_48 = arith.constant dense<0.000000e+00> : vector<2x16xf32>
    %68 = vector.multi_reduction <add>, %67, %cst_48 [2] : vector<2x16x16xf32> to vector<2x16xf32>
    %69 = vector.shape_cast %68 : vector<2x16xf32> to vector<2x16x1xf32>
    %cst_49 = arith.constant 1.600000e+01 : f32
    %70 = vector.broadcast %cst_49 : f32 to vector<2x16x1xf32>
    %71 = arith.divf %69, %70 : vector<2x16x1xf32>
    %72 = arith.mulf %66, %66 : vector<2x16x1xf32>
    %73 = arith.subf %71, %72 : vector<2x16x1xf32>
    %74 = vector.broadcast %66 : vector<2x16x1xf32> to vector<2x16x16xf32>
    %75 = arith.subf %62, %74 : vector<2x16x16xf32>
    %cst_50 = arith.constant 9.99999974E-6 : f32
    %76 = vector.broadcast %cst_50 : f32 to vector<2x16x1xf32>
    %77 = arith.addf %73, %76 : vector<2x16x1xf32>
    %78 = math.rsqrt %77 : vector<2x16x1xf32>
    %79 = vector.broadcast %78 : vector<2x16x1xf32> to vector<2x16x16xf32>
    %80 = arith.mulf %75, %79 : vector<2x16x16xf32>
    %81 = vector.shape_cast %16 : vector<1x16xf32> to vector<1x1x16xf32>
    %82 = vector.broadcast %81 : vector<1x1x16xf32> to vector<2x16x16xf32>
    %83 = arith.mulf %80, %82 : vector<2x16x16xf32>
    %84 = vector.shape_cast %17 : vector<1x16xf32> to vector<1x1x16xf32>
    %85 = vector.broadcast %84 : vector<1x1x16xf32> to vector<2x16x16xf32>
    %86 = arith.addf %83, %85 : vector<2x16x16xf32>
    %87 = arith.truncf %86 : vector<2x16x16xf32> to vector<2x16x16xbf16>
    %88 = vector.shape_cast %87 : vector<2x16x16xbf16> to vector<32x16xbf16>
    %cst_51 = arith.constant dense<0.000000e+00> : vector<32x16xf32>
    %89 = tpu.matmul %88, %18, %cst_51 {dimension_numbers = #tpu.dot_dimension_numbers<[1], [0], [0], [1], [0, 0, 1, 1], [], []>} : vector<32x16xbf16>, vector<16x16xbf16>, vector<32x16xf32> -> vector<32x16xf32>
    %90 = vector.shape_cast %89 : vector<32x16xf32> to vector<2x16x16xf32>
    %cst_52 = arith.constant dense<0.000000e+00> : vector<32x16xf32>
    %91 = tpu.matmul %88, %19, %cst_52 {dimension_numbers = #tpu.dot_dimension_numbers<[1], [0], [0], [1], [0, 0, 1, 1], [], []>} : vector<32x16xbf16>, vector<16x16xbf16>, vector<32x16xf32> -> vector<32x16xf32>
    %92 = vector.shape_cast %91 : vector<32x16xf32> to vector<2x16x16xf32>
    %c0_i32_53 = arith.constant 0 : i32
    %93 = arith.cmpi sgt, %arg1, %c0_i32_53 : i32
    %cst_54 = arith.constant 1.000000e+00 : f32
    %cst_55 = arith.constant 0.000000e+00 : f32
    %94 = arith.select %93, %cst_54, %cst_55 : f32
    %c1_i32_56 = arith.constant 1 : i32
    %95 = arith.addi %arg1, %c1_i32_56 : i32
    %c2_i32 = arith.constant 2 : i32
    %96 = arith.cmpi slt, %95, %c2_i32 : i32
    %cst_57 = arith.constant 1.000000e+00 : f32
    %cst_58 = arith.constant 0.000000e+00 : f32
    %97 = arith.select %96, %cst_57, %cst_58 : f32
    %98 = vector.extract_strided_slice %90 {offsets = [0, 0, 0], sizes = [1, 16, 16], strides = [1, 1, 1]} : vector<2x16x16xf32> to vector<1x16x16xf32>
    %99 = vector.extract_strided_slice %90 {offsets = [1, 0, 0], sizes = [1, 16, 16], strides = [1, 1, 1]} : vector<2x16x16xf32> to vector<1x16x16xf32>
    %c0_59 = arith.constant 0 : index
    %c0_60 = arith.constant 0 : index
    %c0_61 = arith.constant 0 : index
    %100 = vector.load %arg8[%c0_59, %c0_60, %c0_61] : memref<3x3x16xf32, #tpu.memory_space<vmem>>, vector<3x3x16xf32>
    %101 = vector.broadcast %94 : f32 to vector<1x16x16xf32>
    %102 = arith.mulf %98, %101 : vector<1x16x16xf32>
    %c0_62 = arith.constant 0 : index
    %c8 = arith.constant 8 : index
    %c0_63 = arith.constant 0 : index
    %103 = vector.load %arg13[%c0_62, %c8, %c0_63] : memref<10x32x16xf32, #tpu.memory_space<vmem>>, vector<1x16x16xf32>
    tpu.vector_store %arg13[%c0_62, %c8, %c0_63], %102 {strides = array<i32>} : memref<10x32x16xf32, #tpu.memory_space<vmem>>, vector<1x16x16xf32>,
    %c1 = arith.constant 1 : index
    %c8_64 = arith.constant 8 : index
    %c0_65 = arith.constant 0 : index
    %104 = vector.load %arg13[%c1, %c8_64, %c0_65] : memref<10x32x16xf32, #tpu.memory_space<vmem>>, vector<8x16x16xf32>
    tpu.vector_store %arg13[%c1, %c8_64, %c0_65], %49 {strides = array<i32>} : memref<10x32x16xf32, #tpu.memory_space<vmem>>, vector<8x16x16xf32>,
    %105 = vector.broadcast %97 : f32 to vector<1x16x16xf32>
    %106 = arith.mulf %99, %105 : vector<1x16x16xf32>
    %c9 = arith.constant 9 : index
    %c8_66 = arith.constant 8 : index
    %c0_67 = arith.constant 0 : index
    %107 = vector.load %arg13[%c9, %c8_66, %c0_67] : memref<10x32x16xf32, #tpu.memory_space<vmem>>, vector<1x16x16xf32>
    tpu.vector_store %arg13[%c9, %c8_66, %c0_67], %106 {strides = array<i32>} : memref<10x32x16xf32, #tpu.memory_space<vmem>>, vector<1x16x16xf32>,
    %cst_68 = arith.constant 0.000000e+00 : f32
    %108 = vector.broadcast %cst_68 : f32 to vector<10x1x16xf32>
    %c0_69 = arith.constant 0 : index
    %c7 = arith.constant 7 : index
    %c0_70 = arith.constant 0 : index
    %109 = vector.load %arg13[%c0_69, %c7, %c0_70] : memref<10x32x16xf32, #tpu.memory_space<vmem>>, vector<10x1x16xf32>
    tpu.vector_store %arg13[%c0_69, %c7, %c0_70], %108 {strides = array<i32>} : memref<10x32x16xf32, #tpu.memory_space<vmem>>, vector<10x1x16xf32>,
    %c0_71 = arith.constant 0 : index
    %c24 = arith.constant 24 : index
    %c0_72 = arith.constant 0 : index
    %110 = vector.load %arg13[%c0_71, %c24, %c0_72] : memref<10x32x16xf32, #tpu.memory_space<vmem>>, vector<10x1x16xf32>
    tpu.vector_store %arg13[%c0_71, %c24, %c0_72], %108 {strides = array<i32>} : memref<10x32x16xf32, #tpu.memory_space<vmem>>, vector<10x1x16xf32>,
    %cst_73 = arith.constant 0.000000e+00 : f32
    %111 = vector.broadcast %cst_73 : f32 to vector<8x16x16xf32>
    %c0_74 = arith.constant 0 : index
    %c7_75 = arith.constant 7 : index
    %c0_76 = arith.constant 0 : index
    %112 = vector.load %arg13[%c0_74, %c7_75, %c0_76] : memref<10x32x16xf32, #tpu.memory_space<vmem>>, vector<8x16x16xf32>
    %113 = vector.extract_strided_slice %100 {offsets = [0, 0, 0], sizes = [1, 1, 16], strides = [1, 1, 1]} : vector<3x3x16xf32> to vector<1x1x16xf32>
    %114 = vector.shape_cast %113 : vector<1x1x16xf32> to vector<16xf32>
    %115 = vector.shape_cast %114 : vector<16xf32> to vector<1x1x16xf32>
    %116 = vector.broadcast %115 : vector<1x1x16xf32> to vector<8x16x16xf32>
    %117 = arith.mulf %112, %116 : vector<8x16x16xf32>
    %118 = arith.addf %111, %117 : vector<8x16x16xf32>
    %c0_77 = arith.constant 0 : index
    %c8_78 = arith.constant 8 : index
    %c0_79 = arith.constant 0 : index
    %119 = vector.load %arg13[%c0_77, %c8_78, %c0_79] : memref<10x32x16xf32, #tpu.memory_space<vmem>>, vector<8x16x16xf32>
    %120 = vector.extract_strided_slice %100 {offsets = [0, 1, 0], sizes = [1, 1, 16], strides = [1, 1, 1]} : vector<3x3x16xf32> to vector<1x1x16xf32>
    %121 = vector.shape_cast %120 : vector<1x1x16xf32> to vector<16xf32>
    %122 = vector.shape_cast %121 : vector<16xf32> to vector<1x1x16xf32>
    %123 = vector.broadcast %122 : vector<1x1x16xf32> to vector<8x16x16xf32>
    %124 = arith.mulf %119, %123 : vector<8x16x16xf32>
    %125 = arith.addf %118, %124 : vector<8x16x16xf32>
    %c0_80 = arith.constant 0 : index
    %c9_81 = arith.constant 9 : index
    %c0_82 = arith.constant 0 : index
    %126 = vector.load %arg13[%c0_80, %c9_81, %c0_82] : memref<10x32x16xf32, #tpu.memory_space<vmem>>, vector<8x16x16xf32>
    %127 = vector.extract_strided_slice %100 {offsets = [0, 2, 0], sizes = [1, 1, 16], strides = [1, 1, 1]} : vector<3x3x16xf32> to vector<1x1x16xf32>
    %128 = vector.shape_cast %127 : vector<1x1x16xf32> to vector<16xf32>
    %129 = vector.shape_cast %128 : vector<16xf32> to vector<1x1x16xf32>
    %130 = vector.broadcast %129 : vector<1x1x16xf32> to vector<8x16x16xf32>
    %131 = arith.mulf %126, %130 : vector<8x16x16xf32>
    %132 = arith.addf %125, %131 : vector<8x16x16xf32>
    %c1_83 = arith.constant 1 : index
    %c7_84 = arith.constant 7 : index
    %c0_85 = arith.constant 0 : index
    %133 = vector.load %arg13[%c1_83, %c7_84, %c0_85] : memref<10x32x16xf32, #tpu.memory_space<vmem>>, vector<8x16x16xf32>
    %134 = vector.extract_strided_slice %100 {offsets = [1, 0, 0], sizes = [1, 1, 16], strides = [1, 1, 1]} : vector<3x3x16xf32> to vector<1x1x16xf32>
    %135 = vector.shape_cast %134 : vector<1x1x16xf32> to vector<16xf32>
    %136 = vector.shape_cast %135 : vector<16xf32> to vector<1x1x16xf32>
    %137 = vector.broadcast %136 : vector<1x1x16xf32> to vector<8x16x16xf32>
    %138 = arith.mulf %133, %137 : vector<8x16x16xf32>
    %139 = arith.addf %132, %138 : vector<8x16x16xf32>
    %c1_86 = arith.constant 1 : index
    %c8_87 = arith.constant 8 : index
    %c0_88 = arith.constant 0 : index
    %140 = vector.load %arg13[%c1_86, %c8_87, %c0_88] : memref<10x32x16xf32, #tpu.memory_space<vmem>>, vector<8x16x16xf32>
    %141 = vector.extract_strided_slice %100 {offsets = [1, 1, 0], sizes = [1, 1, 16], strides = [1, 1, 1]} : vector<3x3x16xf32> to vector<1x1x16xf32>
    %142 = vector.shape_cast %141 : vector<1x1x16xf32> to vector<16xf32>
    %143 = vector.shape_cast %142 : vector<16xf32> to vector<1x1x16xf32>
    %144 = vector.broadcast %143 : vector<1x1x16xf32> to vector<8x16x16xf32>
    %145 = arith.mulf %140, %144 : vector<8x16x16xf32>
    %146 = arith.addf %139, %145 : vector<8x16x16xf32>
    %c1_89 = arith.constant 1 : index
    %c9_90 = arith.constant 9 : index
    %c0_91 = arith.constant 0 : index
    %147 = vector.load %arg13[%c1_89, %c9_90, %c0_91] : memref<10x32x16xf32, #tpu.memory_space<vmem>>, vector<8x16x16xf32>
    %148 = vector.extract_strided_slice %100 {offsets = [1, 2, 0], sizes = [1, 1, 16], strides = [1, 1, 1]} : vector<3x3x16xf32> to vector<1x1x16xf32>
    %149 = vector.shape_cast %148 : vector<1x1x16xf32> to vector<16xf32>
    %150 = vector.shape_cast %149 : vector<16xf32> to vector<1x1x16xf32>
    %151 = vector.broadcast %150 : vector<1x1x16xf32> to vector<8x16x16xf32>
    %152 = arith.mulf %147, %151 : vector<8x16x16xf32>
    %153 = arith.addf %146, %152 : vector<8x16x16xf32>
    %c2 = arith.constant 2 : index
    %c7_92 = arith.constant 7 : index
    %c0_93 = arith.constant 0 : index
    %154 = vector.load %arg13[%c2, %c7_92, %c0_93] : memref<10x32x16xf32, #tpu.memory_space<vmem>>, vector<8x16x16xf32>
    %155 = vector.extract_strided_slice %100 {offsets = [2, 0, 0], sizes = [1, 1, 16], strides = [1, 1, 1]} : vector<3x3x16xf32> to vector<1x1x16xf32>
    %156 = vector.shape_cast %155 : vector<1x1x16xf32> to vector<16xf32>
    %157 = vector.shape_cast %156 : vector<16xf32> to vector<1x1x16xf32>
    %158 = vector.broadcast %157 : vector<1x1x16xf32> to vector<8x16x16xf32>
    %159 = arith.mulf %154, %158 : vector<8x16x16xf32>
    %160 = arith.addf %153, %159 : vector<8x16x16xf32>
    %c2_94 = arith.constant 2 : index
    %c8_95 = arith.constant 8 : index
    %c0_96 = arith.constant 0 : index
    %161 = vector.load %arg13[%c2_94, %c8_95, %c0_96] : memref<10x32x16xf32, #tpu.memory_space<vmem>>, vector<8x16x16xf32>
    %162 = vector.extract_strided_slice %100 {offsets = [2, 1, 0], sizes = [1, 1, 16], strides = [1, 1, 1]} : vector<3x3x16xf32> to vector<1x1x16xf32>
    %163 = vector.shape_cast %162 : vector<1x1x16xf32> to vector<16xf32>
    %164 = vector.shape_cast %163 : vector<16xf32> to vector<1x1x16xf32>
    %165 = vector.broadcast %164 : vector<1x1x16xf32> to vector<8x16x16xf32>
    %166 = arith.mulf %161, %165 : vector<8x16x16xf32>
    %167 = arith.addf %160, %166 : vector<8x16x16xf32>
    %c2_97 = arith.constant 2 : index
    %c9_98 = arith.constant 9 : index
    %c0_99 = arith.constant 0 : index
    %168 = vector.load %arg13[%c2_97, %c9_98, %c0_99] : memref<10x32x16xf32, #tpu.memory_space<vmem>>, vector<8x16x16xf32>
    %169 = vector.extract_strided_slice %100 {offsets = [2, 2, 0], sizes = [1, 1, 16], strides = [1, 1, 1]} : vector<3x3x16xf32> to vector<1x1x16xf32>
    %170 = vector.shape_cast %169 : vector<1x1x16xf32> to vector<16xf32>
    %171 = vector.shape_cast %170 : vector<16xf32> to vector<1x1x16xf32>
    %172 = vector.broadcast %171 : vector<1x1x16xf32> to vector<8x16x16xf32>
    %173 = arith.mulf %168, %172 : vector<8x16x16xf32>
    %174 = arith.addf %167, %173 : vector<8x16x16xf32>
    %175 = vector.extract_strided_slice %92 {offsets = [0, 0, 0], sizes = [1, 16, 16], strides = [1, 1, 1]} : vector<2x16x16xf32> to vector<1x16x16xf32>
    %176 = vector.extract_strided_slice %92 {offsets = [1, 0, 0], sizes = [1, 16, 16], strides = [1, 1, 1]} : vector<2x16x16xf32> to vector<1x16x16xf32>
    %c0_100 = arith.constant 0 : index
    %c0_101 = arith.constant 0 : index
    %c0_102 = arith.constant 0 : index
    %177 = vector.load %arg9[%c0_100, %c0_101, %c0_102] : memref<3x3x16xf32, #tpu.memory_space<vmem>>, vector<3x3x16xf32>
    %178 = vector.broadcast %94 : f32 to vector<1x16x16xf32>
    %179 = arith.mulf %175, %178 : vector<1x16x16xf32>
    %c0_103 = arith.constant 0 : index
    %c8_104 = arith.constant 8 : index
    %c0_105 = arith.constant 0 : index
    %180 = vector.load %arg13[%c0_103, %c8_104, %c0_105] : memref<10x32x16xf32, #tpu.memory_space<vmem>>, vector<1x16x16xf32>
    tpu.vector_store %arg13[%c0_103, %c8_104, %c0_105], %179 {strides = array<i32>} : memref<10x32x16xf32, #tpu.memory_space<vmem>>, vector<1x16x16xf32>,
    %c1_106 = arith.constant 1 : index
    %c8_107 = arith.constant 8 : index
    %c0_108 = arith.constant 0 : index
    %181 = vector.load %arg13[%c1_106, %c8_107, %c0_108] : memref<10x32x16xf32, #tpu.memory_space<vmem>>, vector<8x16x16xf32>
    tpu.vector_store %arg13[%c1_106, %c8_107, %c0_108], %51 {strides = array<i32>} : memref<10x32x16xf32, #tpu.memory_space<vmem>>, vector<8x16x16xf32>,
    %182 = vector.broadcast %97 : f32 to vector<1x16x16xf32>
    %183 = arith.mulf %176, %182 : vector<1x16x16xf32>
    %c9_109 = arith.constant 9 : index
    %c8_110 = arith.constant 8 : index
    %c0_111 = arith.constant 0 : index
    %184 = vector.load %arg13[%c9_109, %c8_110, %c0_111] : memref<10x32x16xf32, #tpu.memory_space<vmem>>, vector<1x16x16xf32>
    tpu.vector_store %arg13[%c9_109, %c8_110, %c0_111], %183 {strides = array<i32>} : memref<10x32x16xf32, #tpu.memory_space<vmem>>, vector<1x16x16xf32>,
    %cst_112 = arith.constant 0.000000e+00 : f32
    %185 = vector.broadcast %cst_112 : f32 to vector<10x1x16xf32>
    %c0_113 = arith.constant 0 : index
    %c7_114 = arith.constant 7 : index
    %c0_115 = arith.constant 0 : index
    %186 = vector.load %arg13[%c0_113, %c7_114, %c0_115] : memref<10x32x16xf32, #tpu.memory_space<vmem>>, vector<10x1x16xf32>
    tpu.vector_store %arg13[%c0_113, %c7_114, %c0_115], %185 {strides = array<i32>} : memref<10x32x16xf32, #tpu.memory_space<vmem>>, vector<10x1x16xf32>,
    %c0_116 = arith.constant 0 : index
    %c24_117 = arith.constant 24 : index
    %c0_118 = arith.constant 0 : index
    %187 = vector.load %arg13[%c0_116, %c24_117, %c0_118] : memref<10x32x16xf32, #tpu.memory_space<vmem>>, vector<10x1x16xf32>
    tpu.vector_store %arg13[%c0_116, %c24_117, %c0_118], %185 {strides = array<i32>} : memref<10x32x16xf32, #tpu.memory_space<vmem>>, vector<10x1x16xf32>,
    %cst_119 = arith.constant 0.000000e+00 : f32
    %188 = vector.broadcast %cst_119 : f32 to vector<8x16x16xf32>
    %c0_120 = arith.constant 0 : index
    %c7_121 = arith.constant 7 : index
    %c0_122 = arith.constant 0 : index
    %189 = vector.load %arg13[%c0_120, %c7_121, %c0_122] : memref<10x32x16xf32, #tpu.memory_space<vmem>>, vector<8x16x16xf32>
    %190 = vector.extract_strided_slice %177 {offsets = [0, 0, 0], sizes = [1, 1, 16], strides = [1, 1, 1]} : vector<3x3x16xf32> to vector<1x1x16xf32>
    %191 = vector.shape_cast %190 : vector<1x1x16xf32> to vector<16xf32>
    %192 = vector.shape_cast %191 : vector<16xf32> to vector<1x1x16xf32>
    %193 = vector.broadcast %192 : vector<1x1x16xf32> to vector<8x16x16xf32>
    %194 = arith.mulf %189, %193 : vector<8x16x16xf32>
    %195 = arith.addf %188, %194 : vector<8x16x16xf32>
    %c0_123 = arith.constant 0 : index
    %c8_124 = arith.constant 8 : index
    %c0_125 = arith.constant 0 : index
    %196 = vector.load %arg13[%c0_123, %c8_124, %c0_125] : memref<10x32x16xf32, #tpu.memory_space<vmem>>, vector<8x16x16xf32>
    %197 = vector.extract_strided_slice %177 {offsets = [0, 1, 0], sizes = [1, 1, 16], strides = [1, 1, 1]} : vector<3x3x16xf32> to vector<1x1x16xf32>
    %198 = vector.shape_cast %197 : vector<1x1x16xf32> to vector<16xf32>
    %199 = vector.shape_cast %198 : vector<16xf32> to vector<1x1x16xf32>
    %200 = vector.broadcast %199 : vector<1x1x16xf32> to vector<8x16x16xf32>
    %201 = arith.mulf %196, %200 : vector<8x16x16xf32>
    %202 = arith.addf %195, %201 : vector<8x16x16xf32>
    %c0_126 = arith.constant 0 : index
    %c9_127 = arith.constant 9 : index
    %c0_128 = arith.constant 0 : index
    %203 = vector.load %arg13[%c0_126, %c9_127, %c0_128] : memref<10x32x16xf32, #tpu.memory_space<vmem>>, vector<8x16x16xf32>
    %204 = vector.extract_strided_slice %177 {offsets = [0, 2, 0], sizes = [1, 1, 16], strides = [1, 1, 1]} : vector<3x3x16xf32> to vector<1x1x16xf32>
    %205 = vector.shape_cast %204 : vector<1x1x16xf32> to vector<16xf32>
    %206 = vector.shape_cast %205 : vector<16xf32> to vector<1x1x16xf32>
    %207 = vector.broadcast %206 : vector<1x1x16xf32> to vector<8x16x16xf32>
    %208 = arith.mulf %203, %207 : vector<8x16x16xf32>
    %209 = arith.addf %202, %208 : vector<8x16x16xf32>
    %c1_129 = arith.constant 1 : index
    %c7_130 = arith.constant 7 : index
    %c0_131 = arith.constant 0 : index
    %210 = vector.load %arg13[%c1_129, %c7_130, %c0_131] : memref<10x32x16xf32, #tpu.memory_space<vmem>>, vector<8x16x16xf32>
    %211 = vector.extract_strided_slice %177 {offsets = [1, 0, 0], sizes = [1, 1, 16], strides = [1, 1, 1]} : vector<3x3x16xf32> to vector<1x1x16xf32>
    %212 = vector.shape_cast %211 : vector<1x1x16xf32> to vector<16xf32>
    %213 = vector.shape_cast %212 : vector<16xf32> to vector<1x1x16xf32>
    %214 = vector.broadcast %213 : vector<1x1x16xf32> to vector<8x16x16xf32>
    %215 = arith.mulf %210, %214 : vector<8x16x16xf32>
    %216 = arith.addf %209, %215 : vector<8x16x16xf32>
    %c1_132 = arith.constant 1 : index
    %c8_133 = arith.constant 8 : index
    %c0_134 = arith.constant 0 : index
    %217 = vector.load %arg13[%c1_132, %c8_133, %c0_134] : memref<10x32x16xf32, #tpu.memory_space<vmem>>, vector<8x16x16xf32>
    %218 = vector.extract_strided_slice %177 {offsets = [1, 1, 0], sizes = [1, 1, 16], strides = [1, 1, 1]} : vector<3x3x16xf32> to vector<1x1x16xf32>
    %219 = vector.shape_cast %218 : vector<1x1x16xf32> to vector<16xf32>
    %220 = vector.shape_cast %219 : vector<16xf32> to vector<1x1x16xf32>
    %221 = vector.broadcast %220 : vector<1x1x16xf32> to vector<8x16x16xf32>
    %222 = arith.mulf %217, %221 : vector<8x16x16xf32>
    %223 = arith.addf %216, %222 : vector<8x16x16xf32>
    %c1_135 = arith.constant 1 : index
    %c9_136 = arith.constant 9 : index
    %c0_137 = arith.constant 0 : index
    %224 = vector.load %arg13[%c1_135, %c9_136, %c0_137] : memref<10x32x16xf32, #tpu.memory_space<vmem>>, vector<8x16x16xf32>
    %225 = vector.extract_strided_slice %177 {offsets = [1, 2, 0], sizes = [1, 1, 16], strides = [1, 1, 1]} : vector<3x3x16xf32> to vector<1x1x16xf32>
    %226 = vector.shape_cast %225 : vector<1x1x16xf32> to vector<16xf32>
    %227 = vector.shape_cast %226 : vector<16xf32> to vector<1x1x16xf32>
    %228 = vector.broadcast %227 : vector<1x1x16xf32> to vector<8x16x16xf32>
    %229 = arith.mulf %224, %228 : vector<8x16x16xf32>
    %230 = arith.addf %223, %229 : vector<8x16x16xf32>
    %c2_138 = arith.constant 2 : index
    %c7_139 = arith.constant 7 : index
    %c0_140 = arith.constant 0 : index
    %231 = vector.load %arg13[%c2_138, %c7_139, %c0_140] : memref<10x32x16xf32, #tpu.memory_space<vmem>>, vector<8x16x16xf32>
    %232 = vector.extract_strided_slice %177 {offsets = [2, 0, 0], sizes = [1, 1, 16], strides = [1, 1, 1]} : vector<3x3x16xf32> to vector<1x1x16xf32>
    %233 = vector.shape_cast %232 : vector<1x1x16xf32> to vector<16xf32>
    %234 = vector.shape_cast %233 : vector<16xf32> to vector<1x1x16xf32>
    %235 = vector.broadcast %234 : vector<1x1x16xf32> to vector<8x16x16xf32>
    %236 = arith.mulf %231, %235 : vector<8x16x16xf32>
    %237 = arith.addf %230, %236 : vector<8x16x16xf32>
    %c2_141 = arith.constant 2 : index
    %c8_142 = arith.constant 8 : index
    %c0_143 = arith.constant 0 : index
    %238 = vector.load %arg13[%c2_141, %c8_142, %c0_143] : memref<10x32x16xf32, #tpu.memory_space<vmem>>, vector<8x16x16xf32>
    %239 = vector.extract_strided_slice %177 {offsets = [2, 1, 0], sizes = [1, 1, 16], strides = [1, 1, 1]} : vector<3x3x16xf32> to vector<1x1x16xf32>
    %240 = vector.shape_cast %239 : vector<1x1x16xf32> to vector<16xf32>
    %241 = vector.shape_cast %240 : vector<16xf32> to vector<1x1x16xf32>
    %242 = vector.broadcast %241 : vector<1x1x16xf32> to vector<8x16x16xf32>
    %243 = arith.mulf %238, %242 : vector<8x16x16xf32>
    %244 = arith.addf %237, %243 : vector<8x16x16xf32>
    %c2_144 = arith.constant 2 : index
    %c9_145 = arith.constant 9 : index
    %c0_146 = arith.constant 0 : index
    %245 = vector.load %arg13[%c2_144, %c9_145, %c0_146] : memref<10x32x16xf32, #tpu.memory_space<vmem>>, vector<8x16x16xf32>
    %246 = vector.extract_strided_slice %177 {offsets = [2, 2, 0], sizes = [1, 1, 16], strides = [1, 1, 1]} : vector<3x3x16xf32> to vector<1x1x16xf32>
    %247 = vector.shape_cast %246 : vector<1x1x16xf32> to vector<16xf32>
    %248 = vector.shape_cast %247 : vector<16xf32> to vector<1x1x16xf32>
    %249 = vector.broadcast %248 : vector<1x1x16xf32> to vector<8x16x16xf32>
    %250 = arith.mulf %245, %249 : vector<8x16x16xf32>
    %251 = arith.addf %244, %250 : vector<8x16x16xf32>
    %252 = arith.mulf %174, %251 : vector<8x16x16xf32>
    %253 = arith.truncf %252 : vector<8x16x16xf32> to vector<8x16x16xbf16>
    %254 = vector.shape_cast %253 : vector<8x16x16xbf16> to vector<128x16xbf16>
    %c0_147 = arith.constant 0 : index
    %c0_148 = arith.constant 0 : index
    %255 = vector.load %arg10[%c0_147, %c0_148] : memref<16x16xbf16, #tpu.memory_space<vmem>>, vector<16x16xbf16>
    %cst_149 = arith.constant dense<0.000000e+00> : vector<128x16xf32>
    %256 = tpu.matmul %254, %255, %cst_149 {dimension_numbers = #tpu.dot_dimension_numbers<[1], [0], [0], [1], [0, 0, 1, 1], [], []>} : vector<128x16xbf16>, vector<16x16xbf16>, vector<128x16xf32> -> vector<128x16xf32>
    %257 = vector.shape_cast %256 : vector<128x16xf32> to vector<8x16x16xf32>
    %c0_150 = arith.constant 0 : index
    %c0_151 = arith.constant 0 : index
    %c0_152 = arith.constant 0 : index
    %c0_153 = arith.constant 0 : index
    %258 = vector.load %arg2[%c0_150, %c0_151, %c0_152, %c0_153] : memref<1x8x16x16xf32, #tpu.memory_space<vmem>>, vector<1x8x16x16xf32>
    %259 = vector.shape_cast %258 : vector<1x8x16x16xf32> to vector<8x16x16xf32>
    %260 = arith.addf %259, %257 : vector<8x16x16xf32>
    %c0_154 = arith.constant 0 : index
    %c0_155 = arith.constant 0 : index
    %c0_156 = arith.constant 0 : index
    %c0_157 = arith.constant 0 : index
    %261 = vector.load %arg11[%c0_154, %c0_155, %c0_156, %c0_157] : memref<1x8x16x16xf32, #tpu.memory_space<vmem>>, vector<1x8x16x16xf32>
    %262 = vector.shape_cast %261 : vector<1x8x16x16xf32> to vector<8x16x16xf32>
    %263 = vector.shape_cast %260 : vector<8x16x16xf32> to vector<1x8x16x16xf32>
    tpu.vector_store %arg11[%c0_154, %c0_155, %c0_156, %c0_157], %263 {strides = array<i32>} : memref<1x8x16x16xf32, #tpu.memory_space<vmem>>, vector<1x8x16x16xf32>,
    return
  }
  func.func @transform_0(%arg0: i32, %arg1: i32) -> (i32, i32, i32, i32) {
    %c0_i32 = arith.constant 0 : i32
    %c0_i32_0 = arith.constant 0 : i32
    %c0_i32_1 = arith.constant 0 : i32
    return %arg0, %arg1, %c0_i32, %c0_i32_0 : i32, i32, i32, i32
  }
  func.func @transform_2(%arg0: i32, %arg1: i32) -> (i32, i32) {
    %c0_i32 = arith.constant 0 : i32
    %c0_i32_0 = arith.constant 0 : i32
    %c0_i32_1 = arith.constant 0 : i32
    return %c0_i32, %c0_i32_0 : i32, i32
  }
  func.func @transform_3(%arg0: i32, %arg1: i32) -> (i32, i32) {
    %c0_i32 = arith.constant 0 : i32
    %c0_i32_0 = arith.constant 0 : i32
    %c0_i32_1 = arith.constant 0 : i32
    return %c0_i32, %c0_i32_0 : i32, i32
  }
  func.func @transform_4(%arg0: i32, %arg1: i32) -> (i32, i32) {
    %c0_i32 = arith.constant 0 : i32
    %c0_i32_0 = arith.constant 0 : i32
    %c0_i32_1 = arith.constant 0 : i32
    return %c0_i32, %c0_i32_0 : i32, i32
  }
  func.func @transform_5(%arg0: i32, %arg1: i32) -> (i32, i32) {
    %c0_i32 = arith.constant 0 : i32
    %c0_i32_0 = arith.constant 0 : i32
    %c0_i32_1 = arith.constant 0 : i32
    return %c0_i32, %c0_i32_0 : i32, i32
  }
  func.func @transform_6(%arg0: i32, %arg1: i32) -> (i32, i32, i32) {
    %c0_i32 = arith.constant 0 : i32
    %c0_i32_0 = arith.constant 0 : i32
    %c0_i32_1 = arith.constant 0 : i32
    %c0_i32_2 = arith.constant 0 : i32
    return %c0_i32, %c0_i32_0, %c0_i32_1 : i32, i32, i32
  }
  func.func @transform_7(%arg0: i32, %arg1: i32) -> (i32, i32, i32) {
    %c0_i32 = arith.constant 0 : i32
    %c0_i32_0 = arith.constant 0 : i32
    %c0_i32_1 = arith.constant 0 : i32
    %c0_i32_2 = arith.constant 0 : i32
    return %c0_i32, %c0_i32_0, %c0_i32_1 : i32, i32, i32
  }
  func.func @transform_8(%arg0: i32, %arg1: i32) -> (i32, i32) {
    %c0_i32 = arith.constant 0 : i32
    %c0_i32_0 = arith.constant 0 : i32
    %c0_i32_1 = arith.constant 0 : i32
    return %c0_i32, %c0_i32_0 : i32, i32
  }
  func.func @transform_9(%arg0: i32, %arg1: i32) -> (i32, i32, i32, i32) {
    %c0_i32 = arith.constant 0 : i32
    %c0_i32_0 = arith.constant 0 : i32
    %c0_i32_1 = arith.constant 0 : i32
    return %arg0, %arg1, %c0_i32, %c0_i32_0 : i32, i32, i32, i32
  }
}

</mosaic_0001>

<bundles_post_ra>
// kernel: tpu_custom_call.1
= control target key start
LH: loop header
LB: loop body
LE: loop exit
PB: predicated region body
PF: predicated region fallthrough
CT: control target
= control target key end

     0   :  { %s5322_s0 = inlined_call_operand.hbm [shape: f32[2,16,16,16], index: 0, kind: input, shape index: {}]   ;;  %s5323_s1 = inlined_call_operand.hbm [shape: f32[2,16,16,16], index: 1, kind: input, shape index: {}]   ;;  %s5324_s2 = inlined_call_operand.vmem [shape: f32[1,16], index: 2, kind: input, shape index: {}]   ;;  %s5325_s3 = inlined_call_operand.vmem [shape: f32[1,16], index: 3, kind: input, shape index: {}]   ;;  %s5326_s4 = inlined_call_operand.hbm [shape: bf16[16,16], index: 4, kind: input, shape index: {}]   ;;  %s5327_s5 = inlined_call_operand.hbm [shape: bf16[16,16], index: 5, kind: input, shape index: {}]   ;;  %s5328_s6 = inlined_call_operand.hbm [shape: f32[3,3,16], index: 6, kind: input, shape index: {}]   ;;  %s5329_s7 = inlined_call_operand.hbm [shape: f32[3,3,16], index: 7, kind: input, shape index: {}]   ;;  %s5330_s8 = inlined_call_operand.hbm [shape: bf16[16,16], index: 8, kind: input, shape index: {}]   ;;  %s5331_s9 = inlined_call_operand.hbm [shape: f32[2,16,16,16], index: 9, kind: output, shape index: {}]  }
   0x1   :  { %5467 = sst [smem:[#allocation109_spill]] %s5323_s1 }
   0x2   :  { %5468 = sst [smem:[#allocation110_spill]] %s5326_s4 }
   0x3   :  { %5469 = sst [smem:[#allocation111_spill]] %s5327_s5 }
   0x4   :  { %5470 = sst [smem:[#allocation112_spill]] %s5328_s6 }
   0x5   :  { %5471 = sst [smem:[#allocation113_spill]] %s5329_s7 }
   0x6   :  { %5472 = sst [smem:[#allocation114_spill]] %s5330_s8 }
   0x7   :  { %5473 = sst [smem:[#allocation115_spill]] %s5331_s9 }
   0x8   :  { %14 = vsyncpa [#allocation6], 0 }
   0x9   :  { %16 = vsyncpa [#allocation6 + $0x1], 0 }
   0xa   :  { %17 = vsyncpa [#allocation9], 0 }
   0xb   :  { %18 = vsyncpa [#allocation12], 0 }
   0xc   :  { %19 = vsyncpa [#allocation15], 0 }
   0xd   :  { %20 = vsyncpa [#allocation7], 0 }
   0xe   :  { %22 = vsyncpa [#allocation7 + $0x1], 0  ;;  %s3330_s30 = smov 0   ;;  %s3332_s10 = smov 0  }
   0xf   :  { %s3334_s11 = smov 0   ;;  %s3336_s12 = smov 0  }
  0x10   :  { %s3338_s13 = smov 0   ;;  %s3340_s14 = smov 0  }
  0x11   :  { %s3342_s15 = smov 0   ;;  %s3344_s16 = smov 0  }
  0x12 LB: > { %5474 = sst [smem:[#allocation30_spill]] %s3235_s30  ;;  %s5332_s17 = sadd.s32 4294967295, %s3263_s16   ;;  %s3263_s16 = sphi %s3344_s16, %s28_s16   ;;  %s3259_s15 = sphi %s3342_s15, %s5717_s15   ;;  %s3255_s14 = sphi %s3340_s14, %s5716_s14   ;;  %s3251_s13 = sphi %s3338_s13, %s5715_s13   ;;  %s3247_s12 = sphi %s3336_s12, %s5714_s12   ;;  %s3243_s11 = sphi %s3334_s11, %s5713_s11   ;;  %s3239_s10 = sphi %s3332_s10, %s5712_s10   ;;  %s3235_s30 = sphi %s3330_s30, %s5711_s30  }
  0x13   : > { %5475 = sst [smem:[#allocation31_spill]] %s3263_s16  ;;  %p2656_p0 = scmp.ge.s32.totalorder %s3263_s16, 1 }
  0x14   : > { %p3374_p1 = scmp.eq.s32.totalorder %s5332_s17, 0  ;;  %p248_p2 = scmp.lt.s32.totalorder %s3263_s16, 5 }
  0x15   : > { %s5477_s4 = sld [smem:[#allocation110_spill]]  ;;  %s3265_s23 = smov [#allocation8]  }
  0x16   : > { %p3382_p3 = pnand %p2656_p0, %p248_p2  ;;  %s267_s24 = sshll.u32 %s3265_s23, 4  ;;  %s268_s24 = int_to_ptr.vmem [resolvable:$true] %s267_s24 }
  0x17   : > { %s5480_s6 = sld [smem:[#allocation112_spill]]  ;;  %s3266_s29 = smov 64  }
  0x18   : > { %p2762_p4 = pneg %p3382_p3  ;;  %s3267_s19 = smov 4  }
  0x19   : > { %s3268_s20 = smov [#allocation11]   ;;  %s5481_s5 = sld [smem:[#allocation111_spill]] }
  0x1a   : > { %p3390_p5 = pnand %p2762_p4, %p3374_p1  ;;  %s295_s23 = sshll.u32 %s3268_s20, 4  ;;  %s296_s23 = int_to_ptr.vmem [resolvable:$true] %s295_s23 }
  0x1b   : > { %s265_s21 = sshll.u32 %s5477_s4, 4  ;;  %s5482_s7 = sld [smem:[#allocation113_spill]]  ;;  %s266_s21 = int_to_ptr.hbm [resolvable:$true] %s265_s21 }
  0x1c   : > { %2765 = dma.hbm_to_vmem [thread:$0]  (!%p3390_p5), %s266_s21, 128, %s268_s24, [#allocation9], %s3266_s29, %s3266_s29, %s3267_s19  }
  0x1d   : > { %s293_s28 = sshll.u32 %s5480_s6, 4  ;;  %s3269_s1 = smov [#allocation10]   ;;  %s294_s28 = int_to_ptr.hbm [resolvable:$true] %s293_s28 }
  0x1e   : > { %2771 = dma.hbm_to_vmem [thread:$0]  (!%p3390_p5), %s294_s28, 192, %s296_s23, [#allocation12], %s3266_s29, %s3266_s29, %s3267_s19  }
  0x1f   : > { %s279_s9 = sshll.u32 %s5481_s5, 4  ;;  %s281_s21 = sshll.u32 %s3269_s1, 4  ;;  %s280_s9 = int_to_ptr.hbm [resolvable:$true] %s279_s9  ;;  %s282_s21 = int_to_ptr.vmem [resolvable:$true] %s281_s21 }
  0x20   : > { %2768 = dma.hbm_to_vmem [thread:$0]  (!%p3390_p5), %s280_s9, 128, %s282_s21, [#allocation9], %s3266_s29, %s3266_s29, %s3267_s19  }
  0x21   : > { %s307_s6 = sshll.u32 %s5482_s7, 4  ;;  %s3270_s4 = smov [#allocation13]   ;;  %s308_s6 = int_to_ptr.hbm [resolvable:$true] %s307_s6 }
  0x22   : > { %s309_s17 = sshll.u32 %s3270_s4, 4  ;;  %s5483_s8 = sld [smem:[#allocation114_spill]]  ;;  %s310_s17 = int_to_ptr.vmem [resolvable:$true] %s309_s17 }
  0x23   : > { %2774 = dma.hbm_to_vmem [thread:$0]  (!%p3390_p5), %s308_s6, 192, %s310_s17, [#allocation12], %s3266_s29, %s3266_s29, %s3267_s19  }
  0x24   : > { %s3271_s1 = smov [#allocation14]   ;;  %s2655_s9 = sadd.s32 4294967294, %s3263_s16  }
  0x25   : > { %s323_s23 = sshll.u32 %s3271_s1, 4  ;;  %s37_s26 = sadd.s32 1, %s3255_s14  ;;  %s324_s23 = int_to_ptr.vmem [resolvable:$true] %s323_s23 }
  0x26   : > { %s40_s27 = sadd.s32 1, %s3259_s15  ;;  %p38_p6 = scmp.ge.s32.totalorder %s37_s26, 2 }
  0x27   : > { %s49_s21 = sadd.s32 1, %s3243_s11  ;;  %p56_p7 = scmp.ne.s32.totalorder %s3243_s11, %s3239_s10 }
  0x28   : > { %s321_s20 = sshll.u32 %s5483_s8, 4  ;;  %p57_p8 = scmp.eq.s32.totalorder %s3263_s16, 0  ;;  %s322_s20 = int_to_ptr.hbm [resolvable:$true] %s321_s20 }
  0x29   : > { %2777 = dma.hbm_to_vmem [thread:$0]  (!%p3390_p5), %s322_s20, 128, %s324_s23, [#allocation15], %s3266_s29, %s3266_s29, %s3267_s19  }
  0x2a   : > { %s5719_s26 = smov (%p38_p6, %s37_s26), 0  ;;  %s5721_s27 = smov (!%p38_p6, %s40_s27), %s3259_s15 }
  0x2b   : > { %5484 = sst [smem:[#allocation32_spill]] %s5719_s26  ;;  %s45_s6 = ssub.s32 %s3255_s14, %s5719_s26 }
  0x2c   : > { %p3428_p9 = por %p57_p8, %p56_p7  ;;  %p42_p10 = scmp.ge.s32.totalorder %s5721_s27, 2 }
  0x2d   : > { %p62_p11 = scmp.ne.s32.totalorder %s3239_s10, %s3235_s30  ;;  %s5486_s29 = sadd.s32 4294967295, %s3263_s16  }
  0x2e   : > { %p235_p12 = scmp.eq.s32.totalorder %s5486_s29, 3  ;;  %p241_p13 = scmp.eq.s32.totalorder %s2655_s9, 3 }
  0x2f   : > { %s5723_s27 = smov (%p42_p10, %s5721_s27), 0  ;;  %p3440_p0 = por %p3374_p1, %p62_p11 }
  0x30   : > { %5487 = sst [smem:[#allocation33_spill]] %s5723_s27  ;;  %p3444_p2 = por %p235_p12, %p56_p7 }
  0x31   : > { %s44_s17 = ssub.s32 %s3259_s15, %s5723_s27  ;;  %p3450_p4 = por %p241_p13, %p62_p11 }
  0x32   : > { %s46_s28 = sor.u32 %s45_s6, %s44_s17  ;;  %p2791_p5 = scmp.lt.s32.totalorder %s3263_s16, 4 }
  0x33   : > { %s5490_s24 = scalar_select %p3450_p4, 1, 0 }
  0x34   : > { %p47_p6 = scmp.eq.s32.totalorder %s46_s28, 0  ;;  %s337_s20 = sand.u32 1, %s3243_s11  }
  0x35   : > { %5491 = sst [smem:[#allocation34_spill]] %s5490_s24  ;;  %s2663_s1 = sshll.u32 %s337_s20, 7 }
  0x36   : > { %s3457_s23 = scalar_select %p47_p6, %s3243_s11, %s49_s21  }
  0x37   : > { %s2730_s9 = sshll.u32 %s3255_s14, 4  ;;  %s2666_s29 = sshll.u32 %s3259_s15, 5 }
  0x38   : > { %s341_s5 = scalar_lea.vmem [#allocation5], %s2663_s1  ;;  %s347_s8 = sadd.s32 %s2730_s9, %s2666_s29 }
  0x39   : > { %s352_s7 = sshll.u32 %s341_s5, 4  ;;  %s2667_s26 = sshll.u32 %s347_s8, 3  ;;  %s353_s7 = int_to_ptr.vmem [resolvable:$true] %s352_s7 }
  0x3a   : > { %p2779_p7 = pnand %p2791_p5, %p3428_p9  ;;  %s349_s24 = scalar_lea.hbm %s5322_s0, %s2667_s26 }
  0x3b   : > { %s350_s6 = sshll.u32 %s349_s24, 4  ;;  %s338_s17 = scalar_lea.sflag [#allocation6], %s337_s20  ;;  %s351_s6 = int_to_ptr.hbm [resolvable:$true] %s350_s6 }
  0x3c   : > { %s3272_s28 = smov 128   ;;  %s3273_s16 = smov 8  }
  0x3d   : > { %2781 = dma.hbm_to_vmem [thread:$0]  (!%p2779_p7), %s351_s6, 2048, %s353_s7, %s338_s17, %s3272_s28, %s3272_s28, %s3273_s16  }
  0x3e   : > { %364 = sbr.rel (%p3382_p3) target bundleno = 1067 (0x42b), region = 52 }
  0x43   : > { %s3469_s5 = sand.u32 1, %s3239_s10  }
  0x44   : > { %s5341_s8 = sshll.u32 %s3469_s5, 7  ;;  %s367_s21 = scalar_lea.sflag [#allocation6], %s3469_s5 }
  0x45   : > { %s3475_s30 = scalar_lea.vmem [#allocation5], %s5341_s8 }
  0x46   : > { %3210 = dma.done.wait (%p3440_p0), %s367_s21, 2048  }
  0x47   : > { %3212 = vsyncadd (%p3440_p0), %s367_s21, 4294965248 }
  0x48   : > { %3214 = dma.done.wait (%p3374_p1), [#allocation9], 256  }
  0x49   : > { %3216 = vsyncadd (%p3374_p1), [#allocation9], 4294967040 }
  0x4a   : > { %3218 = dma.done.wait (%p3374_p1), [#allocation12], 384  }
  0x4b   : > { %3220 = vsyncadd (%p3374_p1), [#allocation12], 4294966912 }
  0x4c   : > { %3222 = dma.done.wait (%p3374_p1), [#allocation15], 128  }
  0x4d   : > { %3224 = vsyncadd (%p3374_p1), [#allocation15], 4294967168  ;;  %vm496_vm0 = vcmask 130048   ;;  %v3494_v0 = vld [vmem:[%s3475_s30] sm:$0xff]  ;;  %v3497_v1 = vld [vmem:[%s3475_s30 + $0x10] sm:$0xff]  ;;  %s2676_s26 = sshll.u32 %s3247_s12, 3 }
  0x4e   : > { %v497_v2 = vsel %vm496_vm0, %v3494_v0, 0.0  ;;  %v503_v3 = vsel %vm496_vm0, %v3497_v1, 0.0  ;;  %v568_v4 = vmul.f32 %v3494_v0, %v3494_v0  ;;  %v3506_v5 = vld [vmem:[%s3475_s30 + $0x8] sm:$0xff]  ;;  %v3510_v7 = vld [vmem:[%s3475_s30 + $0x18] sm:$0xff]  ;;  %v570_v12 = vmul.f32 %v3497_v1, %v3497_v1  ;;  %v3522_v13 = vld [vmem:[%s3475_s30 + $0x20] sm:$0xff]  ;;  %s2677_s27 = sadd.s32 4294967295, %s2676_s26 }
  0x4f   : > { %498 = vadd.xlane.f32.xlu0 %v497_v2  ;;  %504 = vadd.xlane.f32.xlu2 %v503_v3  ;;  %v569_v8 = vmul.f32 %v3506_v5, %v3506_v5  ;;  %v500_v9 = vsel %vm496_vm0, %v3506_v5, 0.0  ;;  %v506_v10 = vsel %vm496_vm0, %v3510_v7, 0.0  ;;  %v571_v14 = vmul.f32 %v3510_v7, %v3510_v7  ;;  %v3530_v17 = vld [vmem:[%s3475_s30 + $0x28] sm:$0xff]  ;;  %v3541_v23 = vld [vmem:[%s3475_s30 + $0x30] sm:$0xff]  ;;  %v3547_v26 = vld [vmem:[%s3475_s30 + $0x38] sm:$0xff]  ;;  %p434_p1 = scmp.gt.s32.totalorder %s2677_s27, 0 }
  0x50   : > { %v584_v6 = vsel %vm496_vm0, %v568_v4, 0.0  ;;  %v590_v15 = vsel %vm496_vm0, %v570_v12, 0.0  ;;  %v509_v16 = vsel %vm496_vm0, %v3522_v13, 0.0  ;;  %v573_v19 = vmul.f32 %v3530_v17, %v3530_v17  ;;  %v3557_v31 = vld [vmem:[%s3475_s30 + $0x48] sm:$0xff]  ;;  %v3560_v32 = vld [vmem:[%s3475_s30 + $0x40] sm:$0xff]  ;;  %v3570_v37 = vld [vmem:[%s3475_s30 + $0x70] sm:$0xff] }
  0x51   : > { %585 = vadd.xlane.f32.xlu1 %v584_v6  ;;  %v587_v11 = vsel %vm496_vm0, %v569_v8, 0.0  ;;  %v593_v18 = vsel %vm496_vm0, %v571_v14, 0.0  ;;  %v572_v20 = vmul.f32 %v3522_v13, %v3522_v13  ;;  %v512_v21 = vsel %vm496_vm0, %v3530_v17, 0.0  ;;  %v3578_v41 = vld [vmem:[%s3475_s30 + $0x78] sm:$0xff]  ;;  %v3589_v47 = vld [vmem:[%s3475_s30 + $0x50] sm:$0xff]  ;;  %v3605_v55 = vld [vmem:[%s3475_s30 + $0x68] sm:$0xff] }
  0x52   : > { %v599_v22 = vsel %vm496_vm0, %v573_v19, 0.0  ;;  %v574_v25 = vmul.f32 %v3541_v23, %v3541_v23  ;;  %v515_v27 = vsel %vm496_vm0, %v3541_v23, 0.0  ;;  %v518_v29 = vsel %vm496_vm0, %v3547_v26, 0.0  ;;  %v3595_v50 = vld [vmem:[%s3475_s30 + $0x58] sm:$0xff]  ;;  %v3608_v56 = vld [vmem:[%s3475_s30 + $0x60] sm:$0xff]  ;;  %s2679_s25 = sshll.u32 %s3251_s13, 8 }
  0x53   : > { %v596_v24 = vsel %vm496_vm0, %v572_v20, 0.0  ;;  %v575_v30 = vmul.f32 %v3547_v26, %v3547_v26  ;;  %v524_v34 = vsel %vm496_vm0, %v3557_v31, 0.0  ;;  %v521_v35 = vsel %vm496_vm0, %v3560_v32, 0.0  ;;  %s3275_s19 = smov [#allocation2]   ;;  %s5725_s27 = smov (!%p434_p1, %s2677_s27), 0 }
  0x54   : > { %v602_v28 = vsel %vm496_vm0, %v574_v25, 0.0  ;;  %v576_v36 = vmul.f32 %v3560_v32, %v3560_v32  ;;  %v577_v38 = vmul.f32 %v3557_v31, %v3557_v31  ;;  %v539_v40 = vsel %vm496_vm0, %v3570_v37, 0.0  ;;  %s452_s24 = sshll.u32 %s3275_s19, 4  ;;  %s436_s20 = sadd.s32 8, %s2676_s26  ;;  %s453_s24 = int_to_ptr.vmem [resolvable:$true] %s452_s24 }
  0x55   : > { %v605_v33 = vsel %vm496_vm0, %v575_v30, 0.0  ;;  %v583_v43 = vmul.f32 %v3578_v41, %v3578_v41  ;;  %v582_v44 = vmul.f32 %v3570_v37, %v3570_v37  ;;  %v542_v45 = vsel %vm496_vm0, %v3578_v41, 0.0  ;;  %v3634_v30 = vld [vmem:[#allocation8] sm:$0xff]  ;;  %s2678_s1 = sshll.u32 %s5725_s27, 4  ;;  %s5512_s17 = sld [smem:[#allocation109_spill]] }
  0x56   : > { %v608_v39 = vsel %vm496_vm0, %v576_v36, 0.0  ;;  %v611_v42 = vsel %vm496_vm0, %v577_v38, 0.0  ;;  %v578_v49 = vmul.f32 %v3589_v47, %v3589_v47  ;;  %v527_v51 = vsel %vm496_vm0, %v3589_v47, 0.0  ;;  %1019 = vmatpush.bf16.msra.mxu0 %v3634_v30  ;;  %2735 = vmatpush.bf16.msra.mxu3 %v3634_v30  ;;  %s441_s9 = sadd.s32 %s2679_s25, %s2678_s1  ;;  %p437_p3 = scmp.lt.s32.totalorder %s436_s20, 15 }
  0x57   : > { %501 = vadd.xlane.f32.xlu0 %v500_v9  ;;  %507 = vadd.xlane.f32.xlu2 %v506_v10  ;;  %v629_v46 = vsel %vm496_vm0, %v583_v43, 0.0  ;;  %v626_v48 = vsel %vm496_vm0, %v582_v44, 0.0  ;;  %v530_v53 = vsel %vm496_vm0, %v3595_v50, 0.0  ;;  %v579_v54 = vmul.f32 %v3595_v50, %v3595_v50 }
  0x58   : > { %v614_v52 = vsel %vm496_vm0, %v578_v49, 0.0  ;;  %v536_v58 = vsel %vm496_vm0, %v3605_v55, 0.0  ;;  %v533_v59 = vsel %vm496_vm0, %v3608_v56, 0.0  ;;  %v580_v60 = vmul.f32 %v3608_v56, %v3608_v56 }
  0x59   : > { %588 = vadd.xlane.f32.xlu1 %v587_v11  ;;  %v617_v57 = vsel %vm496_vm0, %v579_v54, 0.0  ;;  %v581_v61 = vmul.f32 %v3605_v55, %v3605_v55  ;;  %v3274_v2 = vmov 16.0  }
  0x5a   : > { %v620_v62 = vsel %vm496_vm0, %v580_v60, 0.0  ;;  %2879 = vrcp.f32 %v3274_v2 }
  0x5b   : > { %v623_v63 = vsel %vm496_vm0, %v581_v61, 0.0  ;;  %s442_s28 = scalar_lea.hbm %s5512_s17, %s441_s9  ;;  %s3105_s19 = scalar_lea.hbm %s5512_s17, 512 }
  0x5c   : > { %s450_s21 = sshll.u32 %s442_s28, 4  ;;  %s451_s21 = int_to_ptr.hbm [resolvable:$true] %s450_s21 }
  0x5d   : > { %s3101_s7 = sshra.s32 %s451_s21, 4  ;;  %s3102_s7 = int_to_ptr.hbm [resolvable:$true] %s3101_s7 }
  0x5e   : > { %s3103_s16 = scalar_lea.hbm %s3102_s7, 16  ;;  %p3106_p9 = scmp.lt.s32.totalorder %s3102_s7, %s5512_s17 }
  0x5f   : > { %591 = vadd.xlane.f32.xlu0 %v590_v15  ;;  %510 = vadd.xlane.f32.xlu2 %v509_v16  ;;  %p3104_p8 = scmp.ne.s32.totalorder %s3102_s7, %s3103_s16  ;;  %p3107_p10 = scmp.lt.s32.totalorder %s3105_s19, %s3103_s16 }
  0x60   : > { %v2880_v3 = vpop.eup %2879 }
  0x61   : > { %594 = vadd.xlane.f32.xlu1 %v593_v18  ;;  %v546_v4 = vmul.f32 16.0, %v2880_v3  ;;  %vm550_vm1 = vweird.f32 %v2880_v3  ;;  %p3108_p11 = por %p3107_p10, %p3106_p9 }
  0x63   : > { %v547_v6 = vsub.f32 1.0, %v546_v4  ;;  %p3109_p12 = pnand %p3108_p11, %p3104_p8 }
  0x65   : > { %v548_v8 = vmul.f32 %v2880_v3, %v547_v6 }
  0x67   : > { %513 = vadd.xlane.f32.xlu0 %v512_v21  ;;  %600 = vadd.xlane.f32.xlu2 %v599_v22  ;;  %v549_v9 = vadd.f32 %v2880_v3, %v548_v8 }
  0x69   : > { %597 = vadd.xlane.f32.xlu1 %v596_v24  ;;  %v3621_v10 = vsel %vm550_vm1, %v2880_v3, %v549_v9 }
  0x6f   : > { %516 = vadd.xlane.f32.xlu0 %v515_v27  ;;  %603 = vadd.xlane.f32.xlu2 %v602_v28 }
  0x71   : > { %519 = vadd.xlane.f32.xlu1 %v518_v29 }
  0x77   : > { %606 = vadd.xlane.f32.xlu0 %v605_v33  ;;  %525 = vadd.xlane.f32.xlu2 %v524_v34  ;;  %v3636_v33 = vld [vmem:[#allocation10] sm:$0xff] }
  0x78   : > { %1074 = vmatpush.bf16.msra.mxu1 %v3636_v33  ;;  %2736 = vmatpush.bf16.msrb.mxu3 %v3636_v33 }
  0x79   : > { %522 = vadd.xlane.f32.xlu1 %v521_v35 }
  0x7f   : > { %609 = vadd.xlane.f32.xlu0 %v608_v39  ;;  %540 = vadd.xlane.f32.xlu2 %v539_v40 }
  0x81   : > { %612 = vadd.xlane.f32.xlu1 %v611_v42 }
  0x87   : > { %543 = vadd.xlane.f32.xlu0 %v542_v45  ;;  %630 = vadd.xlane.f32.xlu2 %v629_v46 }
  0x89   : > { %627 = vadd.xlane.f32.xlu1 %v626_v48 }
  0x8f   : > { %528 = vadd.xlane.f32.xlu0 %v527_v51  ;;  %615 = vadd.xlane.f32.xlu2 %v614_v52 }
  0x91   : > { %531 = vadd.xlane.f32.xlu1 %v530_v53 }
  0x97   : > { %618 = vadd.xlane.f32.xlu0 %v617_v57  ;;  %537 = vadd.xlane.f32.xlu2 %v536_v58 }
  0x99   : > { %534 = vadd.xlane.f32.xlu1 %v533_v59 }
  0x9f   : > { %621 = vadd.xlane.f32.xlu0 %v620_v62 }
  0xa1   : > { %624 = vadd.xlane.f32.xlu1 %v623_v63 }
  0xc2   : > { %v499_v11 = vpop.xlane.xlu0 %498  ;;  %v505_v12 = vpop.xlane.xlu2 %504 }
  0xc3   : > { %v552_v14 = vmul.f32 %v3621_v10, %v499_v11  ;;  %v3629_v27 = vmul.f32 %v3621_v10, %v505_v12 }
  0xc4   : > { %v586_v15 = vpop.xlane.xlu1 %585 }
  0xc5   : > { %v648_v16 = vmul.f32 %v552_v14, %v552_v14  ;;  %v632_v18 = vmul.f32 %v586_v15, %v3621_v10  ;;  %v650_v36 = vmul.f32 %v3629_v27, %v3629_v27  ;;  %v680_v4 = vsub.f32 %v3494_v0, %v552_v14  ;;  %v3673_v0 = vld [vmem:[%s5324_s2] ss:$0 sm:$0xff] }
  0xc7   : > { %v664_v19 = vsub.f32 %v632_v18, %v648_v16 }
  0xc9   : > { %v696_v20 = vadd.f32 1e-05, %v664_v19 }
  0xca   : > { %v502_v21 = vpop.xlane.xlu0 %501  ;;  %v508_v22 = vpop.xlane.xlu2 %507 }
  0xcb   : > { %v3626_v24 = vmul.f32 %v3621_v10, %v502_v21  ;;  %2881 = vrsqrt.f32 %v696_v20  ;;  %v3639_v34 = vmul.f32 %v3621_v10, %v508_v22  ;;  %vm718_vm3 = vweird.f32 %v696_v20 }
  0xcc   : > { %v589_v25 = vpop.xlane.xlu1 %588 }
  0xcd   : > { %v649_v28 = vmul.f32 %v3626_v24, %v3626_v24  ;;  %v633_v29 = vmul.f32 %v589_v25, %v3621_v10  ;;  %v651_v45 = vmul.f32 %v3639_v34, %v3639_v34 }
  0xcf   : > { %v665_v35 = vsub.f32 %v633_v29, %v649_v28 }
  0xd1   : > { %v2882_v38 = vpop.eup %2881  ;;  %v697_v39 = vadd.f32 1e-05, %v665_v35 }
  0xd2   : > { %v592_v40 = vpop.xlane.xlu0 %591  ;;  %v511_v42 = vpop.xlane.xlu2 %510  ;;  %v713_v43 = vmul.f32 %v2882_v38, %v696_v20  ;;  %vm719_vm2 = vweird.f32 %v2882_v38 }
  0xd3   : > { %v634_v44 = vmul.f32 %v592_v40, %v3621_v10  ;;  %2883 = vrsqrt.f32 %v697_v39  ;;  %v3654_v54 = vmul.f32 %v3621_v10, %v511_v42  ;;  %vm720_vm4 = vmor %vm718_vm3, %vm719_vm2  ;;  %vm728_vm6 = vweird.f32 %v697_v39 }
  0xd4   : > { %v595_v46 = vpop.xlane.xlu1 %594  ;;  %v714_v48 = vmul.f32 %v2882_v38, %v713_v43  ;;  %v3690_v43 = vld [vmem:[%s5325_s3] ss:$0 sm:$0xff] }
  0xd5   : > { %v666_v49 = vsub.f32 %v634_v44, %v650_v36  ;;  %v635_v51 = vmul.f32 %v595_v46, %v3621_v10  ;;  %v652_v6 = vmul.f32 %v3654_v54, %v3654_v54  ;;  %v681_v46 = vsub.f32 %v3506_v5, %v3626_v24 }
  0xd6   : > { %v715_v52 = vmul.f32 0.5, %v714_v48 }
  0xd7   : > { %v3651_v53 = vadd.f32 1e-05, %v666_v49  ;;  %v667_v57 = vsub.f32 %v635_v51, %v651_v45 }
  0xd8   : > { %v716_v58 = vsub.f32 1.5, %v715_v52 }
  0xd9   : > { %2885 = vrsqrt.f32 %v3651_v53  ;;  %v2884_v59 = vpop.eup %2883  ;;  %v3657_v60 = vadd.f32 1e-05, %v667_v57  ;;  %vm738_vm8 = vweird.f32 %v3651_v53 }
  0xda   : > { %v514_v61 = vpop.xlane.xlu0 %513  ;;  %v601_v62 = vpop.xlane.xlu2 %600  ;;  %v717_v63 = vmul.f32 %v2882_v38, %v716_v58  ;;  %v723_v2 = vmul.f32 %v2884_v59, %v697_v39  ;;  %vm729_vm5 = vweird.f32 %v2884_v59 }
  0xdb   : > { %v3660_v3 = vmul.f32 %v3621_v10, %v514_v61  ;;  %2887 = vrsqrt.f32 %v3657_v60  ;;  %v637_v8 = vmul.f32 %v601_v62, %v3621_v10  ;;  %vm730_vm7 = vmor %vm728_vm6, %vm729_vm5  ;;  %vm748_vm10 = vweird.f32 %v3657_v60 }
  0xdc   : > { %v598_v9 = vpop.xlane.xlu1 %597  ;;  %v721_v11 = vsel %vm720_vm4, %v2882_v38, %v717_v63  ;;  %v724_v12 = vmul.f32 %v2884_v59, %v723_v2 }
  0xdd   : > { %v653_v15 = vmul.f32 %v3660_v3, %v3660_v3  ;;  %v636_v16 = vmul.f32 %v598_v9, %v3621_v10  ;;  %v872_v18 = vmul.f32 %v721_v11, %v680_v4 }
  0xde   : > { %v725_v19 = vmul.f32 0.5, %v724_v12 }
  0xdf   : > { %v3675_v14 = vpop.eup %2885  ;;  %v669_v20 = vsub.f32 %v637_v8, %v653_v15  ;;  %v668_v22 = vsub.f32 %v636_v16, %v652_v6  ;;  %v891_v42 = vmul.f32 %v3673_v0, %v872_v18 }
  0xe0   : > { %v733_v21 = vmul.f32 %v3675_v14, %v3651_v53  ;;  %v726_v25 = vsub.f32 1.5, %v725_v19  ;;  %vm739_vm9 = vweird.f32 %v3675_v14 }
  0xe1   : > { %v3679_v28 = vadd.f32 1e-05, %v669_v20  ;;  %v3681_v29 = vpop.eup %2887  ;;  %v3684_v36 = vadd.f32 1e-05, %v668_v22  ;;  %v910_v5 = vadd.f32 %v3690_v43, %v891_v42  ;;  %vm3726_vm12 = vmor %vm738_vm8, %vm739_vm9 }
  0xe2   : > { %v734_v35 = vmul.f32 %v3675_v14, %v733_v21  ;;  %v517_v38 = vpop.xlane.xlu0 %516  ;;  %v604_v40 = vpop.xlane.xlu2 %603  ;;  %v727_v44 = vmul.f32 %v2884_v59, %v726_v25  ;;  %v743_v45 = vmul.f32 %v3681_v29, %v3657_v60  ;;  %vm749_vm11 = vweird.f32 %v3681_v29 }
  0xe3   : > { %2889 = vrsqrt.f32 %v3679_v28  ;;  %v3700_v57 = vmul.f32 %v3621_v10, %v517_v38  ;;  %v638_v39 = vmul.f32 %v604_v40, %v3621_v10  ;;  %v926_v19 = vpack.c.bf16 %v910_v5, %v910_v5  ;;  %vm3740_vm13 = vmor %vm748_vm10, %vm749_vm11 }
  0xe4   : > { %v735_v48 = vmul.f32 0.5, %v734_v35  ;;  %2891 = vrsqrt.f32 %v3684_v36  ;;  %v520_v49 = vpop.xlane.xlu1 %519  ;;  %v731_v51 = vsel %vm730_vm7, %v2884_v59, %v727_v44  ;;  %v744_v52 = vmul.f32 %v3681_v29, %v743_v45 }
  0xe5   : > { %v3704_v61 = vmul.f32 %v3621_v10, %v520_v49  ;;  %v873_v62 = vmul.f32 %v731_v51, %v681_v46  ;;  %v654_v63 = vmul.f32 %v3700_v57, %v3700_v57  ;;  %v682_v45 = vsub.f32 %v3497_v1, %v3629_v27 }
  0xe6   : > { %v736_v58 = vsub.f32 1.5, %v735_v48  ;;  %v745_v24 = vmul.f32 0.5, %v744_v52  ;;  %v683_v60 = vsub.f32 %v3510_v7, %v3639_v34  ;;  %v958_v51 = vunpack.c.l.b16 %v926_v19 }
  0xe7   : > { %v892_v2 = vmul.f32 %v3673_v0, %v873_v62  ;;  %v670_v8 = vsub.f32 %v638_v39, %v654_v63  ;;  %v655_v12 = vmul.f32 %v3704_v61, %v3704_v61  ;;  %vm768_vm14 = vweird.f32 %v3679_v28 }
  0xe8   : > { %v737_v59 = vmul.f32 %v3675_v14, %v736_v58  ;;  %v746_v6 = vsub.f32 1.5, %v745_v24  ;;  %vm758_vm1 = vweird.f32 %v3684_v36 }
  0xe9   : > { %v3713_v4 = vpop.eup %2889  ;;  %v911_v18 = vadd.f32 %v3690_v43, %v892_v2  ;;  %v3733_v25 = vadd.f32 1e-05, %v670_v8 }
  0xea   : > { %v3717_v9 = vpop.eup %2891  ;;  %v763_v11 = vmul.f32 %v3713_v4, %v3679_v28  ;;  %v607_v15 = vpop.xlane.xlu0 %606  ;;  %v747_v21 = vmul.f32 %v3681_v29, %v746_v6  ;;  %v741_v35 = vsel %vm3726_vm12, %v3675_v14, %v737_v59  ;;  %vm769_vm15 = vweird.f32 %v3713_v4 }
  0xeb   : > { %v526_v16 = vpop.xlane.xlu2 %525  ;;  %v753_v22 = vmul.f32 %v3717_v9, %v3684_v36  ;;  %v639_v40 = vmul.f32 %v607_v15, %v3621_v10  ;;  %v927_v44 = vpack.c.bf16 %v911_v18, %v911_v18  ;;  %2893 = vrsqrt.f32 %v3733_v25  ;;  %vm3787_vm3 = vmor %vm768_vm14, %vm769_vm15 }
  0xec   : > { %v764_v53 = vmul.f32 %v3713_v4, %v763_v11  ;;  %v523_v42 = vpop.xlane.xlu1 %522  ;;  %v751_v46 = vsel %vm3740_vm13, %v3681_v29, %v747_v21  ;;  %v874_v1 = vmul.f32 %v741_v35, %v682_v45  ;;  %v3761_v29 = vmul.f32 %v3621_v10, %v526_v16 }
  0xed   : > { %v754_v14 = vmul.f32 %v3717_v9, %v753_v22  ;;  %v671_v49 = vsub.f32 %v639_v40, %v655_v12  ;;  %v3756_v39 = vmul.f32 %v3621_v10, %v523_v42  ;;  %v959_v58 = vunpack.c.l.b16 %v927_v44 }
  0xee   : > { %v765_v48 = vmul.f32 0.5, %v764_v53  ;;  %v875_v62 = vmul.f32 %v751_v46, %v683_v60  ;;  %vm759_vm2 = vweird.f32 %v3717_v9  ;;  %v893_v11 = vmul.f32 %v3673_v0, %v874_v1 }
  0xef   : > { %v755_v52 = vmul.f32 0.5, %v754_v14  ;;  %v3758_v27 = vadd.f32 1e-05, %v671_v49  ;;  %v974_v7 = vpack.c.b16 %v959_v58, %v958_v51  ;;  %v656_v34 = vmul.f32 %v3756_v39, %v3756_v39  ;;  %vm3796_vm4 = vmor %vm758_vm1, %vm759_vm2 }
  0xf0   : > { %v766_v5 = vsub.f32 1.5, %v765_v48  ;;  %v657_v15 = vmul.f32 %v3761_v29, %v3761_v29  ;;  %v894_v18 = vmul.f32 %v3673_v0, %v875_v62  ;;  %v912_v42 = vadd.f32 %v3690_v43, %v893_v11 }
  0xf1   : > { %v756_v24 = vsub.f32 1.5, %v755_v52  ;;  %2895 = vrsqrt.f32 %v3758_v27  ;;  %v3769_v2 = vpop.eup %2893  ;;  %2685 = vmatmul.msk.bf16.vlgmr.msra.gmra.mxu0 %vm496_vm0, %v974_v7  ;;  %2697 = vmatmul.msk.bf16.vlgmr.msra.gmra.mxu1 %vm496_vm0, %v974_v7  ;;  %v684_v36 = vsub.f32 %v3522_v13, %v3654_v54  ;;  %v685_v45 = vsub.f32 %v3530_v17, %v3660_v3 }
  0xf2   : > { %v610_v63 = vpop.xlane.xlu0 %609  ;;  %v773_v12 = vmul.f32 %v3769_v2, %v3733_v25  ;;  %v767_v19 = vmul.f32 %v3713_v4, %v766_v5  ;;  %v913_v28 = vadd.f32 %v3690_v43, %v894_v18  ;;  %v928_v1 = vpack.c.bf16 %v912_v42, %v912_v42 }
  0xf3   : > { %v541_v59 = vpop.xlane.xlu2 %540  ;;  %v757_v6 = vmul.f32 %v3717_v9, %v756_v24  ;;  %v640_v8 = vmul.f32 %v610_v63, %v3621_v10  ;;  %vm778_vm5 = vweird.f32 %v3733_v25  ;;  %vm779_vm6 = vweird.f32 %v3769_v2 }
  0xf4   : > { %v613_v16 = vpop.xlane.xlu1 %612  ;;  %v3792_v21 = vmul.f32 %v3621_v10, %v541_v59  ;;  %v774_v35 = vmul.f32 %v3769_v2, %v773_v12  ;;  %v771_v14 = vsel %vm3787_vm3, %v3713_v4, %v767_v19  ;;  %v929_v48 = vpack.c.bf16 %v913_v28, %v913_v28  ;;  %vm3855_vm7 = vmor %vm778_vm5, %vm779_vm6 }
  0xf5   : > { %v672_v38 = vsub.f32 %v640_v8, %v656_v34  ;;  %v641_v53 = vmul.f32 %v613_v16, %v3621_v10  ;;  %v761_v40 = vsel %vm3796_vm4, %v3717_v9, %v757_v6  ;;  %v877_v34 = vmul.f32 %v771_v14, %v685_v45 }
  0xf6   : > { %v662_v9 = vmul.f32 %v3792_v21, %v3792_v21  ;;  %v775_v49 = vmul.f32 0.5, %v774_v35  ;;  %v876_v17 = vmul.f32 %v761_v40, %v684_v36  ;;  %v961_v7 = vunpack.c.l.b16 %v929_v48 }
  0xf7   : > { %v3807_v44 = vpop.eup %2895  ;;  %v673_v46 = vsub.f32 %v641_v53, %v657_v15  ;;  %v3820_v51 = vadd.f32 1e-05, %v672_v38  ;;  %v960_v11 = vunpack.c.l.b16 %v928_v1  ;;  %v896_v19 = vmul.f32 %v3673_v0, %v877_v34 }
  0xf8   : > { %v783_v60 = vmul.f32 %v3807_v44, %v3758_v27  ;;  %v776_v63 = vsub.f32 1.5, %v775_v49  ;;  %v895_v12 = vmul.f32 %v3673_v0, %v876_v17  ;;  %vm788_vm8 = vweird.f32 %v3758_v27 }
  0xf9   : > { %v3822_v52 = vadd.f32 1e-05, %v673_v46  ;;  %v975_v18 = vpack.c.b16 %v961_v7, %v960_v11  ;;  %vm789_vm9 = vweird.f32 %v3807_v44  ;;  %v915_v25 = vadd.f32 %v3690_v43, %v896_v19 }
  0xfa   : > { %v544_v13 = vpop.xlane.xlu0 %543  ;;  %v784_v3 = vmul.f32 %v3807_v44, %v783_v60  ;;  %v777_v53 = vmul.f32 %v3769_v2, %v776_v63  ;;  %v914_v28 = vadd.f32 %v3690_v43, %v895_v12  ;;  %vm3876_vm10 = vmor %vm788_vm8, %vm789_vm9  ;;  %v686_v17 = vsub.f32 %v3541_v23, %v3700_v57 }
  0xfb   : > { %v631_v54 = vpop.xlane.xlu2 %630  ;;  %v3826_v58 = vmul.f32 %v3621_v10, %v544_v13  ;;  %2897 = vrsqrt.f32 %v3822_v52  ;;  %vm808_vm2 = vweird.f32 %v3822_v52  ;;  %vm798_vm4 = vweird.f32 %v3820_v51 }
  0xfc   : > { %v647_v4 = vmul.f32 %v631_v54, %v3621_v10  ;;  %v628_v62 = vpop.xlane.xlu1 %627  ;;  %v785_v59 = vmul.f32 0.5, %v784_v3  ;;  %2899 = vrsqrt.f32 %v3820_v51  ;;  %v781_v27 = vsel %vm3855_vm7, %v3769_v2, %v777_v53 }
  0xfd   : > { %v663_v5 = vmul.f32 %v3826_v58, %v3826_v58  ;;  %v646_v24 = vmul.f32 %v628_v62, %v3621_v10  ;;  %v930_v54 = vpack.c.bf16 %v914_v28, %v914_v28  ;;  %v687_v3 = vsub.f32 %v3547_v26, %v3704_v61 }
  0xfe   : > { %v786_v22 = vsub.f32 1.5, %v785_v59  ;;  %v694_v2 = vsub.f32 %v3570_v37, %v3792_v21  ;;  %v878_v61 = vmul.f32 %v781_v27, %v686_v17  ;;  %v688_v27 = vsub.f32 %v3560_v32, %v3756_v39 }
  0xff   : > { %v679_v6 = vsub.f32 %v647_v4, %v663_v5  ;;  %v678_v8 = vsub.f32 %v646_v24, %v662_v9  ;;  %v931_v5 = vpack.c.bf16 %v915_v25, %v915_v25 }
 0x100   : > { %v787_v60 = vmul.f32 %v3807_v44, %v786_v22 }
 0x101   : > { %v3837_v15 = vadd.f32 1e-05, %v679_v6  ;;  %v3839_v16 = vadd.f32 1e-05, %v678_v8  ;;  %v3842_v20 = vpop.eup %2897  ;;  %2686 = vmatmul.msk.bf16.gmra.mxu0 %vm496_vm0, %v975_v18  ;;  %2698 = vmatmul.msk.bf16.gmra.mxu1 %vm496_vm0, %v975_v18  ;;  %v962_v6 = vunpack.c.l.b16 %v930_v54  ;;  %v963_v22 = vunpack.c.l.b16 %v931_v5 }
 0x102   : > { %v529_v35 = vpop.xlane.xlu0 %528  ;;  %v3849_v40 = vpop.eup %2899  ;;  %v803_v45 = vmul.f32 %v3842_v20, %v3822_v52  ;;  %v791_v7 = vsel %vm3876_vm10, %v3807_v44, %v787_v60  ;;  %vm809_vm3 = vweird.f32 %v3842_v20 }
 0x103   : > { %v616_v38 = vpop.xlane.xlu2 %615  ;;  %2901 = vrsqrt.f32 %v3837_v15  ;;  %v3865_v46 = vmul.f32 %v3621_v10, %v529_v35  ;;  %v793_v49 = vmul.f32 %v3849_v40, %v3820_v51  ;;  %vm868_vm11 = vweird.f32 %v3837_v15  ;;  %vm3960_vm6 = vmor %vm808_vm2, %vm809_vm3 }
 0x104   : > { %2903 = vrsqrt.f32 %v3839_v16  ;;  %v532_v36 = vpop.xlane.xlu1 %531  ;;  %v642_v14 = vmul.f32 %v616_v38, %v3621_v10  ;;  %v804_v1 = vmul.f32 %v3842_v20, %v803_v45  ;;  %vm858_vm12 = vweird.f32 %v3839_v16 }
 0x105   : > { %v3871_v9 = vmul.f32 %v3621_v10, %v532_v36  ;;  %v658_v13 = vmul.f32 %v3865_v46, %v3865_v46  ;;  %v794_v34 = vmul.f32 %v3849_v40, %v793_v49  ;;  %v879_v35 = vmul.f32 %v791_v7, %v687_v3 }
 0x106   : > { %v805_v18 = vmul.f32 0.5, %v804_v1  ;;  %v976_v49 = vpack.c.b16 %v963_v22, %v962_v6  ;;  %vm799_vm5 = vweird.f32 %v3849_v40 }
 0x107   : > { %v674_v62 = vsub.f32 %v642_v14, %v658_v13  ;;  %v659_v26 = vmul.f32 %v3871_v9, %v3871_v9  ;;  %v795_v45 = vmul.f32 0.5, %v794_v34  ;;  %v695_v14 = vsub.f32 %v3578_v41, %v3826_v58  ;;  %vm3972_vm7 = vmor %vm798_vm4, %vm799_vm5 }
 0x108   : > { %v897_v13 = vmul.f32 %v3673_v0, %v878_v61  ;;  %v898_v54 = vmul.f32 %v3673_v0, %v879_v35  ;;  %v806_v17 = vsub.f32 1.5, %v805_v18 }
 0x109   : > { %v3888_v4 = vpop.eup %2901  ;;  %v3902_v59 = vadd.f32 1e-05, %v674_v62  ;;  %v796_v5 = vsub.f32 1.5, %v795_v45 }
 0x10a   : > { %v2904_v24 = vpop.eup %2903  ;;  %v863_v23 = vmul.f32 %v3888_v4, %v3837_v15  ;;  %v619_v57 = vpop.xlane.xlu0 %618  ;;  %vm869_vm13 = vweird.f32 %v3888_v4  ;;  %v917_v34 = vadd.f32 %v3690_v43, %v898_v54  ;;  %v807_v52 = vmul.f32 %v3842_v20, %v806_v17 }
 0x10b   : > { %v853_v63 = vmul.f32 %v2904_v24, %v3839_v16  ;;  %v538_v8 = vpop.xlane.xlu2 %537  ;;  %v643_v44 = vmul.f32 %v619_v57, %v3621_v10  ;;  %vm859_vm14 = vweird.f32 %v2904_v24  ;;  %2905 = vrsqrt.f32 %v3902_v59  ;;  %vm3922_vm15 = vmor %vm868_vm11, %vm869_vm13 }
 0x10c   : > { %v864_v11 = vmul.f32 %v3888_v4, %v863_v23  ;;  %v535_v12 = vpop.xlane.xlu1 %534  ;;  %v3910_v28 = vmul.f32 %v3621_v10, %v538_v8  ;;  %vm3931_vm1 = vmor %vm858_vm12, %vm859_vm14  ;;  %v797_v51 = vmul.f32 %v3849_v40, %v796_v5  ;;  %v811_v22 = vsel %vm3960_vm6, %v3842_v20, %v807_v52 }
 0x10d   : > { %v854_v19 = vmul.f32 %v2904_v24, %v853_v63  ;;  %v675_v53 = vsub.f32 %v643_v44, %v659_v26  ;;  %v3914_v36 = vmul.f32 %v3621_v10, %v535_v12  ;;  %vm818_vm10 = vweird.f32 %v3902_v59 }
 0x10e   : > { %v865_v38 = vmul.f32 0.5, %v864_v11  ;;  %v661_v58 = vmul.f32 %v3910_v28, %v3910_v28  ;;  %v916_v11 = vadd.f32 %v3690_v43, %v897_v13  ;;  %v801_v20 = vsel %vm3972_vm7, %v3849_v40, %v797_v51 }
 0x10f   : > { %v855_v42 = vmul.f32 0.5, %v854_v19  ;;  %v3918_v60 = vadd.f32 1e-05, %v675_v53  ;;  %v660_v62 = vmul.f32 %v3914_v36, %v3914_v36  ;;  %v933_v19 = vpack.c.bf16 %v917_v34, %v917_v34 }
 0x110   : > { %v866_v25 = vsub.f32 1.5, %v865_v38 }
 0x111   : > { %v856_v48 = vsub.f32 1.5, %v855_v42  ;;  %2907 = vrsqrt.f32 %v3918_v60  ;;  %2687 = vmatmul.msk.bf16.gmra.mxu0 %vm496_vm0, %v976_v49  ;;  %2699 = vmatmul.msk.bf16.gmra.mxu1 %vm496_vm0, %v976_v49  ;;  %v3948_v26 = vpop.eup %2905  ;;  %v689_v42 = vsub.f32 %v3557_v31, %v3761_v29  ;;  %v965_v13 = vunpack.c.l.b16 %v933_v19 }
 0x112   : > { %v867_v3 = vmul.f32 %v3888_v4, %v866_v25  ;;  %v622_v15 = vpop.xlane.xlu0 %621  ;;  %v813_v18 = vmul.f32 %v3948_v26, %v3902_v59  ;;  %v932_v25 = vpack.c.bf16 %v916_v11, %v916_v11  ;;  %vm828_vm8 = vweird.f32 %v3918_v60 }
 0x113   : > { %v857_v1 = vmul.f32 %v2904_v24, %v856_v48  ;;  %v644_v16 = vmul.f32 %v622_v15, %v3621_v10  ;;  %v881_v31 = vmul.f32 %v811_v22, %v689_v42  ;;  %vm819_vm11 = vweird.f32 %v3948_v26 }
 0x114   : > { %v871_v7 = vsel %vm3922_vm15, %v3888_v4, %v867_v3  ;;  %v625_v23 = vpop.xlane.xlu1 %624  ;;  %v814_v48 = vmul.f32 %v3948_v26, %v813_v18  ;;  %v964_v3 = vunpack.c.l.b16 %v932_v25  ;;  %vm820_vm13 = vmor %vm818_vm10, %vm819_vm11  ;;  %v691_v59 = vsub.f32 %v3595_v50, %v3871_v9 }
 0x115   : > { %v861_v57 = vsel %vm3931_vm1, %v2904_v24, %v857_v1  ;;  %v645_v61 = vmul.f32 %v625_v23, %v3621_v10  ;;  %v887_v63 = vmul.f32 %v871_v7, %v695_v14  ;;  %v676_v24 = vsub.f32 %v644_v16, %v660_v62 }
 0x116   : > { %v886_v4 = vmul.f32 %v861_v57, %v694_v2  ;;  %v815_v32 = vmul.f32 0.5, %v814_v48  ;;  %v977_v39 = vpack.c.b16 %v965_v13, %v964_v3  ;;  %v900_v40 = vmul.f32 %v3673_v0, %v881_v31 }
 0x117   : > { %v677_v8 = vsub.f32 %v645_v61, %v661_v58  ;;  %v906_v44 = vmul.f32 %v3673_v0, %v887_v63  ;;  %v3966_v12 = vpop.eup %2907  ;;  %v3988_v14 = vadd.f32 1e-05, %v676_v24  ;;  %v880_v58 = vmul.f32 %v801_v20, %v688_v27 }
 0x118   : > { %v905_v37 = vmul.f32 %v3673_v0, %v886_v4  ;;  %v823_v2 = vmul.f32 %v3966_v12, %v3918_v60  ;;  %v816_v5 = vsub.f32 1.5, %v815_v32  ;;  %vm829_vm9 = vweird.f32 %v3966_v12 }
 0x119   : > { %v3981_v35 = vadd.f32 1e-05, %v677_v8  ;;  %v925_v53 = vadd.f32 %v3690_v43, %v906_v44  ;;  %v899_v16 = vmul.f32 %v3673_v0, %v880_v58  ;;  %v919_v23 = vadd.f32 %v3690_v43, %v900_v40  ;;  %vm830_vm12 = vmor %vm828_vm8, %vm829_vm9 }
 0x11a   : > { %v924_v38 = vadd.f32 %v3690_v43, %v905_v37  ;;  %v824_v45 = vmul.f32 %v3966_v12, %v823_v2  ;;  %v817_v60 = vmul.f32 %v3948_v26, %v816_v5  ;;  %v690_v44 = vsub.f32 %v3589_v47, %v3865_v46 }
 0x11b   : > { %2909 = vrsqrt.f32 %v3981_v35  ;;  %v941_v54 = vpack.c.bf16 %v925_v53, %v925_v53  ;;  %v918_v34 = vadd.f32 %v3690_v43, %v899_v16  ;;  %v935_v52 = vpack.c.bf16 %v919_v23, %v919_v23 }
 0x11c   : > { %v940_v49 = vpack.c.bf16 %v924_v38, %v924_v38  ;;  %v825_v29 = vmul.f32 0.5, %v824_v45  ;;  %2911 = vrsqrt.f32 %v3988_v14  ;;  %v821_v8 = vsel %vm820_vm13, %v3948_v26, %v817_v60 }
 0x11d   : > { %v973_v41 = vunpack.c.l.b16 %v941_v54  ;;  %v934_v24 = vpack.c.bf16 %v918_v34, %v918_v34  ;;  %v967_v51 = vunpack.c.l.b16 %v935_v52  ;;  %v882_v2 = vmul.f32 %v821_v8, %v690_v44 }
 0x11e   : > { %v972_v17 = vunpack.c.l.b16 %v940_v49  ;;  %v826_v1 = vsub.f32 1.5, %v825_v29  ;;  %vm848_vm14 = vweird.f32 %v3981_v35  ;;  %vm838_vm1 = vweird.f32 %v3988_v14 }
 0x11f   : > { %v966_v21 = vunpack.c.l.b16 %v934_v24  ;;  %v901_v50 = vmul.f32 %v3673_v0, %v882_v2  ;;  %v693_v42 = vsub.f32 %v3605_v55, %v3910_v28  ;;  %v692_v20 = vsub.f32 %v3608_v56, %v3914_v36 }
 0x120   : > { %v981_v15 = vpack.c.b16 %v973_v41, %v972_v17  ;;  %v827_v57 = vmul.f32 %v3966_v12, %v826_v1 }
 0x121   : > { %v2910_v62 = vpop.eup %2909  ;;  %2688 = vmatmul.msk.bf16.gmra.mxu0 %vm496_vm0, %v977_v39  ;;  %2700 = vmatmul.msk.bf16.gmra.mxu1 %vm496_vm0, %v977_v39  ;;  %v978_v22 = vpack.c.b16 %v967_v51, %v966_v21  ;;  %v920_v26 = vadd.f32 %v3690_v43, %v901_v50 }
 0x122   : > { %2692 = vmatmul.msk.bf16.vlgmr.msra.gmra.mxu3 %vm496_vm0, %v981_v15  ;;  %v2912_v7 = vpop.eup %2911  ;;  %v843_v61 = vmul.f32 %v2910_v62, %v3981_v35  ;;  %v831_v4 = vsel %vm830_vm12, %v3966_v12, %v827_v57  ;;  %vm849_vm15 = vweird.f32 %v2910_v62 }
 0x123   : > { %v833_v63 = vmul.f32 %v2912_v7, %v3988_v14  ;;  %v883_v18 = vmul.f32 %v831_v4, %v691_v59  ;;  %vm839_vm2 = vweird.f32 %v2912_v7  ;;  %vm850_vm3 = vmor %vm848_vm14, %vm849_vm15  ;;  %v936_v35 = vpack.c.bf16 %v920_v26, %v920_v26 }
 0x124   : > { %v844_v6 = vmul.f32 %v2910_v62, %v843_v61  ;;  %vm840_vm4 = vmor %vm838_vm1, %vm839_vm2 }
 0x125   : > { %v834_v11 = vmul.f32 %v2912_v7, %v833_v63  ;;  %v902_v12 = vmul.f32 %v3673_v0, %v883_v18  ;;  %v968_v49 = vunpack.c.l.b16 %v936_v35 }
 0x126   : > { %v845_v37 = vmul.f32 0.5, %v844_v6 }
 0x127   : > { %v835_v19 = vmul.f32 0.5, %v834_v11  ;;  %v921_v47 = vadd.f32 %v3690_v43, %v902_v12 }
 0x128   : > { %v846_v38 = vsub.f32 1.5, %v845_v37 }
 0x129   : > { %v836_v9 = vsub.f32 1.5, %v835_v19  ;;  %v937_v45 = vpack.c.bf16 %v921_v47, %v921_v47 }
 0x12a   : > { %v847_v46 = vmul.f32 %v2910_v62, %v846_v38 }
 0x12b   : > { %v837_v53 = vmul.f32 %v2912_v7, %v836_v9  ;;  %v969_v48 = vunpack.c.l.b16 %v937_v45 }
 0x12c   : > { %v851_v25 = vsel %vm850_vm3, %v2910_v62, %v847_v46 }
 0x12d   : > { %v841_v27 = vsel %vm840_vm4, %v2912_v7, %v837_v53  ;;  %v885_v14 = vmul.f32 %v851_v25, %v693_v42  ;;  %v979_v54 = vpack.c.b16 %v969_v48, %v968_v49 }
 0x12e   : > { %v884_v13 = vmul.f32 %v841_v27, %v692_v20 }
 0x12f   : > { %v904_v31 = vmul.f32 %v3673_v0, %v885_v14 }
 0x130   : > { %v903_v55 = vmul.f32 %v3673_v0, %v884_v13 }
 0x131   : > { %2689 = vmatmul.msk.bf16.gmra.mxu0 %vm496_vm0, %v978_v22  ;;  %2701 = vmatmul.msk.bf16.gmra.mxu1 %vm496_vm0, %v978_v22  ;;  %v923_v28 = vadd.f32 %v3690_v43, %v904_v31 }
 0x132   : > { %2704 = vmatmul.msk.bf16.vlgmr.msrb.gmra.mxu3 %vm496_vm0, %v981_v15  ;;  %v922_v29 = vadd.f32 %v3690_v43, %v903_v55 }
 0x133   : > { %v939_v56 = vpack.c.bf16 %v923_v28, %v923_v28 }
 0x134   : > { %v938_v36 = vpack.c.bf16 %v922_v29, %v922_v29 }
 0x135   : > { %v971_v17 = vunpack.c.l.b16 %v939_v56 }
 0x136   : > { %v970_v3 = vunpack.c.l.b16 %v938_v36 }
 0x138   : > { %v980_v41 = vpack.c.b16 %v971_v17, %v970_v3 }
 0x141   : > { %2690 = vmatmul.msk.bf16.gmra.mxu0 %vm496_vm0, %v979_v54  ;;  %2702 = vmatmul.msk.bf16.gmra.mxu1 %vm496_vm0, %v979_v54 }
 0x151   : > { %2691 = vmatmul.msk.bf16.gmra.mxu0 %vm496_vm0, %v980_v41  ;;  %2703 = vmatmul.msk.bf16.gmra.mxu1 %vm496_vm0, %v980_v41 }
 0x152   : > { %3112 = shalt.err (!%p3109_p12)  }
 0x153   : > { %455 = dma.hbm_to_vmem [thread:$0]  %s451_s21, 256, %s453_s24, [#allocation4] }
 0x154   : > { %s5727_s20 = smov (!%p437_p3, %s436_s20), 15  ;;  %s3276_s27 = smov [#allocation2 + $0x10]  }
 0x155   : > { %s470_s1 = sshll.u32 %s3276_s27, 4  ;;  %s2680_s9 = sshll.u32 %s5727_s20, 4  ;;  %s471_s1 = int_to_ptr.vmem [resolvable:$true] %s470_s1 }
 0x156   : > { %s457_s29 = sadd.s32 %s2680_s9, %s2679_s25 }
 0x157   : > { %s458_s18 = scalar_lea.hbm %s5512_s17, %s457_s29 }
 0x158   : > { %s468_s22 = sshll.u32 %s458_s18, 4  ;;  %s469_s22 = int_to_ptr.hbm [resolvable:$true] %s468_s22 }
 0x159   : > { %s3125_s8 = sshra.s32 %s469_s22, 4  ;;  %s3126_s8 = int_to_ptr.hbm [resolvable:$true] %s3125_s8 }
 0x15a   : > { %s3127_s7 = scalar_lea.hbm %s3126_s8, 16  ;;  %p3130_p0 = scmp.lt.s32.totalorder %s3126_s8, %s5512_s17 }
 0x15b   : > { %p3128_p13 = scmp.ne.s32.totalorder %s3126_s8, %s3127_s7  ;;  %p3131_p5 = scmp.lt.s32.totalorder %s3105_s19, %s3127_s7 }
 0x15d   : > { %p3132_p6 = por %p3131_p5, %p3130_p0 }
 0x15f   : > { %p3133_p7 = pnand %p3132_p6, %p3128_p13 }
 0x161   : > { %3136 = shalt.err (!%p3133_p7)  }
 0x162   : > { %473 = dma.hbm_to_vmem [thread:$0]  %s469_s22, 256, %s471_s1, [#allocation4 + $0x1] }
 0x163   : > { %s5519_s25 = sshll.u32 %s3469_s5, 7 }
 0x164   : > { %s4092_s24 = scalar_lea.vmem [#allocation16], %s5519_s25 }
 0x16e   : > { %v1021_v58 = vpop.f32.mrf.mxu0  ;;  %v4058_v32 = vpop.f32.mrf.mxu1 }
 0x176   : > { %v1023_v39 = vpop.f32.mrf.mxu0  ;;  %v4060_v15 = vpop.f32.mrf.mxu1 }
 0x17e   : > { %v1026_v40 = vpop.f32.mrf.mxu0  ;;  %v4062_v1 = vpop.f32.mrf.mxu1 }
 0x17f   : > { %5513 = vst [vmem:[#allocation35_spill] sm:$0xff] %v4062_v1 }
 0x186   : > { %v1028_v62 = vpop.f32.mrf.mxu0  ;;  %v4064_v16 = vpop.f32.mrf.mxu1 }
 0x187   : > { %5514 = vst [vmem:[#allocation36_spill] sm:$0xff] %v4064_v16 }
 0x18e   : > { %v1031_v5 = vpop.f32.mrf.mxu0  ;;  %v4066_v7 = vpop.f32.mrf.mxu1 }
 0x18f   : > { %5515 = vst [vmem:[#allocation37_spill] sm:$0xff] %v4066_v7 }
 0x196   : > { %v1033_v23 = vpop.f32.mrf.mxu0  ;;  %v4068_v57 = vpop.f32.mrf.mxu1 }
 0x197   : > { %5516 = vst [vmem:[#allocation38_spill] sm:$0xff] %v4068_v57 }
 0x19e   : > { %v1036_v61 = vpop.f32.mrf.mxu0  ;;  %v4070_v34 = vpop.f32.mrf.mxu1 }
 0x19f   : > { %5517 = vst [vmem:[#allocation39_spill] sm:$0xff] %v4070_v34 }
 0x1a5   : > { %v1056_v60 = vpop.f32.mrf.mxu3 }
 0x1a6   : > { %v1038_v63 = vpop.f32.mrf.mxu0  ;;  %v4072_v52 = vpop.f32.mrf.mxu1 }
 0x1a7   : > { %5518 = vst [vmem:[#allocation40_spill] sm:$0xff] %v4072_v52 }
 0x1ad   : > { %v1058_v4 = vpop.f32.mrf.mxu3 }
 0x1ae   : > { %v1041_v6 = vpop.f32.mrf.mxu0  ;;  %v4074_v59 = vpop.f32.mrf.mxu1 }
 0x1b5   : > { %v4076_v24 = vpop.f32.mrf.mxu3 }
 0x1b6   : > { %v1043_v8 = vpop.f32.mrf.mxu0  ;;  %v4078_v11 = vpop.f32.mrf.mxu1 }
 0x1bd   : > { %v4080_v44 = vpop.f32.mrf.mxu3 }
 0x1be   : > { %v1046_v51 = vpop.f32.mrf.mxu0  ;;  %v4082_v18 = vpop.f32.mrf.mxu1 }
 0x1c6   : > { %v1048_v37 = vpop.f32.mrf.mxu0  ;;  %v4084_v21 = vpop.f32.mrf.mxu1 }
 0x1ce   : > { %v1051_v2 = vpop.f32.mrf.mxu0  ;;  %v4086_v19 = vpop.f32.mrf.mxu1 }
 0x1d6   : > { %v1053_v22 = vpop.f32.mrf.mxu0  ;;  %v4088_v12 = vpop.f32.mrf.mxu1 }
 0x1d7   : > { %3225 = dma.done.wait [#allocation4], 256 }
 0x1d8   : > { %3226 = vsyncadd [#allocation4], 4294967040 }
 0x1d9   : > { %3227 = dma.done.wait [#allocation4 + $0x1], 256 }
 0x1da   : > { %3228 = vsyncadd [#allocation4 + $0x1], 4294967040  ;;  %1257 = vmatpush.bf16.msra.mxu2 %v3634_v30  ;;  %1276 = vmatpush.bf16.msra.mxu3 %v3636_v33  ;;  %1302 = vst.msk [vmem:[#allocation3 + $0x28] sm:$0xff] %vm496_vm0, %v1021_v58  ;;  %v4103_v38 = vld [vmem:[#allocation2] sm:$0xff]  ;;  %v4105_v50 = vld [vmem:[#allocation2 + $0x10] sm:$0xff]  ;;  %vm1324_vm2 = vcmask 122880  }
 0x1db   : > { %1303 = vst.msk [vmem:[#allocation3 + $0x30] sm:$0xff] %vm496_vm0, %v1023_v39  ;;  %v1126_v30 = vsel %vm496_vm0, %v4103_v38, 0.0  ;;  %v1142_v33 = vmul.f32 %v4103_v38, %v4103_v38  ;;  %v4113_v9 = vld [vmem:[#allocation2 + $0x8] sm:$0xff]  ;;  %v1132_v47 = vsel %vm496_vm0, %v4105_v50, 0.0  ;;  %v4123_v53 = vld [vmem:[#allocation2 + $0x18] sm:$0xff]  ;;  %v1144_v35 = vmul.f32 %v4105_v50, %v4105_v50  ;;  %p1288_p1 = scmp.gt.s32.totalorder %s3247_s12, 0 }
 0x1dc   : > { %1304 = vst.msk [vmem:[#allocation3 + $0x48] sm:$0xff] %vm496_vm0, %v1026_v40  ;;  %1127 = vadd.xlane.f32.xlu0 %v1126_v30  ;;  %1133 = vadd.xlane.f32.xlu2 %v1132_v47  ;;  %v1143_v26 = vmul.f32 %v4113_v9, %v4113_v9  ;;  %v1129_v42 = vsel %vm496_vm0, %v4113_v9, 0.0  ;;  %v1135_v45 = vsel %vm496_vm0, %v4123_v53, 0.0  ;;  %v1145_v27 = vmul.f32 %v4123_v53, %v4123_v53  ;;  %s1290_s21 = sadd.s32 1, %s3247_s12  ;;  %s2734_s1 = sshll.u32 %s3247_s12, 4 }
 0x1dd   : > { %1305 = vst.msk [vmem:[#allocation3 + $0x50] sm:$0xff] %vm496_vm0, %v1028_v62  ;;  %v1146_v46 = vsel %vm496_vm0, %v1142_v33, 0.0  ;;  %v1152_v20 = vsel %vm496_vm0, %v1144_v35, 0.0  ;;  %s1289_s20 = scalar_select %p1288_p1, 1.0, 0.0 }
 0x1de   : > { %1306 = vst.msk [vmem:[#allocation3 + $0x68] sm:$0xff] %vm496_vm0, %v1031_v5  ;;  %1147 = vadd.xlane.f32.xlu1 %v1146_v46  ;;  %v1149_v25 = vsel %vm496_vm0, %v1143_v26, 0.0  ;;  %v1155_v48 = vsel %vm496_vm0, %v1145_v27, 0.0  ;;  %p4327_p3 = scmp.lt.s32.totalorder %s1290_s21, 2  ;;  %s2724_s9 = sshll.u32 %s3251_s13, 5 }
 0x1df   : > { %1307 = vst.msk [vmem:[#allocation3 + $0x70] sm:$0xff] %vm496_vm0, %v1033_v23  ;;  %s2489_s29 = sadd.s32 %s2734_s1, %s2724_s9  ;;  %s5705_s22 = sld [smem:[#allocation115_spill]] }
 0x1e0   : > { %1308 = vst.msk [vmem:[#allocation3 + $0x88] sm:$0xff] %vm496_vm0, %v1036_v61  ;;  %s1292_s27 = scalar_select %p4327_p3, 1.0, 0.0 }
 0x1e1   : > { %1309 = vst.msk [vmem:[#allocation3 + $0x90] sm:$0xff] %vm496_vm0, %v1038_v63  ;;  %s2725_s6 = sshll.u32 %s2489_s29, 3  ;;  %s2492_s7 = sshll.u32 %s4092_s24, 4  ;;  %s2493_s7 = int_to_ptr.vmem [resolvable:$true] %s2492_s7 }
 0x1e2   : > { %1310 = vst.msk [vmem:[#allocation3 + $0xa8] sm:$0xff] %vm496_vm0, %v1041_v6  ;;  %s2477_s12 = scalar_lea.sflag [#allocation7], %s3469_s5 }
 0x1e3   : > { %1311 = vst.msk [vmem:[#allocation3 + $0xb0] sm:$0xff] %vm496_vm0, %v1043_v8 }
 0x1e4   : > { %1312 = vst.msk [vmem:[#allocation3 + $0xc8] sm:$0xff] %vm496_vm0, %v1046_v51  ;;  %1130 = vadd.xlane.f32.xlu0 %v1129_v42  ;;  %1136 = vadd.xlane.f32.xlu2 %v1135_v45 }
 0x1e5   : > { %1313 = vst.msk [vmem:[#allocation3 + $0xd0] sm:$0xff] %vm496_vm0, %v1048_v37  ;;  %s2491_s8 = scalar_lea.hbm %s5705_s22, %s2725_s6  ;;  %s3169_s21 = scalar_lea.hbm %s5705_s22, 512 }
 0x1e6   : > { %1314 = vst.msk [vmem:[#allocation3 + $0xe8] sm:$0xff] %vm496_vm0, %v1051_v2  ;;  %1150 = vadd.xlane.f32.xlu1 %v1149_v25  ;;  %s2494_s16 = sshll.u32 %s2491_s8, 4  ;;  %s2495_s16 = int_to_ptr.hbm [resolvable:$true] %s2494_s16 }
 0x1e7   : > { %1315 = vst.msk [vmem:[#allocation3 + $0xf0] sm:$0xff] %vm496_vm0, %v1053_v22  ;;  %s3163_s13 = sshra.s32 %s2495_s16, 4  ;;  %s3164_s13 = int_to_ptr.hbm [resolvable:$true] %s3163_s13 }
 0x1e8   : > { %1316 = vst.msk [vmem:[#allocation3 + $0x108] sm:$0xff] %vm496_vm0, %v1056_v60  ;;  %s3165_s26 = scalar_lea.hbm %s3164_s13, 128  ;;  %p3170_p11 = scmp.lt.s32.totalorder %s3164_s13, %s5705_s22 }
 0x1e9   : > { %1317 = vst.msk [vmem:[#allocation3 + $0x110] sm:$0xff] %vm496_vm0, %v1058_v4  ;;  %p3166_p8 = scmp.ne.s32.totalorder %s3164_s13, %s3165_s26  ;;  %p3171_p12 = scmp.lt.s32.totalorder %s3169_s21, %s3165_s26 }
 0x1eb   : > { %p3167_p9 = pnand %p3166_p8, %p3444_p2  ;;  %p3172_p13 = por %p3171_p12, %p3170_p11 }
 0x1ec   : > { %1153 = vadd.xlane.f32.xlu0 %v1152_v20 }
 0x1ed   : > { %p3168_p10 = pneg %p3167_p9 }
 0x1ee   : > { %1156 = vadd.xlane.f32.xlu1 %v1155_v48 }
 0x1ef   : > { %p3173_p0 = pnand %p3172_p13, %p3168_p10 }
 0x24f   : > { %v1128_v14 = vpop.xlane.xlu0 %1127  ;;  %v1134_v13 = vpop.xlane.xlu2 %1133 }
 0x250   : > { %v1138_v49 = vmul.f32 %v1128_v14, %v3621_v10  ;;  %v4145_v39 = vmul.f32 %v1134_v13, %v3621_v10 }
 0x251   : > { %v1148_v54 = vpop.xlane.xlu1 %1147 }
 0x252   : > { %v1162_v31 = vmul.f32 %v1138_v49, %v1138_v49  ;;  %v1158_v55 = vmul.f32 %v1148_v54, %v3621_v10  ;;  %v1164_v61 = vmul.f32 %v4145_v39, %v4145_v39  ;;  %v1170_v25 = vsub.f32 %v4103_v38, %v1138_v49 }
 0x254   : > { %v1166_v28 = vsub.f32 %v1158_v55, %v1162_v31 }
 0x256   : > { %v1174_v29 = vadd.f32 1e-05, %v1166_v28 }
 0x257   : > { %v1131_v56 = vpop.xlane.xlu0 %1130  ;;  %v1137_v3 = vpop.xlane.xlu2 %1136 }
 0x258   : > { %2913 = vrsqrt.f32 %v1174_v29  ;;  %v1139_v36 = vmul.f32 %v1131_v56, %v3621_v10  ;;  %v4148_v62 = vmul.f32 %v1137_v3, %v3621_v10  ;;  %vm1184_vm6 = vweird.f32 %v1174_v29 }
 0x259   : > { %v1151_v17 = vpop.xlane.xlu1 %1150 }
 0x25a   : > { %v1163_v41 = vmul.f32 %v1139_v36, %v1139_v36  ;;  %v1159_v58 = vmul.f32 %v1151_v17, %v3621_v10  ;;  %v1165_v4 = vmul.f32 %v4148_v62, %v4148_v62  ;;  %v1171_v56 = vsub.f32 %v4113_v9, %v1139_v36 }
 0x25c   : > { %v1167_v40 = vsub.f32 %v1159_v58, %v1163_v41 }
 0x25e   : > { %v2914_v5 = vpop.eup %2913  ;;  %v1175_v23 = vadd.f32 1e-05, %v1167_v40 }
 0x25f   : > { %v1179_v60 = vmul.f32 %v2914_v5, %v1174_v29  ;;  %v1154_v63 = vpop.xlane.xlu0 %1153  ;;  %vm1185_vm5 = vweird.f32 %v2914_v5 }
 0x260   : > { %2915 = vrsqrt.f32 %v1175_v23  ;;  %v1160_v6 = vmul.f32 %v1154_v63, %v3621_v10  ;;  %vm1186_vm7 = vmor %vm1184_vm6, %vm1185_vm5  ;;  %vm1194_vm9 = vweird.f32 %v1175_v23 }
 0x261   : > { %v1180_v8 = vmul.f32 %v2914_v5, %v1179_v60  ;;  %v1157_v51 = vpop.xlane.xlu1 %1156 }
 0x262   : > { %v1161_v37 = vmul.f32 %v1157_v51, %v3621_v10  ;;  %v1168_v2 = vsub.f32 %v1160_v6, %v1164_v61  ;;  %v1173_v61 = vsub.f32 %v4123_v53, %v4148_v62 }
 0x263   : > { %v1181_v22 = vmul.f32 0.5, %v1180_v8 }
 0x264   : > { %v1169_v30 = vsub.f32 %v1161_v37, %v1165_v4  ;;  %v1176_v33 = vadd.f32 1e-05, %v1168_v2 }
 0x265   : > { %v1182_v47 = vsub.f32 1.5, %v1181_v22 }
 0x266   : > { %v2916_v46 = vpop.eup %2915  ;;  %v1177_v26 = vadd.f32 1e-05, %v1169_v30  ;;  %2917 = vrsqrt.f32 %v1176_v33  ;;  %vm1204_vm11 = vweird.f32 %v1176_v33 }
 0x267   : > { %v1189_v42 = vmul.f32 %v2916_v46, %v1175_v23  ;;  %v1183_v45 = vmul.f32 %v2914_v5, %v1182_v47  ;;  %vm1195_vm8 = vweird.f32 %v2916_v46 }
 0x268   : > { %2919 = vrsqrt.f32 %v1177_v26  ;;  %vm1196_vm10 = vmor %vm1194_vm9, %vm1195_vm8  ;;  %vm1214_vm13 = vweird.f32 %v1177_v26 }
 0x269   : > { %v1190_v35 = vmul.f32 %v2916_v46, %v1189_v42  ;;  %v1187_v27 = vsel %vm1186_vm7, %v2914_v5, %v1183_v45  ;;  %v1172_v5 = vsub.f32 %v4105_v50, %v4145_v39 }
 0x26a   : > { %v1218_v20 = vmul.f32 %v1187_v27, %v1170_v25  ;;  %v5354_v25 = vmov 0.0  }
 0x26b   : > { %v1191_v10 = vmul.f32 0.5, %v1190_v35  ;;  %1335 = vst.msk [vmem:[#allocation3 + $0x18] sm:$0x1] %vm1324_vm2, %v5354_v25  ;;  %v4208_v35 = vld [vmem:[#allocation3 + $0xa8] sm:$0xff] }
 0x26c   : > { %v2918_v48 = vpop.eup %2917  ;;  %v1222_v31 = vmul.f32 %v3673_v0, %v1218_v20  ;;  %1325 = vst.msk [vmem:[#allocation3 + $0x7] sm:$0x1] %vm1324_vm2, %v5354_v25  ;;  %v4214_v20 = vld [vmem:[#allocation3 + $0xb0] sm:$0xff] }
 0x26d   : > { %v1192_v14 = vsub.f32 1.5, %v1191_v10  ;;  %v1199_v13 = vmul.f32 %v2918_v48, %v1176_v33  ;;  %vm1205_vm12 = vweird.f32 %v2918_v48  ;;  %1326 = vst.msk [vmem:[#allocation3 + $0x27] sm:$0x1] %vm1324_vm2, %v5354_v25 }
 0x26e   : > { %v2920_v54 = vpop.eup %2919  ;;  %v1226_v41 = vadd.f32 %v3690_v43, %v1222_v31  ;;  %vm1206_vm15 = vmor %vm1204_vm11, %vm1205_vm12  ;;  %1327 = vst.msk [vmem:[#allocation3 + $0x47] sm:$0x1] %vm1324_vm2, %v5354_v25 }
 0x26f   : > { %v1209_v55 = vmul.f32 %v2920_v54, %v1177_v26  ;;  %v1200_v28 = vmul.f32 %v2918_v48, %v1199_v13  ;;  %v1193_v29 = vmul.f32 %v2916_v46, %v1192_v14  ;;  %vm1215_vm14 = vweird.f32 %v2920_v54  ;;  %1328 = vst.msk [vmem:[#allocation3 + $0x67] sm:$0x1] %vm1324_vm2, %v5354_v25  ;;  %v4225_v13 = vld [vmem:[#allocation3 + $0xcf] sm:$0xff] }
 0x270   : > { %vm1216_vm1 = vmor %vm1214_vm13, %vm1215_vm14  ;;  %v1230_v63 = vpack.c.bf16 %v1226_v41, %v1226_v41  ;;  %1329 = vst.msk [vmem:[#allocation3 + $0x87] sm:$0x1] %vm1324_vm2, %v5354_v25  ;;  %v4247_v41 = vld [vmem:[#allocation3 + $0xef] sm:$0xff] }
 0x271   : > { %v1210_v38 = vmul.f32 %v2920_v54, %v1209_v55  ;;  %v1201_v49 = vmul.f32 0.5, %v1200_v28  ;;  %v1197_v17 = vsel %vm1196_vm10, %v2916_v46, %v1193_v29  ;;  %1330 = vst.msk [vmem:[#allocation3 + $0xa7] sm:$0x1] %vm1324_vm2, %v5354_v25 }
 0x272   : > { %v1219_v3 = vmul.f32 %v1197_v17, %v1171_v56  ;;  %v1238_v2 = vunpack.c.l.b16 %v1230_v63  ;;  %1331 = vst.msk [vmem:[#allocation3 + $0xc7] sm:$0x1] %vm1324_vm2, %v5354_v25  ;;  %v1294_v17 = vld [vmem:[#allocation11 + $0x4] sm:$0x7] }
 0x273   : > { %v1211_v58 = vmul.f32 0.5, %v1210_v38  ;;  %v1202_v40 = vsub.f32 1.5, %v1201_v49  ;;  %1332 = vst.msk [vmem:[#allocation3 + $0xe7] sm:$0x1] %vm1324_vm2, %v5354_v25  ;;  %v4241_v38 = vld [vmem:[#allocation3 + $0xc9] sm:$0xff] }
 0x274   : > { %v1223_v23 = vmul.f32 %v3673_v0, %v1219_v3  ;;  %1333 = vst.msk [vmem:[#allocation3 + $0x107] sm:$0x1] %vm1324_vm2, %v5354_v25  ;;  %v1787_v49 = vld [vmem:[#allocation13] sm:$0x7] }
 0x275   : > { %v1212_v9 = vsub.f32 1.5, %v1211_v58  ;;  %v1203_v36 = vmul.f32 %v2918_v48, %v1202_v40  ;;  %1334 = vst.msk [vmem:[#allocation3 + $0x127] sm:$0x1] %vm1324_vm2, %v5354_v25  ;;  %v4249_v58 = vld [vmem:[#allocation3 + $0xe8] sm:$0xff] }
 0x276   : > { %v1227_v60 = vadd.f32 %v3690_v43, %v1223_v23  ;;  %1336 = vst.msk [vmem:[#allocation3 + $0x38] sm:$0x1] %vm1324_vm2, %v5354_v25 }
 0x277   : > { %v1207_v4 = vsel %vm1206_vm15, %v2918_v48, %v1203_v36  ;;  %v1213_v6 = vmul.f32 %v2920_v54, %v1212_v9  ;;  %1337 = vst.msk [vmem:[#allocation3 + $0x58] sm:$0x1] %vm1324_vm2, %v5354_v25  ;;  %v4218_v48 = vld [vmem:[#allocation3 + $0xa9] sm:$0xff]  ;;  %v4255_v9 = vperm.slane %v1294_v17, 0 }
 0x278   : > { %v1231_v8 = vpack.c.bf16 %v1227_v60, %v1227_v60  ;;  %v1220_v51 = vmul.f32 %v1207_v4, %v1172_v5  ;;  %1338 = vst.msk [vmem:[#allocation3 + $0x78] sm:$0x1] %vm1324_vm2, %v5354_v25  ;;  %v4223_v14 = vld [vmem:[#allocation3 + $0xa7] sm:$0xff]  ;;  %v4261_v36 = vld [vmem:[#allocation3 + $0xd0] sm:$0xff] }
 0x279   : > { %v1217_v37 = vsel %vm1216_vm1, %v2920_v54, %v1213_v6  ;;  %1339 = vst.msk [vmem:[#allocation3 + $0x98] sm:$0x1] %vm1324_vm2, %v5354_v25  ;;  %v4227_v54 = vld [vmem:[#allocation3 + $0xc8] sm:$0xff]  ;;  %v4265_v60 = vld [vmem:[#allocation3 + $0xf0] sm:$0xff] }
 0x27a   : > { %v1239_v22 = vunpack.c.l.b16 %v1231_v8  ;;  %v1221_v50 = vmul.f32 %v1217_v37, %v1173_v61  ;;  %v1224_v39 = vmul.f32 %v3673_v0, %v1220_v51  ;;  %1340 = vst.msk [vmem:[#allocation3 + $0xb8] sm:$0x1] %vm1324_vm2, %v5354_v25  ;;  %v4231_v31 = vld [vmem:[#allocation3 + $0xc7] sm:$0xff]  ;;  %v1520_v51 = vmul.f32 %v4255_v9, %v4225_v13  ;;  %v1788_v37 = vld [vmem:[#allocation13 + $0x4] sm:$0x7] }
 0x27b   : > { %5521 = vst [vmem:[#allocation42_spill] sm:$0xff] %v4208_v35  ;;  %v4245_v3 = vld [vmem:[#allocation3 + $0xe7] sm:$0xff]  ;;  %v1519_v6 = vmul.f32 %v4255_v9, %v4231_v31 }
 0x27c   : > { %v1242_v30 = vpack.c.b16 %v1239_v22, %v1238_v2  ;;  %v1225_v33 = vmul.f32 %v3673_v0, %v1221_v50  ;;  %v1228_v53 = vadd.f32 %v3690_v43, %v1224_v39  ;;  %v1293_v0 = vld [vmem:[#allocation11] sm:$0x7]  ;;  %1341 = vst.msk [vmem:[#allocation3 + $0xd8] sm:$0x1] %vm1324_vm2, %v5354_v25  ;;  %v4285_v2 = vperm.slane %v1787_v49, 0 }
 0x27d   : > { %v4212_v27 = vperm.slane %v1293_v0, 0  ;;  %5523 = vst [vmem:[#allocation44_spill] sm:$0xff] %v4214_v20  ;;  %v4216_v10 = vperm.slane %v1293_v0, 1  ;;  %v4251_v5 = vld [vmem:[#allocation3 + $0xe9] sm:$0xff]  ;;  %v4253_v23 = vperm.slane %v1293_v0, 2  ;;  %v4287_v22 = vperm.slane %v1787_v49, 1 }
 0x27e   : > { %2705 = vmatmul.msk.bf16.vlgmr.msra.gmra.mxu2 %vm496_vm0, %v1242_v30  ;;  %2707 = vmatmul.msk.bf16.vlgmr.msra.gmra.mxu3 %vm496_vm0, %v1242_v30  ;;  %v1229_v62 = vadd.f32 %v3690_v43, %v1225_v33  ;;  %v1232_v47 = vpack.c.bf16 %v1228_v53, %v1228_v53  ;;  %v4206_v43 = vld [vmem:[#allocation3 + $0xaf] sm:$0xff]  ;;  %5524 = vst [vmem:[#allocation45_spill] sm:$0xff] %v4218_v48  ;;  %v4294_v30 = vperm.slane %v1294_v17, 2  ;;  %v4298_v33 = vperm.slane %v1787_v49, 2 }
 0x27f   : > { %5520 = vst [vmem:[#allocation41_spill] sm:$0xff] %v4206_v43  ;;  %v1372_v55 = vmul.f32 %v4212_v27, %v4223_v14  ;;  %v1373_v28 = vmul.f32 %v4212_v27, %v4206_v43  ;;  %v1421_v29 = vmul.f32 %v4216_v10, %v4208_v35  ;;  %v1422_v56 = vmul.f32 %v4216_v10, %v4214_v20 }
 0x280   : > { %v1233_v46 = vpack.c.bf16 %v1229_v62, %v1229_v62  ;;  %v1240_v26 = vunpack.c.l.b16 %v1232_v47  ;;  %5522 = vst [vmem:[#allocation43_spill] sm:$0xff] %v4212_v27  ;;  %v1470_v4 = vmul.f32 %v4253_v23, %v4218_v48  ;;  %v4300_v53 = vstv %s1289_s20 }
 0x281   : > { %1342 = vst.msk [vmem:[#allocation3 + $0xf8] sm:$0x1] %vm1324_vm2, %v5354_v25  ;;  %v1437_v40 = vadd.f32 %v1421_v29, %v1372_v55  ;;  %v1438_v61 = vadd.f32 %v1422_v56, %v1373_v28  ;;  %v4267_v63 = vld [vmem:[#allocation3 + $0xb1] sm:$0xff]  ;;  %v4316_v0 = vperm.slane %v1788_v37, 0  ;;  %v4322_v29 = vperm.slane %v1788_v37, 2 }
 0x282   : > { %v1241_v42 = vunpack.c.l.b16 %v1233_v46  ;;  %5525 = vst [vmem:[#allocation46_spill] sm:$0xff] %v4223_v14  ;;  %v4304_v46 = vld [vmem:[#allocation13 + $0x8] sm:$0x7] }
 0x283   : > { %5526 = vst [vmem:[#allocation47_spill] sm:$0xff] %v4225_v13  ;;  %v4277_v8 = vld [vmem:[#allocation3 + $0xd1] sm:$0xff]  ;;  %v4325_v56 = vperm.slane %v4304_v46, 0 }
 0x284   : > { %v1243_v45 = vpack.c.b16 %v1241_v42, %v1240_v26  ;;  %5527 = vst [vmem:[#allocation48_spill] sm:$0xff] %v4227_v54  ;;  %v4308_v26 = vperm.slane %v1788_v37, 1  ;;  %v1618_v28 = vmul.f32 %v4294_v30, %v4277_v8 }
 0x285   : > { %1343 = vst.msk [vmem:[#allocation3 + $0x118] sm:$0x1] %vm1324_vm2, %v5354_v25 }
 0x286   : > { %5528 = vst [vmem:[#allocation49_spill] sm:$0xff] %v4231_v31 }
 0x287   : > { %5529 = vst [vmem:[#allocation50_spill] sm:$0xff] %v4241_v38 }
 0x288   : > { %1344 = vst.msk [vmem:[#allocation3 + $0x138] sm:$0x1] %vm1324_vm2, %v5354_v25  ;;  %v4290_v50 = vld [vmem:[#allocation3 + $0xf1] sm:$0xff] }
 0x289   : > { %5530 = vst [vmem:[#allocation51_spill] sm:$0xff] %v4245_v3 }
 0x28a   : > { %5531 = vst [vmem:[#allocation52_spill] sm:$0xff] %v4253_v23 }
 0x28b   : > { %5532 = vst [vmem:[#allocation53_spill] sm:$0xff] %v4255_v9 }
 0x28c   : > { %1802 = vst.msk [vmem:[#allocation3 + $0xa8] sm:$0xff] %vm496_vm0, %v4074_v59  ;;  %v4273_v59 = vperm.slane %v1294_v17, 1 }
 0x28d   : > { %5533 = vst [vmem:[#allocation54_spill] sm:$0xff] %v4261_v36 }
 0x28e   : > { %2706 = vmatmul.msk.bf16.gmra.mxu2 %vm496_vm0, %v1243_v45  ;;  %2708 = vmatmul.msk.bf16.gmra.mxu3 %vm496_vm0, %v1243_v45  ;;  %1804 = vst.msk [vmem:[#allocation3 + $0xc8] sm:$0xff] %vm496_vm0, %v4082_v18  ;;  %v1471_v18 = vmul.f32 %v4253_v23, %v4267_v63  ;;  %v1568_v39 = vmul.f32 %v4273_v59, %v4227_v54 }
 0x28f   : > { %5534 = vst [vmem:[#allocation55_spill] sm:$0xff] %v4267_v63  ;;  %v1569_v47 = vmul.f32 %v4273_v59, %v4261_v36 }
 0x290   : > { %5535 = vst [vmem:[#allocation56_spill] sm:$0xff] %v4273_v59  ;;  %v1487_v62 = vadd.f32 %v1471_v18, %v1438_v61 }
 0x291   : > { %1806 = vst.msk [vmem:[#allocation3 + $0xe8] sm:$0xff] %vm496_vm0, %v4086_v19  ;;  %v1486_v19 = vadd.f32 %v1470_v4, %v1437_v40 }
 0x292   : > { %5536 = vst [vmem:[#allocation57_spill] sm:$0xff] %v4277_v8  ;;  %v1536_v55 = vadd.f32 %v1520_v51, %v1487_v62 }
 0x293   : > { %1803 = vst.msk [vmem:[#allocation3 + $0xb0] sm:$0xff] %vm496_vm0, %v4078_v11  ;;  %v1295_v11 = vld [vmem:[#allocation11 + $0x8] sm:$0x7]  ;;  %v1535_v42 = vadd.f32 %v1519_v6, %v1486_v19  ;;  %v4351_v19 = vperm.slane %v4304_v46, 1 }
 0x294   : > { %5537 = vst [vmem:[#allocation58_spill] sm:$0xff] %v4285_v2  ;;  %v4312_v45 = vperm.slane %v1295_v11, 0  ;;  %v4335_v61 = vperm.slane %v1295_v11, 1  ;;  %v1585_v6 = vadd.f32 %v1569_v47, %v1536_v55 }
 0x295   : > { %5538 = vst [vmem:[#allocation59_spill] sm:$0xff] %v4287_v22  ;;  %v1584_v49 = vadd.f32 %v1568_v39, %v1535_v42  ;;  %v4339_v4 = vld [vmem:[#allocation3 + $0xc8] sm:$0xff]  ;;  %v4357_v42 = vperm.slane %v1295_v11, 2 }
 0x296   : > { %5539 = vst [vmem:[#allocation60_spill] sm:$0xff] %v4294_v30  ;;  %v1667_v17 = vmul.f32 %v4312_v45, %v4245_v3  ;;  %v1668_v40 = vmul.f32 %v4312_v45, %v4247_v41  ;;  %v4346_v51 = vmul.f32 %v4308_v26, %v4339_v4  ;;  %v1716_v62 = vmul.f32 %v4335_v61, %v4249_v58 }
 0x297   : > { %1805 = vst.msk [vmem:[#allocation3 + $0xd0] sm:$0xff] %vm496_vm0, %v4084_v21  ;;  %v1617_v21 = vmul.f32 %v4294_v30, %v4241_v38  ;;  %v1717_v47 = vmul.f32 %v4335_v61, %v4265_v60  ;;  %v1634_v48 = vadd.f32 %v1618_v28, %v1585_v6  ;;  %v1765_v28 = vmul.f32 %v4357_v42, %v4251_v5 }
 0x298   : > { %1807 = vst.msk [vmem:[#allocation3 + $0xf0] sm:$0xff] %vm496_vm0, %v4088_v12  ;;  %v1893_v12 = vld [vmem:[#allocation3 + $0xa8] sm:$0xff]  ;;  %v1766_v6 = vmul.f32 %v4357_v42, %v4290_v50 }
 0x299   : > { %5540 = vst [vmem:[#allocation61_spill] sm:$0xff] %v4308_v26  ;;  %v1910_v18 = vmul.f32 %v4287_v22, %v1893_v12  ;;  %v4348_v37 = vld [vmem:[#allocation3 + $0xe8] sm:$0xff]  ;;  %v1633_v39 = vadd.f32 %v1617_v21, %v1584_v49 }
 0x29a   : > { %5541 = vst [vmem:[#allocation62_spill] sm:$0xff] %v4312_v45  ;;  %v1845_v55 = vld [vmem:[#allocation3 + $0xaf] sm:$0xff] }
 0x29b   : > { %1819 = vst.msk [vmem:[#allocation3 + $0xa7] sm:$0x1] %vm1324_vm2, %v5354_v25  ;;  %v1894_v12 = vld [vmem:[#allocation3 + $0xb0] sm:$0xff]  ;;  %v1862_v21 = vmul.f32 %v4285_v2, %v1845_v55  ;;  %v1683_v14 = vadd.f32 %v1667_v17, %v1633_v39 }
 0x29c   : > { %5542 = vst [vmem:[#allocation63_spill] sm:$0xff] %v4316_v0  ;;  %v1942_v63 = vld [vmem:[#allocation3 + $0xa9] sm:$0xff]  ;;  %v1911_v49 = vmul.f32 %v4287_v22, %v1894_v12 }
 0x29d   : > { %1820 = vst.msk [vmem:[#allocation3 + $0xc7] sm:$0x1] %vm1324_vm2, %v5354_v25  ;;  %v1959_v20 = vmul.f32 %v4298_v33, %v1942_v63  ;;  %v1732_v39 = vadd.f32 %v1716_v62, %v1683_v14  ;;  %v4414_v14 = vperm.slane %v4304_v46, 2  ;;  %v4416_v62 = vld [vmem:[#allocation3 + $0x107] sm:$0xff] }
 0x29e   : > { %5543 = vst [vmem:[#allocation64_spill] sm:$0xff] %v4325_v56  ;;  %v4366_v35 = vld [vmem:[#allocation3 + $0xcf] sm:$0xff]  ;;  %v1927_v34 = vadd.f32 %v1911_v49, %v1862_v21 }
 0x29f   : > { %5545 = vst [vmem:[#allocation65_spill] sm:$0xff] %v4335_v61  ;;  %v4368_v11 = vld [vmem:[#allocation3 + $0xd0] sm:$0xff]  ;;  %v2009_v55 = vmul.f32 %v4316_v0, %v4366_v35 }
 0x2a0   : > { %1821 = vst.msk [vmem:[#allocation3 + $0xe7] sm:$0x1] %vm1324_vm2, %v5354_v25  ;;  %v4370_v43 = vld [vmem:[#allocation3 + $0xc9] sm:$0xff]  ;;  %v4386_v57 = vmul.f32 %v4308_v26, %v4368_v11 }
 0x2a1   : > { %5546 = vst [vmem:[#allocation66_spill] sm:$0xff] %v4339_v4  ;;  %v4380_v12 = vld [vmem:[#allocation3 + $0xef] sm:$0xff]  ;;  %v4390_v17 = vmul.f32 %v4322_v29, %v4370_v43 }
 0x2a2   : > { %1829 = vst.msk [vmem:[#allocation3 + $0xb8] sm:$0x1] %vm1324_vm2, %v5354_v25  ;;  %v4382_v63 = vld [vmem:[#allocation3 + $0xf0] sm:$0xff]  ;;  %v1844_v52 = vld [vmem:[#allocation3 + $0xa7] sm:$0xff]  ;;  %v4397_v1 = vmul.f32 %v4325_v56, %v4380_v12 }
 0x2a3   : > { %5547 = vst [vmem:[#allocation67_spill] sm:$0xff] %v4348_v37  ;;  %v1861_v7 = vmul.f32 %v4285_v2, %v1844_v52  ;;  %v4411_v52 = vmul.f32 %v4351_v19, %v4382_v63  ;;  %v4426_v4 = vld [vmem:[#allocation3 + $0x108] sm:$0xff] }
 0x2a4   : > { %5548 = vst [vmem:[#allocation68_spill] sm:$0xff] %v4351_v19  ;;  %v4393_v16 = vld [vmem:[#allocation3 + $0xc7] sm:$0xff] }
 0x2a5   : > { %5549 = vst [vmem:[#allocation69_spill] sm:$0xff] %v4357_v42  ;;  %v2008_v49 = vmul.f32 %v4316_v0, %v4393_v16 }
 0x2a6   : > { %1830 = vst.msk [vmem:[#allocation3 + $0xd8] sm:$0x1] %vm1324_vm2, %v5354_v25 }
 0x2a7   : > { %1831 = vst.msk [vmem:[#allocation3 + $0xf8] sm:$0x1] %vm1324_vm2, %v5354_v25  ;;  %v1684_v25 = vadd.f32 %v1668_v40, %v1634_v48  ;;  %v4401_v48 = vmul.f32 %v4351_v19, %v4348_v37  ;;  %v4403_v40 = vld [vmem:[#allocation3 + $0xe9] sm:$0xff]  ;;  %v4420_v37 = vstv %s1292_s27  ;;  %v5561_v19 = vmov 0.0  }
 0x2a8   : > { %5550 = vst [vmem:[#allocation70_spill] sm:$0xff] %v4368_v11  ;;  %v4407_v26 = vld [vmem:[#allocation3 + $0xe7] sm:$0xff] }
 0x2a9   : > { %5551 = vst [vmem:[#allocation71_spill] sm:$0xff] %v4370_v43  ;;  %v1733_v21 = vadd.f32 %v1717_v47, %v1684_v25  ;;  %v2733_v43 = vld [vmem:[#allocation14] sm:$0xff]  ;;  %v4422_v25 = vadd.f32 %v1765_v28, %v1732_v39  ;;  %v1926_v47 = vadd.f32 %v1910_v18, %v1861_v7  ;;  %v1943_v0 = vld [vmem:[#allocation3 + $0xb1] sm:$0xff]  ;;  %v2155_v11 = vmul.f32 %v4325_v56, %v4407_v26 }
 0x2aa   : > { %5552 = vst [vmem:[#allocation72_spill] sm:$0xff] %v4380_v12  ;;  %v4418_v12 = vld [vmem:[#allocation3 + $0x10f] sm:$0xff]  ;;  %v4437_v28 = vmul.f32 %v4414_v14, %v4403_v40  ;;  %v1374_v7 = vmul.f32 %v4212_v27, %v4231_v31  ;;  %2386 = vmatpush.bf16.msrb.mxu2 %v2733_v43  ;;  %2737 = vmatpush.bf16.msrb.mxu3 %v2733_v43 }
 0x2ab   : > { %5553 = vst [vmem:[#allocation73_spill] sm:$0xff] %v4382_v63  ;;  %v4430_v46 = vadd.f32 %v1766_v6, %v1733_v21  ;;  %v1960_v63 = vmul.f32 %v4298_v33, %v1943_v0  ;;  %v4441_v18 = vld [vmem:[#allocation3 + $0x110] sm:$0xff]  ;;  %v1375_v21 = vmul.f32 %v4212_v27, %v4225_v13  ;;  %v1423_v43 = vmul.f32 %v4216_v10, %v4227_v54  ;;  %v4467_v13 = vld [vmem:[#allocation3 + $0x28] sm:$0xff] }
 0x2ac   : > { %5554 = vst [vmem:[#allocation74_spill] sm:$0xff] %v4403_v40  ;;  %v4443_v39 = vld [vmem:[#allocation3 + $0x109] sm:$0xff]  ;;  %v4451_v56 = vld [vmem:[#allocation3 + $0x111] sm:$0xff]  ;;  %v1521_v54 = vmul.f32 %v4255_v9, %v4245_v3  ;;  %v1570_v3 = vmul.f32 %v4273_v59, %v4249_v58 }
 0x2ad   : > { %5555 = vst [vmem:[#allocation75_spill] sm:$0xff] %v4407_v26  ;;  %v1976_v31 = vadd.f32 %v1960_v63, %v1927_v34  ;;  %v4469_v27 = vld [vmem:[#allocation3 + $0x30] sm:$0xff]  ;;  %v1473_v63 = vmul.f32 %v4253_v23, %v4277_v8 }
 0x2ae   : > { %5556 = vst [vmem:[#allocation76_spill] sm:$0xff] %v4411_v52  ;;  %v4433_v52 = vld [vmem:[#allocation3 + $0xd1] sm:$0xff] }
 0x2af   : > { %5557 = vst [vmem:[#allocation77_spill] sm:$0xff] %v4414_v14  ;;  %v2107_v6 = vmul.f32 %v4322_v29, %v4433_v52  ;;  %v4447_v0 = vld [vmem:[#allocation3 + $0xf1] sm:$0xff] }
 0x2b0   : > { %5558 = vst [vmem:[#allocation78_spill] sm:$0xff] %v4418_v12  ;;  %v4457_v40 = vmul.f32 %v4414_v14, %v4447_v0 }
 0x2b1   : > { %5559 = vst [vmem:[#allocation79_spill] sm:$0xff] %v4420_v37  ;;  %v1975_v37 = vadd.f32 %v1959_v20, %v1926_v47  ;;  %v1424_v20 = vmul.f32 %v4216_v10, %v4261_v36  ;;  %v4465_v47 = vld [vmem:[#allocation3 + $0x2f] sm:$0xff] }
 0x2b2   : > { %5560 = vst [vmem:[#allocation80_spill] sm:$0xff] %v4426_v4  ;;  %v4481_v36 = vld [vmem:[#allocation3 + $0x29] sm:$0xff] }
 0x2b3   : > { %1822 = vst.msk [vmem:[#allocation3 + $0x107] sm:$0x1] %vm1324_vm2, %v5561_v19  ;;  %v2024_v34 = vadd.f32 %v2008_v49, %v1975_v37  ;;  %v1439_v37 = vadd.f32 %v1423_v43, %v1374_v7  ;;  %v1440_v49 = vadd.f32 %v1424_v20, %v1375_v21  ;;  %v1669_v43 = vmul.f32 %v4312_v45, %v4416_v62 }
 0x2b4   : > { %5562 = vst [vmem:[#allocation81_spill] sm:$0xff] %v4441_v18 }
 0x2b5   : > { %5563 = vst [vmem:[#allocation82_spill] sm:$0xff] %v4443_v39  ;;  %v2073_v8 = vadd.f32 %v4346_v51, %v2024_v34  ;;  %v1489_v7 = vadd.f32 %v1473_v63, %v1440_v49  ;;  %v4501_v51 = vld [vmem:[#allocation3 + $0x47] sm:$0xff]  ;;  %v1768_v63 = vmul.f32 %v4357_v42, %v4451_v56  ;;  %v4524_v49 = vld [vmem:[#allocation3 + $0x4f] sm:$0xff] }
 0x2b6   : > { %5564 = vst [vmem:[#allocation83_spill] sm:$0xff] %v4447_v0 }
 0x2b7   : > { %5565 = vst [vmem:[#allocation84_spill] sm:$0xff] %v4451_v56  ;;  %v2122_v21 = vadd.f32 %v4390_v17, %v2073_v8  ;;  %v1767_v17 = vmul.f32 %v4357_v42, %v4443_v39  ;;  %v5575_v39 = vld [vmem:[#allocation66_spill] sm:$0xff] }
 0x2b8   : > { %1808 = vst.msk [vmem:[#allocation3 + $0x108] sm:$0xff] %vm496_vm0, %v4076_v24  ;;  %v1472_v24 = vmul.f32 %v4253_v23, %v4241_v38  ;;  %v1522_v38 = vmul.f32 %v4255_v9, %v4247_v41  ;;  %v1571_v23 = vmul.f32 %v4273_v59, %v4265_v60 }
 0x2b9   : > { %1809 = vst.msk [vmem:[#allocation3 + $0x110] sm:$0xff] %vm496_vm0, %v4080_v44  ;;  %v4479_v44 = vld [vmem:[#allocation3 + $0x27] sm:$0xff]  ;;  %v2171_v8 = vadd.f32 %v2155_v11, %v2122_v21  ;;  %v1864_v11 = vmul.f32 %v4366_v35, %v4285_v2 }
 0x2ba   : > { %5566 = vst [vmem:[#allocation85_spill] sm:$0xff] %v4465_v47  ;;  %v1538_v34 = vadd.f32 %v1522_v38, %v1489_v7  ;;  %v4529_v7 = vld [vmem:[#allocation3 + $0x48] sm:$0xff] }
 0x2bb   : > { %5567 = vst [vmem:[#allocation86_spill] sm:$0xff] %v4467_v13  ;;  %v4483_v13 = vld [vmem:[#allocation3 + $0x31] sm:$0xff] }
 0x2bc   : > { %5568 = vst [vmem:[#allocation87_spill] sm:$0xff] %v4469_v27  ;;  %v2025_v27 = vadd.f32 %v2009_v55, %v1976_v31  ;;  %v1488_v55 = vadd.f32 %v1472_v24, %v1439_v37  ;;  %v1719_v24 = vmul.f32 %v4335_v61, %v4441_v18  ;;  %v1863_v37 = vmul.f32 %v4393_v16, %v4285_v2 }
 0x2bd   : > { %1832 = vst.msk [vmem:[#allocation3 + $0x118] sm:$0x1] %vm1324_vm2, %v5561_v19  ;;  %v2220_v16 = vadd.f32 %v4401_v48, %v2171_v8  ;;  %v1912_v18 = vmul.f32 %v5575_v39, %v4287_v22  ;;  %v5582_v8 = vld [vmem:[#allocation71_spill] sm:$0xff]  ;;  %v1962_v2 = vmul.f32 %v4433_v52, %v4298_v33 }
 0x2be   : > { %5569 = vst [vmem:[#allocation88_spill] sm:$0xff] %v4479_v44  ;;  %v2074_v31 = vadd.f32 %v4386_v57, %v2025_v27  ;;  %v1718_v57 = vmul.f32 %v4335_v61, %v4426_v4  ;;  %v1537_v20 = vadd.f32 %v1521_v54, %v1488_v55  ;;  %v1587_v55 = vadd.f32 %v1571_v23, %v1538_v34  ;;  %v4538_v4 = vld [vmem:[#allocation3 + $0x50] sm:$0xff]  ;;  %v5579_v23 = vld [vmem:[#allocation76_spill] sm:$0xff]  ;;  %v5580_v34 = vld [vmem:[#allocation70_spill] sm:$0xff] }
 0x2bf   : > { %5570 = vst [vmem:[#allocation89_spill] sm:$0xff] %v4481_v36  ;;  %v2269_v48 = vadd.f32 %v4437_v28, %v2220_v16  ;;  %v1928_v39 = vadd.f32 %v1912_v18, %v1863_v37  ;;  %v5585_v18 = vld [vmem:[#allocation72_spill] sm:$0xff] }
 0x2c0   : > { %5571 = vst [vmem:[#allocation90_spill] sm:$0xff] %v4483_v13  ;;  %v1619_v13 = vmul.f32 %v4294_v30, %v4251_v5  ;;  %v2123_v27 = vadd.f32 %v2107_v6, %v2074_v31  ;;  %v1586_v31 = vadd.f32 %v1570_v3, %v1537_v20  ;;  %v4542_v3 = vld [vmem:[#allocation3 + $0x51] sm:$0xff] }
 0x2c1   : > { %1794 = vst.msk [vmem:[#allocation3 + $0x28] sm:$0xff] %vm496_vm0, %v4058_v32  ;;  %v1620_v32 = vmul.f32 %v4294_v30, %v4290_v50 }
 0x2c2   : > { %1795 = vst.msk [vmem:[#allocation3 + $0x30] sm:$0xff] %vm496_vm0, %v4060_v15  ;;  %v1670_v15 = vmul.f32 %v4312_v45, %v4418_v12  ;;  %v2172_v6 = vadd.f32 %v4397_v1, %v2123_v27  ;;  %v4540_v1 = vld [vmem:[#allocation3 + $0x49] sm:$0xff]  ;;  %v1635_v27 = vadd.f32 %v1619_v13, %v1586_v31  ;;  %v1961_v12 = vmul.f32 %v5582_v8, %v4298_v33 }
 0x2c3   : > { %5572 = vst [vmem:[#allocation91_spill] sm:$0xff] %v4501_v51  ;;  %v1636_v20 = vadd.f32 %v1620_v32, %v1587_v55  ;;  %v5583_v55 = vld [vmem:[#allocation36_spill] sm:$0xff] }
 0x2c4   : > { %1815 = vst.msk [vmem:[#allocation3 + $0x27] sm:$0x1] %vm1324_vm2, %v5561_v19  ;;  %v2221_v35 = vadd.f32 %v5579_v23, %v2172_v6  ;;  %v1685_v32 = vadd.f32 %v1669_v43, %v1635_v27  ;;  %v2285_v23 = vmul.f32 %v2269_v48, %v4422_v25  ;;  %v5587_v27 = vld [vmem:[#allocation67_spill] sm:$0xff] }
 0x2c5   : > { %1816 = vst.msk [vmem:[#allocation3 + $0x47] sm:$0x1] %vm1324_vm2, %v5561_v19  ;;  %v1686_v6 = vadd.f32 %v1670_v15, %v1636_v20 }
 0x2c6   : > { %1825 = vst.msk [vmem:[#allocation3 + $0x38] sm:$0x1] %vm1324_vm2, %v5561_v19  ;;  %v2270_v13 = vadd.f32 %v4457_v40, %v2221_v35  ;;  %v1734_v52 = vadd.f32 %v1718_v57, %v1685_v32  ;;  %v5586_v35 = vld [vmem:[#allocation61_spill] sm:$0xff]  ;;  %v4576_v57 = vld [vmem:[#allocation3 + $0x10f] sm:$0xff] }
 0x2c7   : > { %5573 = vst [vmem:[#allocation92_spill] sm:$0xff] %v4524_v49  ;;  %v1735_v43 = vadd.f32 %v1719_v24, %v1686_v6  ;;  %v2059_v25 = vmul.f32 %v5587_v27, %v5586_v35  ;;  %v4580_v24 = vld [vmem:[#allocation3 + $0x110] sm:$0xff] }
 0x2c8   : > { %5574 = vst [vmem:[#allocation93_spill] sm:$0xff] %v4529_v7  ;;  %v2286_v40 = vmul.f32 %v2270_v13, %v4430_v46  ;;  %v4572_v8 = vadd.f32 %v1767_v17, %v1734_v52 }
 0x2c9   : > { %5576 = vst [vmem:[#allocation66_spill] sm:$0xff] %v4538_v4 }
 0x2ca   : > { %5577 = vst [vmem:[#allocation94_spill] sm:$0xff] %v4540_v1 }
 0x2cb   : > { %5578 = vst [vmem:[#allocation95_spill] sm:$0xff] %v4542_v3 }
 0x2cc   : > { %1797 = vst.msk [vmem:[#allocation3 + $0x50] sm:$0xff] %vm496_vm0, %v5583_v55  ;;  %v4574_v55 = vadd.f32 %v1768_v63, %v1735_v43  ;;  %v5594_v63 = vld [vmem:[#allocation74_spill] sm:$0xff] }
 0x2cd   : > { %1826 = vst.msk [vmem:[#allocation3 + $0x58] sm:$0x1] %vm1324_vm2, %v5561_v19 }
 0x2ce   : > { %5590 = vst [vmem:[#allocation70_spill] sm:$0xff] %v4576_v57 }
 0x2cf   : > { %5592 = vst [vmem:[#allocation71_spill] sm:$0xff] %v4580_v24 }
 0x301   : > { %v1259_v54 = vpop.f32.mrf.mxu2  ;;  %v1278_v38 = vpop.f32.mrf.mxu3 }
 0x302   : > { %v1297_v21 = vmul.f32 %v4300_v53, %v1259_v54  ;;  %v4533_v56 = vmul.f32 %v4300_v53, %v1278_v38  ;;  %v1913_v54 = vmul.f32 %v5580_v34, %v4287_v22  ;;  %v5581_v38 = vld [vmem:[#allocation35_spill] sm:$0xff] }
 0x303   : > { %1796 = vst.msk [vmem:[#allocation3 + $0x48] sm:$0xff] %vm496_vm0, %v5581_v38  ;;  %v5584_v34 = vld [vmem:[#allocation63_spill] sm:$0xff] }
 0x304   : > { %1299 = vst.msk [vmem:[#allocation3 + $0x8] sm:$0xff] %vm496_vm0, %v1297_v21  ;;  %v1929_v31 = vadd.f32 %v1913_v54, %v1864_v11  ;;  %v1977_v21 = vadd.f32 %v1961_v12, %v1928_v39  ;;  %v2010_v28 = vmul.f32 %v4407_v26, %v5584_v34  ;;  %v2011_v37 = vmul.f32 %v5585_v18, %v5584_v34  ;;  %v5588_v12 = vld [vmem:[#allocation73_spill] sm:$0xff] }
 0x305   : > { %v2301_v11 = vpack.c.bf16 %v2285_v23, %v2285_v23  ;;  %v2060_v20 = vmul.f32 %v5588_v12, %v5586_v35  ;;  %v4570_v54 = vld [vmem:[#allocation3 + $0x107] sm:$0xff]  ;;  %v2302_v39 = vpack.c.bf16 %v2286_v40, %v2286_v40  ;;  %v4592_v40 = vld [vmem:[#allocation3 + $0x111] sm:$0xff]  ;;  %v4670_v12 = vmul.f32 %v4357_v42, %v4540_v1 }
 0x306   : > { %v1978_v15 = vadd.f32 %v1962_v2, %v1929_v31  ;;  %v2026_v16 = vadd.f32 %v2010_v28, %v1977_v21  ;;  %5589 = vst [vmem:[#allocation76_spill] sm:$0xff] %v4570_v54  ;;  %v4578_v2 = vld [vmem:[#allocation3 + $0x108] sm:$0xff]  ;;  %v2108_v28 = vmul.f32 %v5594_v63, %v4322_v29 }
 0x307   : > { %5591 = vst [vmem:[#allocation35_spill] sm:$0xff] %v4578_v2  ;;  %v2335_v6 = vunpack.c.l.b16 %v2301_v11  ;;  %v4586_v23 = vld [vmem:[#allocation3 + $0x109] sm:$0xff]  ;;  %v2336_v17 = vunpack.c.l.b16 %v2302_v39 }
 0x308   : > { %v2027_v46 = vadd.f32 %v2011_v37, %v1978_v15  ;;  %v2075_v31 = vadd.f32 %v2059_v25, %v2026_v16  ;;  %5593 = vst [vmem:[#allocation36_spill] sm:$0xff] %v4586_v23  ;;  %v2109_v37 = vmul.f32 %v4447_v0, %v4322_v29  ;;  %v5597_v16 = vld [vmem:[#allocation68_spill] sm:$0xff]  ;;  %v4703_v1 = vld [vmem:[#allocation3 + $0x6f] sm:$0xff] }
 0x309   : > { %v1261_v38 = vpop.f32.mrf.mxu2  ;;  %v1280_v48 = vpop.f32.mrf.mxu3  ;;  %5595 = vst [vmem:[#allocation63_spill] sm:$0xff] %v4592_v40  ;;  %v2206_v25 = vmul.f32 %v5597_v16, %v4578_v2  ;;  %v4613_v2 = vmul.f32 %v4255_v9, %v4479_v44  ;;  %v4630_v44 = vmul.f32 %v4294_v30, %v4481_v36  ;;  %v4646_v36 = vld [vmem:[#allocation3 + $0x2f] sm:$0xff] }
 0x30a   : > { %v1298_v13 = vmul.f32 %v4300_v53, %v1261_v38  ;;  %v4584_v32 = vmul.f32 %v4300_v53, %v1280_v48  ;;  %v2076_v21 = vadd.f32 %v2060_v20, %v2027_v46  ;;  %v5596_v53 = vld [vmem:[#allocation64_spill] sm:$0xff]  ;;  %v2207_v20 = vmul.f32 %v5597_v16, %v4580_v24  ;;  %5615 = vst [vmem:[#allocation102_spill] sm:$0xff] %v4703_v1  ;;  %v5626_v1 = vld [vmem:[#allocation78_spill] sm:$0xff] }
 0x30b   : > { %v1345_v52 = vld [vmem:[#allocation3 + $0x7] sm:$0xff]  ;;  %v2157_v15 = vmul.f32 %v5596_v53, %v4570_v54  ;;  %v2158_v11 = vmul.f32 %v5596_v53, %v4576_v57  ;;  %v2346_v38 = vpack.c.b16 %v2336_v17, %v2335_v6  ;;  %v2124_v48 = vadd.f32 %v2108_v28, %v2075_v31  ;;  %v5598_v54 = vld [vmem:[#allocation43_spill] sm:$0xff]  ;;  %5603 = vst [vmem:[#allocation64_spill] sm:$0xff] %v4646_v36 }
 0x30c   : > { %v1394_v43 = vld [vmem:[#allocation3 + $0x8] sm:$0xff]  ;;  %1300 = vst.msk [vmem:[#allocation3 + $0x10] sm:$0xff] %vm496_vm0, %v1298_v13  ;;  %v2125_v39 = vadd.f32 %v2109_v37, %v2076_v21  ;;  %v2255_v46 = vmul.f32 %v4414_v14, %v4586_v23  ;;  %v2256_v13 = vmul.f32 %v4414_v14, %v4592_v40  ;;  %v1362_v57 = vmul.f32 %v5598_v54, %v1345_v52  ;;  %v5600_v52 = vld [vmem:[#allocation87_spill] sm:$0xff] }
 0x30d   : > { %1814 = vst.msk [vmem:[#allocation3 + $0x7] sm:$0x1] %vm1324_vm2, %v5561_v19  ;;  %v1411_v0 = vmul.f32 %v4216_v10, %v1394_v43  ;;  %2718 = vmatmul.msk.bf16.vlgmr.msrb.gmra.mxu3 %vm496_vm0, %v2346_v38  ;;  %v2173_v6 = vadd.f32 %v2157_v15, %v2124_v48  ;;  %v4618_v17 = vmul.f32 %v4255_v9, %v4465_v47  ;;  %v5599_v21 = vld [vmem:[#allocation86_spill] sm:$0xff] }
 0x30e   : > { %v2174_v31 = vadd.f32 %v2158_v11, %v2125_v39  ;;  %v4622_v28 = vmul.f32 %v4273_v59, %v5599_v21  ;;  %v4626_v43 = vmul.f32 %v4273_v59, %v5600_v52  ;;  %v5601_v38 = vld [vmem:[#allocation90_spill] sm:$0xff]  ;;  %v4638_v21 = vmul.f32 %v4312_v45, %v4501_v51 }
 0x30f   : > { %v1427_v37 = vadd.f32 %v1411_v0, %v1362_v57  ;;  %v4634_v15 = vmul.f32 %v4294_v30, %v5601_v38  ;;  %v2222_v39 = vadd.f32 %v2206_v25, %v2173_v6  ;;  %v4642_v0 = vmul.f32 %v4312_v45, %v4524_v49  ;;  %v4644_v57 = vld [vmem:[#allocation3 + $0x27] sm:$0xff]  ;;  %v5605_v38 = vld [vmem:[#allocation79_spill] sm:$0xff] }
 0x310   : > { %v2223_v47 = vadd.f32 %v2207_v20, %v2174_v31  ;;  %5602 = vst [vmem:[#allocation61_spill] sm:$0xff] %v4644_v57  ;;  %v4648_v52 = vld [vmem:[#allocation3 + $0x28] sm:$0xff]  ;;  %v4656_v25 = vmul.f32 %v4335_v61, %v4529_v7  ;;  %v4660_v20 = vmul.f32 %v4335_v61, %v4538_v4  ;;  %v4662_v6 = vld [vmem:[#allocation3 + $0x30] sm:$0xff]  ;;  %v4674_v7 = vmul.f32 %v4357_v42, %v4542_v3  ;;  %v5610_v61 = vld [vmem:[#allocation52_spill] sm:$0xff] }
 0x311   : > { %v1264_v11 = vpop.f32.mrf.mxu2  ;;  %v1283_v48 = vpop.f32.mrf.mxu3  ;;  %5604 = vst [vmem:[#allocation68_spill] sm:$0xff] %v4648_v52  ;;  %v4664_v31 = vld [vmem:[#allocation3 + $0x29] sm:$0xff]  ;;  %v4666_v49 = vld [vmem:[#allocation3 + $0x31] sm:$0xff]  ;;  %v2271_v63 = vadd.f32 %v2255_v46, %v2222_v39 }
 0x312   : > { %v1319_v40 = vmul.f32 %v5605_v38, %v1264_v11  ;;  %v4652_v23 = vmul.f32 %v5605_v38, %v1283_v48  ;;  %5606 = vst [vmem:[#allocation43_spill] sm:$0xff] %v4662_v6  ;;  %v2272_v48 = vadd.f32 %v2256_v13, %v2223_v47  ;;  %v4676_v4 = vld [vmem:[#allocation3 + $0x47] sm:$0xff]  ;;  %v4684_v47 = vmul.f32 %v5584_v34, %v4644_v57  ;;  %v4686_v13 = vld [vmem:[#allocation3 + $0x4f] sm:$0xff] }
 0x313   : > { %5607 = vst [vmem:[#allocation79_spill] sm:$0xff] %v4664_v31  ;;  %v1346_v51 = vld [vmem:[#allocation3 + $0xf] sm:$0xff]  ;;  %v4701_v57 = vld [vmem:[#allocation3 + $0x67] sm:$0xff] }
 0x314   : > { %5608 = vst [vmem:[#allocation96_spill] sm:$0xff] %v4666_v49  ;;  %v1395_v24 = vld [vmem:[#allocation3 + $0x10] sm:$0xff]  ;;  %v1363_v18 = vmul.f32 %v5598_v54, %v1346_v51  ;;  %v4688_v39 = vld [vmem:[#allocation3 + $0x48] sm:$0xff]  ;;  %v2288_v51 = vmul.f32 %v2272_v48, %v4574_v55 }
 0x315   : > { %v1443_v11 = vld [vmem:[#allocation3 + $0x9] sm:$0xff]  ;;  %5609 = vst [vmem:[#allocation97_spill] sm:$0xff] %v4676_v4  ;;  %v1444_v27 = vld [vmem:[#allocation3 + $0x11] sm:$0xff]  ;;  %v1412_v26 = vmul.f32 %v4216_v10, %v1395_v24 }
 0x316   : > { %1322 = vst.msk [vmem:[#allocation3 + $0x128] sm:$0xff] %vm496_vm0, %v1319_v40  ;;  %v1460_v46 = vmul.f32 %v5610_v61, %v1443_v11  ;;  %v4690_v3 = vld [vmem:[#allocation3 + $0x50] sm:$0xff]  ;;  %v2287_v40 = vmul.f32 %v2271_v63, %v4572_v8  ;;  %v1461_v24 = vmul.f32 %v5610_v61, %v1444_v27  ;;  %v4699_v11 = vmul.f32 %v5584_v34, %v4646_v36  ;;  %v4705_v42 = vld [vmem:[#allocation3 + $0x68] sm:$0xff] }
 0x317   : > { %5611 = vst [vmem:[#allocation98_spill] sm:$0xff] %v4684_v47  ;;  %v1428_v45 = vadd.f32 %v1412_v26, %v1363_v18  ;;  %v4711_v8 = vmul.f32 %v5586_v35, %v4648_v52  ;;  %v4715_v27 = vmul.f32 %v5586_v35, %v4662_v6  ;;  %v4717_v55 = vld [vmem:[#allocation3 + $0x70] sm:$0xff]  ;;  %v4727_v26 = vmul.f32 %v4322_v29, %v4664_v31  ;;  %v5622_v31 = vld [vmem:[#allocation37_spill] sm:$0xff] }
 0x318   : > { %5612 = vst [vmem:[#allocation99_spill] sm:$0xff] %v4686_v13  ;;  %v1476_v47 = vadd.f32 %v1460_v46, %v1427_v37  ;;  %v4719_v63 = vld [vmem:[#allocation3 + $0x69] sm:$0xff]  ;;  %v4721_v48 = vld [vmem:[#allocation3 + $0x71] sm:$0xff]  ;;  %v2303_v36 = vpack.c.bf16 %v2287_v40, %v2287_v40  ;;  %v4731_v18 = vmul.f32 %v4322_v29, %v4666_v49  ;;  %v4736_v46 = vmul.f32 %v5596_v53, %v4676_v4 }
 0x319   : > { %5613 = vst [vmem:[#allocation100_spill] sm:$0xff] %v4688_v39  ;;  %v4740_v40 = vmul.f32 %v5596_v53, %v4686_v13  ;;  %v1266_v49 = vpop.f32.mrf.mxu2  ;;  %v1285_v6 = vpop.f32.mrf.mxu3  ;;  %v5623_v13 = vld [vmem:[#allocation38_spill] sm:$0xff] }
 0x31a   : > { %5614 = vst [vmem:[#allocation101_spill] sm:$0xff] %v4690_v3  ;;  %v1525_v37 = vadd.f32 %v4613_v2, %v1476_v47  ;;  %v4750_v2 = vmul.f32 %v5597_v16, %v4688_v39  ;;  %v4754_v47 = vmul.f32 %v5597_v16, %v4690_v3  ;;  %v1320_v4 = vmul.f32 %v5605_v38, %v1266_v49  ;;  %v5624_v49 = vld [vmem:[#allocation51_spill] sm:$0xff] }
 0x31b   : > { %1824 = vst.msk [vmem:[#allocation3 + $0x18] sm:$0x1] %vm1324_vm2, %v5561_v19  ;;  %v4760_v52 = vmul.f32 %v5605_v38, %v1285_v6  ;;  %v1376_v38 = vmul.f32 %v5598_v54, %v5624_v49  ;;  %v1426_v49 = vmul.f32 %v4216_v10, %v4265_v60 }
 0x31c   : > { %5616 = vst [vmem:[#allocation103_spill] sm:$0xff] %v4705_v42  ;;  %v2304_v42 = vpack.c.bf16 %v2288_v51, %v2288_v51  ;;  %v4744_v51 = vld [vmem:[#allocation3 + $0x51] sm:$0xff] }
 0x31d   : > { %1793 = vst.msk [vmem:[#allocation3 + $0x10] sm:$0xff] %vm496_vm0, %v4584_v32  ;;  %v1477_v32 = vadd.f32 %v1461_v24, %v1428_v45  ;;  %v2337_v45 = vunpack.c.l.b16 %v2303_v36  ;;  %v1574_v36 = vadd.f32 %v4622_v28, %v1525_v37  ;;  %v1654_v6 = vld [vmem:[#allocation3 + $0x127] sm:$0xff]  ;;  %v1425_v37 = vmul.f32 %v4216_v10, %v4249_v58 }
 0x31e   : > { %5617 = vst [vmem:[#allocation104_spill] sm:$0xff] %v4717_v55  ;;  %v2338_v24 = vunpack.c.l.b16 %v2304_v42 }
 0x31f   : > { %5618 = vst [vmem:[#allocation105_spill] sm:$0xff] %v4719_v63  ;;  %v1623_v28 = vadd.f32 %v4630_v44, %v1574_v36  ;;  %v1523_v44 = vmul.f32 %v4255_v9, %v4416_v62  ;;  %v1441_v63 = vadd.f32 %v1425_v37, %v1376_v38  ;;  %v5627_v37 = vld [vmem:[#allocation80_spill] sm:$0xff] }
 0x320   : > { %5619 = vst [vmem:[#allocation106_spill] sm:$0xff] %v4721_v48  ;;  %v2347_v42 = vpack.c.b16 %v2338_v24, %v2337_v45 }
 0x321   : > { %1792 = vst.msk [vmem:[#allocation3 + $0x8] sm:$0xff] %vm496_vm0, %v4533_v56  ;;  %v4742_v56 = vld [vmem:[#allocation3 + $0x49] sm:$0xff]  ;;  %v1673_v58 = vadd.f32 %v4638_v21, %v1623_v28 }
 0x322   : > { %5620 = vst [vmem:[#allocation107_spill] sm:$0xff] %v4742_v56  ;;  %v4768_v3 = vmul.f32 %v4414_v14, %v4742_v56  ;;  %2719 = vmatmul.msk.bf16.gmra.mxu3 %vm496_vm0, %v2347_v42  ;;  %v1524_v42 = vmul.f32 %v4255_v9, %v5626_v1 }
 0x323   : > { %5621 = vst [vmem:[#allocation108_spill] sm:$0xff] %v4744_v51  ;;  %v1722_v21 = vadd.f32 %v4656_v25, %v1673_v58 }
 0x324   : > { %1798 = vst.msk [vmem:[#allocation3 + $0x68] sm:$0xff] %vm496_vm0, %v5622_v31  ;;  %v1526_v31 = vadd.f32 %v4618_v17, %v1477_v32  ;;  %v1377_v32 = vmul.f32 %v5598_v54, %v4247_v41  ;;  %v1884_v45 = vld [vmem:[#allocation3 + $0x10] sm:$0xff] }
 0x325   : > { %1799 = vst.msk [vmem:[#allocation3 + $0x70] sm:$0xff] %vm496_vm0, %v5623_v13  ;;  %v4772_v13 = vmul.f32 %v4414_v14, %v4744_v51  ;;  %v1933_v24 = vld [vmem:[#allocation3 + $0x11] sm:$0xff]  ;;  %v1474_v51 = vmul.f32 %v5610_v61, %v4251_v5  ;;  %v1901_v60 = vmul.f32 %v4287_v22, %v1884_v45 }
 0x326   : > { %1817 = vst.msk [vmem:[#allocation3 + $0x67] sm:$0x1] %vm1324_vm2, %v5561_v19  ;;  %v1575_v17 = vadd.f32 %v4626_v43, %v1526_v31  ;;  %v1950_v5 = vmul.f32 %v4298_v33, %v1933_v24  ;;  %v1442_v28 = vadd.f32 %v1426_v49, %v1377_v32  ;;  %v5628_v32 = vld [vmem:[#allocation81_spill] sm:$0xff]  ;;  %v5629_v49 = vld [vmem:[#allocation82_spill] sm:$0xff] }
 0x327   : > { %1827 = vst.msk [vmem:[#allocation3 + $0x78] sm:$0x1] %vm1324_vm2, %v5561_v19  ;;  %v1490_v24 = vadd.f32 %v1474_v51, %v1441_v63 }
 0x328   : > { %1323 = vst.msk [vmem:[#allocation3 + $0x130] sm:$0xff] %vm496_vm0, %v1320_v4  ;;  %v1475_v4 = vmul.f32 %v5610_v61, %v4290_v50  ;;  %v1624_v41 = vadd.f32 %v4634_v15, %v1575_v17  ;;  %v1834_v43 = vld [vmem:[#allocation3 + $0x7] sm:$0xff]  ;;  %v1835_v31 = vld [vmem:[#allocation3 + $0xf] sm:$0xff] }
 0x329   : > { %1823 = vst.msk [vmem:[#allocation3 + $0x127] sm:$0x1] %vm1324_vm2, %v5561_v19  ;;  %v1883_v36 = vld [vmem:[#allocation3 + $0x8] sm:$0xff] }
 0x32a   : > { %v5625_v50 = vld [vmem:[#allocation58_spill] sm:$0xff]  ;;  %v1900_v39 = vmul.f32 %v4287_v22, %v1883_v36  ;;  %v1674_v15 = vadd.f32 %v4642_v0, %v1624_v41  ;;  %v4810_v36 = vadd.f32 %v4670_v12, %v1722_v21  ;;  %v1491_v38 = vadd.f32 %v1475_v4, %v1442_v28  ;;  %v5630_v4 = vld [vmem:[#allocation84_spill] sm:$0xff]  ;;  %v5633_v28 = vld [vmem:[#allocation65_spill] sm:$0xff] }
 0x32b   : > { %v1851_v56 = vmul.f32 %v5625_v50, %v1834_v43  ;;  %v1852_v62 = vmul.f32 %v5625_v50, %v1835_v31  ;;  %v1932_v48 = vld [vmem:[#allocation3 + $0x9] sm:$0xff]  ;;  %v1572_v0 = vmul.f32 %v4273_v59, %v5627_v37  ;;  %v1621_v12 = vmul.f32 %v4294_v30, %v5629_v49 }
 0x32c   : > { %v1949_v17 = vmul.f32 %v4298_v33, %v1932_v48  ;;  %v1703_v43 = vld [vmem:[#allocation3 + $0x128] sm:$0xff]  ;;  %v1723_v31 = vadd.f32 %v4660_v20, %v1674_v15  ;;  %v1539_v48 = vadd.f32 %v1523_v44, %v1490_v24  ;;  %v1540_v20 = vadd.f32 %v1524_v42, %v1491_v38  ;;  %v5635_v37 = vld [vmem:[#allocation75_spill] sm:$0xff] }
 0x32d   : > { %v1916_v45 = vadd.f32 %v1900_v39, %v1851_v56  ;;  %v1917_v55 = vadd.f32 %v1901_v60, %v1852_v62  ;;  %v1573_v39 = vmul.f32 %v4273_v59, %v5628_v32  ;;  %v1622_v58 = vmul.f32 %v4294_v30, %v5630_v4  ;;  %v5632_v15 = vld [vmem:[#allocation62_spill] sm:$0xff]  ;;  %v5640_v49 = vld [vmem:[#allocation83_spill] sm:$0xff] }
 0x32e   : > { %v4817_v1 = vadd.f32 %v4674_v7, %v1723_v31  ;;  %v1588_v62 = vadd.f32 %v1572_v0, %v1539_v48  ;;  %v1671_v21 = vmul.f32 %v5632_v15, %v1654_v6  ;;  %v5634_v31 = vld [vmem:[#allocation69_spill] sm:$0xff]  ;;  %v1865_v0 = vmul.f32 %v5635_v37, %v5625_v50  ;;  %v5644_v37 = vld [vmem:[#allocation71_spill] sm:$0xff] }
 0x32f   : > { %v1965_v25 = vadd.f32 %v1949_v17, %v1916_v45  ;;  %v1966_v41 = vadd.f32 %v1950_v5, %v1917_v55  ;;  %v1655_v63 = vld [vmem:[#allocation3 + $0x12f] sm:$0xff]  ;;  %v1589_v7 = vadd.f32 %v1573_v39, %v1540_v20  ;;  %v1720_v45 = vmul.f32 %v5633_v28, %v1703_v43  ;;  %v5636_v43 = vld [vmem:[#allocation72_spill] sm:$0xff] }
 0x330   : > { %v1704_v56 = vld [vmem:[#allocation3 + $0x130] sm:$0xff]  ;;  %v5631_v55 = vld [vmem:[#allocation98_spill] sm:$0xff]  ;;  %v1672_v17 = vmul.f32 %v5632_v15, %v1655_v63  ;;  %v1637_v42 = vadd.f32 %v1621_v12, %v1588_v62  ;;  %v5638_v63 = vld [vmem:[#allocation73_spill] sm:$0xff]  ;;  %v1964_v12 = vmul.f32 %v5640_v49, %v4298_v33 }
 0x331   : > { %v1752_v51 = vld [vmem:[#allocation3 + $0x129] sm:$0xff]  ;;  %v1753_v60 = vld [vmem:[#allocation3 + $0x131] sm:$0xff]  ;;  %v2014_v44 = vadd.f32 %v5631_v55, %v1965_v25  ;;  %v2015_v5 = vadd.f32 %v4699_v11, %v1966_v41  ;;  %v1721_v24 = vmul.f32 %v5633_v28, %v1704_v56  ;;  %v1638_v38 = vadd.f32 %v1622_v58, %v1589_v7 }
 0x332   : > { %1812 = vst.msk [vmem:[#allocation3 + $0x128] sm:$0xff] %vm496_vm0, %v4652_v23  ;;  %v1769_v6 = vmul.f32 %v5634_v31, %v1752_v51  ;;  %v1866_v25 = vmul.f32 %v5636_v43, %v5625_v50  ;;  %v1687_v32 = vadd.f32 %v1671_v21, %v1637_v42  ;;  %v1915_v56 = vmul.f32 %v5638_v63, %v4287_v22  ;;  %v5639_v51 = vld [vmem:[#allocation74_spill] sm:$0xff] }
 0x333   : > { %1813 = vst.msk [vmem:[#allocation3 + $0x130] sm:$0xff] %vm496_vm0, %v4760_v52  ;;  %v2063_v23 = vadd.f32 %v4711_v8, %v2014_v44  ;;  %v2064_v11 = vadd.f32 %v4715_v27, %v2015_v5  ;;  %v1770_v52 = vmul.f32 %v5634_v31, %v1753_v60  ;;  %v5637_v8 = vld [vmem:[#allocation67_spill] sm:$0xff]  ;;  %v1688_v39 = vadd.f32 %v1672_v17, %v1638_v38  ;;  %v5641_v44 = vld [vmem:[#allocation76_spill] sm:$0xff]  ;;  %v5642_v62 = vld [vmem:[#allocation70_spill] sm:$0xff] }
 0x334   : > { %1833 = vst.msk [vmem:[#allocation3 + $0x138] sm:$0x1] %vm1324_vm2, %v5561_v19  ;;  %v1914_v27 = vmul.f32 %v5637_v8, %v4287_v22  ;;  %v1963_v20 = vmul.f32 %v5639_v51, %v4298_v33  ;;  %v1736_v58 = vadd.f32 %v1720_v45, %v1687_v32  ;;  %v1931_v55 = vadd.f32 %v1915_v56, %v1866_v25  ;;  %v4877_v51 = vld [vmem:[#allocation3 + $0x87] sm:$0xff] }
 0x335   : > { %v2112_v41 = vadd.f32 %v4727_v26, %v2063_v23  ;;  %v2113_v48 = vadd.f32 %v4731_v18, %v2064_v11  ;;  %v1737_v60 = vadd.f32 %v1721_v24, %v1688_v39  ;;  %v2012_v5 = vmul.f32 %v5641_v44, %v5584_v34  ;;  %v5643_v24 = vld [vmem:[#allocation35_spill] sm:$0xff]  ;;  %1818 = vst.msk [vmem:[#allocation3 + $0x87] sm:$0x1] %vm1324_vm2, %v5561_v19 }
 0x336   : > { %v1930_v18 = vadd.f32 %v1914_v27, %v1865_v0  ;;  %v2013_v21 = vmul.f32 %v5642_v62, %v5584_v34  ;;  %v4861_v23 = vadd.f32 %v1769_v6, %v1736_v58  ;;  %v1980_v45 = vadd.f32 %v1964_v12, %v1931_v55  ;;  %v5645_v6 = vld [vmem:[#allocation36_spill] sm:$0xff]  ;;  %v5646_v27 = vld [vmem:[#allocation63_spill] sm:$0xff] }
 0x337   : > { %v2161_v4 = vadd.f32 %v4736_v46, %v2112_v41  ;;  %v2162_v26 = vadd.f32 %v4740_v40, %v2113_v48  ;;  %v4863_v40 = vadd.f32 %v1770_v52, %v1737_v60  ;;  %v2061_v38 = vmul.f32 %v5643_v24, %v5586_v35  ;;  %v4888_v58 = vld [vmem:[#allocation3 + $0x89] sm:$0xff] }
 0x338   : > { %v1979_v11 = vadd.f32 %v1963_v20, %v1930_v18  ;;  %v2062_v0 = vmul.f32 %v5644_v37, %v5586_v35  ;;  %v2110_v41 = vmul.f32 %v5645_v6, %v4322_v29  ;;  %v2029_v8 = vadd.f32 %v2013_v21, %v1980_v45  ;;  %5647 = vst [vmem:[#allocation37_spill] sm:$0xff] %v4888_v58  ;;  %v4890_v18 = vld [vmem:[#allocation3 + $0x91] sm:$0xff]  ;;  %v5653_v24 = vld [vmem:[#allocation86_spill] sm:$0xff] }
 0x339   : > { %v2210_v7 = vadd.f32 %v4750_v2, %v2161_v4  ;;  %v2211_v17 = vadd.f32 %v4754_v47, %v2162_v26  ;;  %v2142_v46 = vld [vmem:[#allocation3 + $0x127] sm:$0xff]  ;;  %v2111_v39 = vmul.f32 %v5646_v27, %v4322_v29  ;;  %v4886_v26 = vld [vmem:[#allocation3 + $0x90] sm:$0xff]  ;;  %5648 = vst [vmem:[#allocation38_spill] sm:$0xff] %v4890_v18 }
 0x33a   : > { %v2143_v42 = vld [vmem:[#allocation3 + $0x12f] sm:$0xff]  ;;  %v2028_v47 = vadd.f32 %v2012_v5, %v1979_v11  ;;  %v2159_v63 = vmul.f32 %v5596_v53, %v2142_v46  ;;  %v2078_v60 = vadd.f32 %v2062_v0, %v2029_v8  ;;  %v5651_v11 = vld [vmem:[#allocation40_spill] sm:$0xff]  ;;  %1828 = vst.msk [vmem:[#allocation3 + $0x98] sm:$0x1] %vm1324_vm2, %v5561_v19  ;;  %v4960_v58 = vld [vmem:[#allocation3 + $0x67] sm:$0xff] }
 0x33b   : > { %v2191_v43 = vld [vmem:[#allocation3 + $0x128] sm:$0xff]  ;;  %v2259_v25 = vadd.f32 %v4768_v3, %v2210_v7  ;;  %v2260_v2 = vadd.f32 %v4772_v13, %v2211_v17  ;;  %v2192_v48 = vld [vmem:[#allocation3 + $0x130] sm:$0xff]  ;;  %v2160_v56 = vmul.f32 %v5596_v53, %v2143_v42  ;;  %v5650_v7 = vld [vmem:[#allocation88_spill] sm:$0xff] }
 0x33c   : > { %v2240_v32 = vld [vmem:[#allocation3 + $0x129] sm:$0xff]  ;;  %v2241_v52 = vld [vmem:[#allocation3 + $0x131] sm:$0xff]  ;;  %v2077_v12 = vadd.f32 %v2061_v38, %v2028_v47  ;;  %v2208_v4 = vmul.f32 %v5597_v16, %v2191_v43  ;;  %v2209_v55 = vmul.f32 %v5597_v16, %v2192_v48  ;;  %v1364_v17 = vmul.f32 %v5598_v54, %v5650_v7  ;;  %v5652_v42 = vld [vmem:[#allocation85_spill] sm:$0xff] }
 0x33d   : > { %v4879_v3 = vld [vmem:[#allocation3 + $0x8f] sm:$0xff]  ;;  %v2275_v20 = vmul.f32 %v2259_v25, %v4810_v36  ;;  %v2276_v49 = vmul.f32 %v2260_v2, %v4817_v1  ;;  %v2257_v44 = vmul.f32 %v4414_v14, %v2240_v32  ;;  %v2258_v36 = vmul.f32 %v4414_v14, %v2241_v52  ;;  %v5655_v47 = vld [vmem:[#allocation89_spill] sm:$0xff] }
 0x33e   : > { %v4881_v13 = vld [vmem:[#allocation3 + $0x88] sm:$0xff]  ;;  %v5649_v1 = vld [vmem:[#allocation39_spill] sm:$0xff]  ;;  %v2126_v21 = vadd.f32 %v2110_v41, %v2077_v12  ;;  %1801 = vst.msk [vmem:[#allocation3 + $0x90] sm:$0xff] %vm496_vm0, %v5651_v11  ;;  %v2127_v46 = vadd.f32 %v2111_v39, %v2078_v60  ;;  %v1365_v45 = vmul.f32 %v5598_v54, %v5652_v42  ;;  %v1413_v38 = vmul.f32 %v4216_v10, %v5653_v24  ;;  %v5658_v12 = vld [vmem:[#allocation92_spill] sm:$0xff] }
 0x33f   : > { %1800 = vst.msk [vmem:[#allocation3 + $0x88] sm:$0xff] %vm496_vm0, %v5649_v1  ;;  %v2291_v5 = vpack.c.bf16 %v2275_v20, %v2275_v20  ;;  %v2292_v62 = vpack.c.bf16 %v2276_v49, %v2276_v49  ;;  %v5654_v37 = vld [vmem:[#allocation87_spill] sm:$0xff]  ;;  %v1462_v6 = vmul.f32 %v5610_v61, %v5655_v47  ;;  %v5656_v52 = vld [vmem:[#allocation90_spill] sm:$0xff]  ;;  %v1512_v19 = vmul.f32 %v4255_v9, %v5658_v12 }
 0x340   : > { %v1414_v0 = vmul.f32 %v4216_v10, %v5654_v37  ;;  %v2175_v2 = vadd.f32 %v2159_v63, %v2126_v21  ;;  %v2176_v41 = vadd.f32 %v2160_v56, %v2127_v46  ;;  %v1429_v48 = vadd.f32 %v1413_v38, %v1364_v17  ;;  %v5657_v20 = vld [vmem:[#allocation91_spill] sm:$0xff]  ;;  %v5660_v21 = vld [vmem:[#allocation66_spill] sm:$0xff] }
 0x341   : > { %v2325_v43 = vunpack.c.l.b16 %v2291_v5  ;;  %v2326_v25 = vunpack.c.l.b16 %v2292_v62  ;;  %v1463_v8 = vmul.f32 %v5610_v61, %v5656_v52  ;;  %v1511_v49 = vmul.f32 %v4255_v9, %v5657_v20  ;;  %v5659_v5 = vld [vmem:[#allocation93_spill] sm:$0xff]  ;;  %v5661_v17 = vld [vmem:[#allocation94_spill] sm:$0xff]  ;;  %v5662_v11 = vld [vmem:[#allocation95_spill] sm:$0xff] }
 0x342   : > { %v1430_v32 = vadd.f32 %v1414_v0, %v1365_v45  ;;  %v2224_v39 = vadd.f32 %v2208_v4, %v2175_v2  ;;  %v2225_v60 = vadd.f32 %v2209_v55, %v2176_v41  ;;  %v1478_v1 = vadd.f32 %v1462_v6, %v1429_v48  ;;  %v5663_v37 = vld [vmem:[#allocation102_spill] sm:$0xff]  ;;  %v5664_v0 = vld [vmem:[#allocation103_spill] sm:$0xff]  ;;  %v5666_v41 = vld [vmem:[#allocation105_spill] sm:$0xff] }
 0x343   : > { %v2341_v27 = vpack.c.b16 %v2326_v25, %v2325_v43  ;;  %v1560_v62 = vmul.f32 %v4273_v59, %v5659_v5  ;;  %v1561_v7 = vmul.f32 %v4273_v59, %v5660_v21  ;;  %v1609_v4 = vmul.f32 %v4294_v30, %v5661_v17  ;;  %v5665_v25 = vld [vmem:[#allocation104_spill] sm:$0xff]  ;;  %v5667_v52 = vld [vmem:[#allocation106_spill] sm:$0xff] }
 0x344   : > { %v1479_v63 = vadd.f32 %v1463_v8, %v1430_v32  ;;  %v2273_v56 = vadd.f32 %v2257_v44, %v2224_v39  ;;  %v1610_v46 = vmul.f32 %v4294_v30, %v5662_v11  ;;  %v2274_v42 = vadd.f32 %v2258_v36, %v2225_v60  ;;  %v5668_v8 = vld [vmem:[#allocation61_spill] sm:$0xff]  ;;  %v5669_v39 = vld [vmem:[#allocation64_spill] sm:$0xff] }
 0x345   : > { %2713 = vmatmul.msk.bf16.vlgmr.msrb.gmra.mxu2 %vm496_vm0, %v2341_v27  ;;  %v1527_v45 = vadd.f32 %v1511_v49, %v1478_v1  ;;  %v1659_v24 = vmul.f32 %v5632_v15, %v4701_v57  ;;  %v1660_v44 = vmul.f32 %v5632_v15, %v5663_v37  ;;  %v1708_v43 = vmul.f32 %v5633_v28, %v5664_v0 }
 0x346   : > { %v1528_v55 = vadd.f32 %v1512_v19, %v1479_v63  ;;  %v2289_v38 = vmul.f32 %v2273_v56, %v4861_v23  ;;  %v1709_v2 = vmul.f32 %v5633_v28, %v5665_v25  ;;  %v2290_v47 = vmul.f32 %v2274_v42, %v4863_v40  ;;  %v5670_v40 = vld [vmem:[#allocation68_spill] sm:$0xff]  ;;  %v5671_v56 = vld [vmem:[#allocation43_spill] sm:$0xff] }
 0x347   : > { %v1576_v6 = vadd.f32 %v1560_v62, %v1527_v45  ;;  %v1757_v48 = vmul.f32 %v5634_v31, %v5666_v41  ;;  %v1758_v23 = vmul.f32 %v5634_v31, %v5667_v52  ;;  %v1853_v27 = vmul.f32 %v5668_v8, %v5625_v50  ;;  %v5672_v42 = vld [vmem:[#allocation79_spill] sm:$0xff] }
 0x348   : > { %v1577_v36 = vadd.f32 %v1561_v7, %v1528_v55  ;;  %v2305_v32 = vpack.c.bf16 %v2289_v38, %v2289_v38  ;;  %v1854_v49 = vmul.f32 %v5669_v39, %v5625_v50  ;;  %v2306_v19 = vpack.c.bf16 %v2290_v47, %v2290_v47  ;;  %v5673_v55 = vld [vmem:[#allocation96_spill] sm:$0xff] }
 0x349   : > { %v1625_v60 = vadd.f32 %v1609_v4, %v1576_v6  ;;  %v1902_v63 = vmul.f32 %v5670_v40, %v4287_v22  ;;  %v1903_v7 = vmul.f32 %v5671_v56, %v4287_v22  ;;  %v1951_v45 = vmul.f32 %v5672_v42, %v4298_v33  ;;  %v5674_v4 = vld [vmem:[#allocation97_spill] sm:$0xff]  ;;  %v5675_v6 = vld [vmem:[#allocation99_spill] sm:$0xff] }
 0x34a   : > { %v1626_v1 = vadd.f32 %v1610_v46, %v1577_v36  ;;  %v2339_v62 = vunpack.c.l.b16 %v2305_v32  ;;  %v1952_v38 = vmul.f32 %v5673_v55, %v4298_v33  ;;  %v2340_v8 = vunpack.c.l.b16 %v2306_v19  ;;  %v5676_v32 = vld [vmem:[#allocation100_spill] sm:$0xff]  ;;  %v4962_v19 = vld [vmem:[#allocation3 + $0x6f] sm:$0xff] }
 0x34b   : > { %v1675_v18 = vadd.f32 %v1659_v24, %v1625_v60  ;;  %v1918_v39 = vadd.f32 %v1902_v63, %v1853_v27  ;;  %v1919_v47 = vadd.f32 %v1903_v7, %v1854_v49  ;;  %v2000_v46 = vmul.f32 %v5674_v4, %v5584_v34  ;;  %v4964_v24 = vld [vmem:[#allocation3 + $0x68] sm:$0xff]  ;;  %v5677_v27 = vld [vmem:[#allocation101_spill] sm:$0xff]  ;;  %v5678_v60 = vld [vmem:[#allocation107_spill] sm:$0xff] }
 0x34c   : > { %v1676_v31 = vadd.f32 %v1660_v44, %v1626_v1  ;;  %v2001_v36 = vmul.f32 %v5675_v6, %v5584_v34  ;;  %v2049_v40 = vmul.f32 %v5676_v32, %v5586_v35  ;;  %v2348_v56 = vpack.c.b16 %v2340_v8, %v2339_v62  ;;  %v4970_v63 = vld [vmem:[#allocation3 + $0x70] sm:$0xff] }
 0x34d   : > { %v1724_v22 = vadd.f32 %v1708_v43, %v1675_v18  ;;  %v1967_v50 = vadd.f32 %v1951_v45, %v1918_v39  ;;  %v1968_v44 = vadd.f32 %v1952_v38, %v1919_v47  ;;  %v2050_v49 = vmul.f32 %v5677_v27, %v5586_v35  ;;  %v4972_v7 = vld [vmem:[#allocation3 + $0x69] sm:$0xff] }
 0x34e   : > { %v1725_v42 = vadd.f32 %v1709_v2, %v1676_v31  ;;  %v2098_v1 = vmul.f32 %v5678_v60, %v4322_v29  ;;  %2720 = vmatmul.msk.bf16.gmra.mxu3 %vm496_vm0, %v2348_v56  ;;  %v5679_v2 = vld [vmem:[#allocation108_spill] sm:$0xff]  ;;  %v2147_v55 = vmul.f32 %v5596_v53, %v4960_v58  ;;  %v2148_v38 = vmul.f32 %v5596_v53, %v4962_v19 }
 0x34f   : > { %v1773_v31 = vadd.f32 %v1757_v48, %v1724_v22  ;;  %v2016_v43 = vadd.f32 %v2000_v46, %v1967_v50  ;;  %v2099_v62 = vmul.f32 %v5679_v2, %v4322_v29  ;;  %v2017_v45 = vadd.f32 %v2001_v36, %v1968_v44 }
 0x350   : > { %v1774_v18 = vadd.f32 %v1758_v23, %v1725_v42  ;;  %v2196_v8 = vmul.f32 %v5597_v16, %v4964_v24  ;;  %v2197_v47 = vmul.f32 %v5597_v16, %v4970_v63  ;;  %v2245_v22 = vmul.f32 %v4414_v14, %v4972_v7  ;;  %v4989_v23 = vld [vmem:[#allocation3 + $0x71] sm:$0xff] }
 0x351   : > { %v2065_v39 = vadd.f32 %v2049_v40, %v2016_v43  ;;  %v1366_v50 = vmul.f32 %v5598_v54, %v5657_v20  ;;  %v2066_v48 = vadd.f32 %v2050_v49, %v2017_v45  ;;  %v1367_v46 = vmul.f32 %v5598_v54, %v5658_v12 }
 0x352   : > { %v1415_v36 = vmul.f32 %v4216_v10, %v5659_v5  ;;  %v1416_v40 = vmul.f32 %v4216_v10, %v5660_v21  ;;  %v1464_v42 = vmul.f32 %v5610_v61, %v5661_v17  ;;  %v1465_v44 = vmul.f32 %v5610_v61, %v5662_v11 }
 0x353   : > { %v2114_v56 = vadd.f32 %v2098_v1, %v2065_v39  ;;  %v1513_v20 = vmul.f32 %v4255_v9, %v4701_v57  ;;  %v2115_v49 = vadd.f32 %v2099_v62, %v2066_v48  ;;  %v1514_v12 = vmul.f32 %v4255_v9, %v5663_v37 }
 0x354   : > { %v1431_v43 = vadd.f32 %v1415_v36, %v1366_v50  ;;  %v1432_v45 = vadd.f32 %v1416_v40, %v1367_v46  ;;  %v2246_v21 = vmul.f32 %v4414_v14, %v4989_v23  ;;  %v1562_v1 = vmul.f32 %v4273_v59, %v5664_v0 }
 0x355   : > { %v2163_v5 = vadd.f32 %v2147_v55, %v2114_v56  ;;  %v1563_v17 = vmul.f32 %v4273_v59, %v5665_v25  ;;  %v2164_v11 = vadd.f32 %v2148_v38, %v2115_v49  ;;  %v1611_v62 = vmul.f32 %v4294_v30, %v5666_v41  ;;  %v5681_v49 = vld [vmem:[#allocation69_spill] sm:$0xff] }
 0x356   : > { %v1480_v39 = vadd.f32 %v1464_v42, %v1431_v43  ;;  %v1481_v61 = vadd.f32 %v1465_v44, %v1432_v45  ;;  %v1612_v48 = vmul.f32 %v4294_v30, %v5667_v52  ;;  %v1661_v55 = vmul.f32 %v5632_v15, %v4877_v51  ;;  %v5682_v45 = vld [vmem:[#allocation58_spill] sm:$0xff] }
 0x357   : > { %v2212_v50 = vadd.f32 %v2196_v8, %v2163_v5  ;;  %v1662_v46 = vmul.f32 %v5632_v15, %v4879_v3  ;;  %v2213_v36 = vadd.f32 %v2197_v47, %v2164_v11  ;;  %v1710_v38 = vmul.f32 %v5633_v28, %v4881_v13  ;;  %v5680_v8 = vld [vmem:[#allocation37_spill] sm:$0xff] }
 0x358   : > { %v1529_v40 = vadd.f32 %v1513_v20, %v1480_v39  ;;  %v1530_v56 = vadd.f32 %v1514_v12, %v1481_v61  ;;  %v1711_v44 = vmul.f32 %v5633_v28, %v4886_v26  ;;  %v1759_v43 = vmul.f32 %v5681_v49, %v5680_v8  ;;  %v5683_v20 = vld [vmem:[#allocation59_spill] sm:$0xff] }
 0x359   : > { %v2261_v42 = vadd.f32 %v2245_v22, %v2212_v50  ;;  %v1855_v5 = vmul.f32 %v5674_v4, %v5682_v45  ;;  %v2262_v30 = vadd.f32 %v2246_v21, %v2213_v36  ;;  %v1856_v47 = vmul.f32 %v5675_v6, %v5682_v45 }
 0x35a   : > { %v1578_v59 = vadd.f32 %v1562_v1, %v1529_v40  ;;  %v1579_v9 = vadd.f32 %v1563_v17, %v1530_v56  ;;  %v1904_v12 = vmul.f32 %v5676_v32, %v5683_v20  ;;  %v1905_v22 = vmul.f32 %v5677_v27, %v5683_v20 }
 0x35b   : > { %v2277_v61 = vmul.f32 %v2261_v42, %v1773_v31  ;;  %v1953_v11 = vmul.f32 %v5678_v60, %v4298_v33  ;;  %v2278_v39 = vmul.f32 %v2262_v30, %v1774_v18  ;;  %v1954_v4 = vmul.f32 %v5679_v2, %v4298_v33  ;;  %v5053_v42 = vld [vmem:[#allocation3 + $0x88] sm:$0xff] }
 0x35c   : > { %v1627_v50 = vadd.f32 %v1611_v62, %v1578_v59  ;;  %v1628_v28 = vadd.f32 %v1612_v48, %v1579_v9  ;;  %v1920_v1 = vadd.f32 %v1904_v12, %v1855_v5  ;;  %v1921_v17 = vadd.f32 %v1905_v22, %v1856_v47  ;;  %v5045_v62 = vld [vmem:[#allocation3 + $0x87] sm:$0xff]  ;;  %v5047_v48 = vld [vmem:[#allocation3 + $0x8f] sm:$0xff] }
 0x35d   : > { %v2293_v21 = vpack.c.bf16 %v2277_v61, %v2277_v61  ;;  %v2002_v6 = vmul.f32 %v4960_v58, %v5584_v34  ;;  %v2294_v31 = vpack.c.bf16 %v2278_v39, %v2278_v39  ;;  %v2003_v27 = vmul.f32 %v4962_v19, %v5584_v34  ;;  %v5055_v5 = vld [vmem:[#allocation3 + $0x90] sm:$0xff]  ;;  %v5684_v12 = vld [vmem:[#allocation38_spill] sm:$0xff] }
 0x35e   : > { %v1677_v32 = vadd.f32 %v1661_v55, %v1627_v50  ;;  %v1678_v36 = vadd.f32 %v1662_v46, %v1628_v28  ;;  %v1969_v60 = vadd.f32 %v1953_v11, %v1920_v1  ;;  %v1970_v30 = vadd.f32 %v1954_v4, %v1921_v17  ;;  %v5065_v1 = vld [vmem:[#allocation3 + $0x91] sm:$0xff] }
 0x35f   : > { %v2327_v40 = vunpack.c.l.b16 %v2293_v21  ;;  %v2051_v9 = vmul.f32 %v4964_v24, %v5586_v35  ;;  %v2328_v59 = vunpack.c.l.b16 %v2294_v31  ;;  %v2052_v2 = vmul.f32 %v4970_v63, %v5586_v35 }
 0x360   : > { %v1726_v18 = vadd.f32 %v1710_v38, %v1677_v32  ;;  %v2018_v55 = vadd.f32 %v2002_v6, %v1969_v60  ;;  %v2019_v28 = vadd.f32 %v2003_v27, %v1970_v30  ;;  %v2100_v46 = vmul.f32 %v4972_v7, %v4322_v29  ;;  %v5057_v38 = vld [vmem:[#allocation3 + $0x89] sm:$0xff]  ;;  %v5685_v30 = vld [vmem:[#allocation52_spill] sm:$0xff] }
 0x361   : > { %v2101_v56 = vmul.f32 %v4989_v23, %v4322_v29  ;;  %v2342_v47 = vpack.c.b16 %v2328_v59, %v2327_v40  ;;  %v1727_v61 = vadd.f32 %v1711_v44, %v1678_v36  ;;  %v1760_v22 = vmul.f32 %v5681_v49, %v5684_v12 }
 0x362   : > { %v1775_v11 = vadd.f32 %v1759_v43, %v1726_v18  ;;  %v2067_v39 = vadd.f32 %v2051_v9, %v2018_v55  ;;  %v2068_v50 = vadd.f32 %v2052_v2, %v2019_v28  ;;  %v2149_v4 = vmul.f32 %v5596_v53, %v5045_v62 }
 0x363   : > { %v2150_v21 = vmul.f32 %v5596_v53, %v5047_v48  ;;  %2714 = vmatmul.msk.bf16.gmra.mxu2 %vm496_vm0, %v2342_v47  ;;  %v2198_v17 = vmul.f32 %v5597_v16, %v5053_v42  ;;  %v2199_v44 = vmul.f32 %v5597_v16, %v5055_v5  ;;  %v2247_v43 = vmul.f32 %v4414_v14, %v5057_v38 }
 0x364   : > { %v1368_v6 = vmul.f32 %v5598_v54, %v4701_v57  ;;  %v2116_v31 = vadd.f32 %v2100_v46, %v2067_v39  ;;  %v2117_v32 = vadd.f32 %v2101_v56, %v2068_v50  ;;  %v1369_v36 = vmul.f32 %v5598_v54, %v5663_v37  ;;  %v5686_v37 = vld [vmem:[#allocation53_spill] sm:$0xff]  ;;  %v5687_v56 = vld [vmem:[#allocation56_spill] sm:$0xff] }
 0x365   : > { %v1417_v27 = vmul.f32 %v4216_v10, %v5664_v0  ;;  %v2248_v40 = vmul.f32 %v4414_v14, %v5065_v1  ;;  %v1418_v60 = vmul.f32 %v4216_v10, %v5665_v25  ;;  %v1466_v9 = vmul.f32 %v5685_v30, %v5666_v41 }
 0x366   : > { %v1467_v57 = vmul.f32 %v5685_v30, %v5667_v52  ;;  %v2165_v59 = vadd.f32 %v2149_v4, %v2116_v31  ;;  %v2166_v18 = vadd.f32 %v2150_v21, %v2117_v32  ;;  %v1515_v55 = vmul.f32 %v5686_v37, %v4877_v51  ;;  %v5688_v4 = vld [vmem:[#allocation60_spill] sm:$0xff] }
 0x367   : > { %v1433_v2 = vadd.f32 %v1417_v27, %v1368_v6  ;;  %v1776_v28 = vadd.f32 %v1760_v22, %v1727_v61  ;;  %v1434_v0 = vadd.f32 %v1418_v60, %v1369_v36  ;;  %v1516_v46 = vmul.f32 %v5686_v37, %v4879_v3  ;;  %v5689_v22 = vld [vmem:[#allocation46_spill] sm:$0xff]  ;;  %v5690_v27 = vld [vmem:[#allocation41_spill] sm:$0xff] }
 0x368   : > { %v1564_v25 = vmul.f32 %v5687_v56, %v4881_v13  ;;  %v2214_v47 = vadd.f32 %v2198_v17, %v2165_v59  ;;  %v2215_v39 = vadd.f32 %v2199_v44, %v2166_v18  ;;  %v1565_v52 = vmul.f32 %v5687_v56, %v4886_v26  ;;  %v5691_v60 = vld [vmem:[#allocation42_spill] sm:$0xff] }
 0x369   : > { %v1482_v41 = vadd.f32 %v1466_v9, %v1433_v2  ;;  %v1483_v50 = vadd.f32 %v1467_v57, %v1434_v0  ;;  %v1613_v21 = vmul.f32 %v5688_v4, %v5680_v8  ;;  %v1614_v61 = vmul.f32 %v5688_v4, %v5684_v12  ;;  %v5692_v9 = vld [vmem:[#allocation65_spill] sm:$0xff]  ;;  %v5693_v57 = vld [vmem:[#allocation44_spill] sm:$0xff] }
 0x36a   : > { %v1663_v6 = vmul.f32 %v5632_v15, %v5689_v22  ;;  %v2263_v31 = vadd.f32 %v2247_v43, %v2214_v47  ;;  %v2264_v32 = vadd.f32 %v2248_v40, %v2215_v39  ;;  %v1664_v17 = vmul.f32 %v5632_v15, %v5690_v27 }
 0x36b   : > { %v1531_v36 = vadd.f32 %v1515_v55, %v1482_v41  ;;  %v1532_v44 = vadd.f32 %v1516_v46, %v1483_v50  ;;  %v1712_v59 = vmul.f32 %v5692_v9, %v5691_v60  ;;  %v1713_v18 = vmul.f32 %v5692_v9, %v5693_v57 }
 0x36c   : > { %v1857_v2 = vmul.f32 %v4960_v58, %v5682_v45  ;;  %v2279_v0 = vmul.f32 %v2263_v31, %v1775_v11  ;;  %v2280_v4 = vmul.f32 %v2264_v32, %v1776_v28  ;;  %v1858_v43 = vmul.f32 %v4962_v19, %v5682_v45 }
 0x36d   : > { %v1580_v56 = vadd.f32 %v1564_v25, %v1531_v36  ;;  %v1581_v40 = vadd.f32 %v1565_v52, %v1532_v44  ;;  %v1906_v55 = vmul.f32 %v4964_v24, %v5683_v20  ;;  %v1907_v46 = vmul.f32 %v4970_v63, %v5683_v20 }
 0x36e   : > { %v1955_v47 = vmul.f32 %v4972_v7, %v4298_v33  ;;  %v2295_v39 = vpack.c.bf16 %v2279_v0, %v2279_v0  ;;  %v2296_v41 = vpack.c.bf16 %v2280_v4, %v2280_v4  ;;  %v1956_v58 = vmul.f32 %v4989_v23, %v4298_v33  ;;  %v5126_v4 = vld [vmem:[#allocation3 + $0xa7] sm:$0xff]  ;;  %v5128_v23 = vld [vmem:[#allocation3 + $0xaf] sm:$0xff] }
 0x36f   : > { %v1629_v50 = vadd.f32 %v1613_v21, %v1580_v56  ;;  %v1630_v11 = vadd.f32 %v1614_v61, %v1581_v40  ;;  %v1922_v28 = vadd.f32 %v1906_v55, %v1857_v2  ;;  %v1923_v25 = vadd.f32 %v1907_v46, %v1858_v43  ;;  %v5694_v61 = vld [vmem:[#allocation45_spill] sm:$0xff]  ;;  %v5695_v2 = vld [vmem:[#allocation55_spill] sm:$0xff] }
 0x370   : > { %v2004_v19 = vmul.f32 %v5045_v62, %v5584_v34  ;;  %v2329_v52 = vunpack.c.l.b16 %v2295_v39  ;;  %v2330_v24 = vunpack.c.l.b16 %v2296_v41  ;;  %v2005_v63 = vmul.f32 %v5047_v48, %v5584_v34  ;;  %v5138_v43 = vld [vmem:[#allocation3 + $0xb0] sm:$0xff] }
 0x371   : > { %v1679_v31 = vadd.f32 %v1663_v6, %v1629_v50  ;;  %v1680_v32 = vadd.f32 %v1664_v17, %v1630_v11  ;;  %v1971_v7 = vadd.f32 %v1955_v47, %v1922_v28  ;;  %v1972_v36 = vadd.f32 %v1956_v58, %v1923_v25  ;;  %v5136_v17 = vld [vmem:[#allocation3 + $0xa8] sm:$0xff]  ;;  %v5146_v41 = vld [vmem:[#allocation3 + $0xb1] sm:$0xff] }
 0x372   : > { %v2053_v56 = vmul.f32 %v5053_v42, %v5586_v35  ;;  %v2343_v21 = vpack.c.b16 %v2330_v24, %v2329_v52  ;;  %v1761_v44 = vmul.f32 %v5681_v49, %v5694_v61  ;;  %v1762_v6 = vmul.f32 %v5681_v49, %v5695_v2  ;;  %v5144_v39 = vld [vmem:[#allocation3 + $0xa9] sm:$0xff] }
 0x373   : > { %v2054_v0 = vmul.f32 %v5055_v5, %v5586_v35  ;;  %v2020_v40 = vadd.f32 %v2004_v19, %v1971_v7  ;;  %v2021_v55 = vadd.f32 %v2005_v63, %v1972_v36  ;;  %v2102_v46 = vmul.f32 %v5057_v38, %v4322_v29 }
 0x374   : > { %v2103_v47 = vmul.f32 %v5065_v1, %v4322_v29  ;;  %2715 = vmatmul.msk.bf16.gmra.mxu2 %vm496_vm0, %v2343_v21  ;;  %v1728_v50 = vadd.f32 %v1712_v59, %v1679_v31  ;;  %v1729_v58 = vadd.f32 %v1713_v18, %v1680_v32  ;;  %v2151_v11 = vmul.f32 %v5596_v53, %v5126_v4 }
 0x375   : > { %v2152_v28 = vmul.f32 %v5596_v53, %v5128_v23  ;;  %v2069_v25 = vadd.f32 %v2053_v56, %v2020_v40  ;;  %v2070_v19 = vadd.f32 %v2054_v0, %v2021_v55  ;;  %v2200_v52 = vmul.f32 %v5597_v16, %v5136_v17 }
 0x376   : > { %v2201_v24 = vmul.f32 %v5597_v16, %v5138_v43  ;;  %v2249_v63 = vmul.f32 %v4414_v14, %v5144_v39  ;;  %v2250_v59 = vmul.f32 %v4414_v14, %v5146_v41  ;;  %v1370_v18 = vmul.f32 %v5598_v54, %v4877_v51 }
 0x377   : > { %v1371_v31 = vmul.f32 %v5598_v54, %v4879_v3  ;;  %v2118_v32 = vadd.f32 %v2102_v46, %v2069_v25  ;;  %v2119_v7 = vadd.f32 %v2103_v47, %v2070_v19  ;;  %v1419_v36 = vmul.f32 %v4216_v10, %v4881_v13 }
 0x378   : > { %v1420_v56 = vmul.f32 %v4216_v10, %v4886_v26  ;;  %v1468_v21 = vmul.f32 %v5685_v30, %v5680_v8  ;;  %v1469_v0 = vmul.f32 %v5685_v30, %v5684_v12  ;;  %v1517_v51 = vmul.f32 %v5686_v37, %v5689_v22  ;;  %v5696_v10 = vld [vmem:[#allocation56_spill] sm:$0xff] }
 0x379   : > { %v1518_v54 = vmul.f32 %v5686_v37, %v5690_v27  ;;  %v2167_v3 = vadd.f32 %v2151_v11, %v2118_v32  ;;  %v2168_v40 = vadd.f32 %v2152_v28, %v2119_v7  ;;  %v1435_v55 = vadd.f32 %v1419_v36, %v1370_v18  ;;  %v5697_v22 = vld [vmem:[#allocation60_spill] sm:$0xff] }
 0x37a   : > { %v1436_v46 = vadd.f32 %v1420_v56, %v1371_v31  ;;  %v1777_v13 = vadd.f32 %v1761_v44, %v1728_v50  ;;  %v1778_v47 = vadd.f32 %v1762_v6, %v1729_v58  ;;  %v1566_v26 = vmul.f32 %v5696_v10, %v5691_v60  ;;  %v5698_v50 = vld [vmem:[#allocation49_spill] sm:$0xff]  ;;  %v5699_v58 = vld [vmem:[#allocation47_spill] sm:$0xff] }
 0x37b   : > { %v1567_v8 = vmul.f32 %v5696_v10, %v5693_v57  ;;  %v2216_v25 = vadd.f32 %v2200_v52, %v2167_v3  ;;  %v2217_v12 = vadd.f32 %v2201_v24, %v2168_v40  ;;  %v1484_v30 = vadd.f32 %v1468_v21, %v1435_v55 }
 0x37c   : > { %v1485_v19 = vadd.f32 %v1469_v0, %v1436_v46  ;;  %v1615_v14 = vmul.f32 %v5697_v22, %v5694_v61  ;;  %v1616_v37 = vmul.f32 %v5697_v22, %v5695_v2  ;;  %v1665_v60 = vmul.f32 %v5632_v15, %v5698_v50  ;;  %v2234_v22 = vld [vmem:[#allocation3 + $0xc9] sm:$0xff]  ;;  %v5704_v50 = vld [vmem:[#allocation77_spill] sm:$0xff] }
 0x37d   : > { %v2265_v27 = vadd.f32 %v2249_v63, %v2216_v25  ;;  %v2266_v11 = vadd.f32 %v2250_v59, %v2217_v12  ;;  %v1533_v44 = vadd.f32 %v1517_v51, %v1484_v30  ;;  %v1666_v57 = vmul.f32 %v5632_v15, %v5699_v58  ;;  %v5702_v12 = vld [vmem:[#allocation50_spill] sm:$0xff] }
 0x37e   : > { %v1534_v6 = vadd.f32 %v1518_v54, %v1485_v19  ;;  %v1859_v28 = vmul.f32 %v5045_v62, %v5682_v45  ;;  %v1860_v52 = vmul.f32 %v5047_v48, %v5682_v45  ;;  %v1908_v63 = vmul.f32 %v5053_v42, %v5683_v20  ;;  %v5703_v19 = vld [vmem:[#allocation57_spill] sm:$0xff] }
 0x37f   : > { %v2281_v61 = vmul.f32 %v2265_v27, %v1777_v13  ;;  %v2282_v24 = vmul.f32 %v2266_v11, %v1778_v47  ;;  %v1582_v18 = vadd.f32 %v1566_v26, %v1533_v44  ;;  %v1909_v59 = vmul.f32 %v5055_v5, %v5683_v20  ;;  %v5700_v5 = vld [vmem:[#allocation48_spill] sm:$0xff] }
 0x380   : > { %v1583_v2 = vadd.f32 %v1567_v8, %v1534_v6  ;;  %v1957_v31 = vmul.f32 %v5057_v38, %v4298_v33  ;;  %v1958_v15 = vmul.f32 %v5065_v1, %v4298_v33  ;;  %v1924_v48 = vadd.f32 %v1908_v63, %v1859_v28 }
 0x381   : > { %v2297_v62 = vpack.c.bf16 %v2281_v61, %v2281_v61  ;;  %v2298_v32 = vpack.c.bf16 %v2282_v24, %v2282_v24  ;;  %v1631_v7 = vadd.f32 %v1615_v14, %v1582_v18  ;;  %v1925_v36 = vadd.f32 %v1909_v59, %v1860_v52 }
 0x382   : > { %v1632_v45 = vadd.f32 %v1616_v37, %v1583_v2  ;;  %v2006_v56 = vmul.f32 %v5126_v4, %v5584_v34  ;;  %v2007_v42 = vmul.f32 %v5128_v23, %v5584_v34  ;;  %v1714_v38 = vmul.f32 %v5692_v9, %v5700_v5  ;;  %v5701_v4 = vld [vmem:[#allocation54_spill] sm:$0xff] }
 0x383   : > { %v2331_v21 = vunpack.c.l.b16 %v2297_v62  ;;  %v2332_v20 = vunpack.c.l.b16 %v2298_v32  ;;  %v1973_v0 = vadd.f32 %v1957_v31, %v1924_v48  ;;  %v1974_v51 = vadd.f32 %v1958_v15, %v1925_v36  ;;  %v2136_v34 = vld [vmem:[#allocation3 + $0xc7] sm:$0xff]  ;;  %v2137_v23 = vld [vmem:[#allocation3 + $0xcf] sm:$0xff] }
 0x384   : > { %v2055_v33 = vmul.f32 %v5136_v17, %v5586_v35  ;;  %v2056_v14 = vmul.f32 %v5138_v43, %v5586_v35  ;;  %v1681_v54 = vadd.f32 %v1665_v60, %v1631_v7  ;;  %v1682_v3 = vadd.f32 %v1666_v57, %v1632_v45  ;;  %v2185_v17 = vld [vmem:[#allocation3 + $0xc8] sm:$0xff]  ;;  %v2186_v35 = vld [vmem:[#allocation3 + $0xd0] sm:$0xff]  ;;  %v2439_v7 = vld [vmem:[%s3475_s30 + $0x58] sm:$0xff] }
 0x385   : > { %v2344_v1 = vpack.c.b16 %v2332_v20, %v2331_v21  ;;  %v1715_v40 = vmul.f32 %v5692_v9, %v5701_v4  ;;  %v2022_v55 = vadd.f32 %v2006_v56, %v1973_v0  ;;  %v2023_v46 = vadd.f32 %v2007_v42, %v1974_v51  ;;  %v2438_v15 = vld [vmem:[%s3475_s30 + $0x50] sm:$0xff]  ;;  %v2440_v36 = vld [vmem:[%s3475_s30 + $0x60] sm:$0xff]  ;;  %v2441_v21 = vld [vmem:[%s3475_s30 + $0x68] sm:$0xff] }
 0x386   : > { %v2104_v13 = vmul.f32 %v5144_v39, %v4322_v29  ;;  %v2105_v47 = vmul.f32 %v5146_v41, %v4322_v29  ;;  %v2153_v26 = vmul.f32 %v5596_v53, %v2136_v34  ;;  %v2154_v9 = vmul.f32 %v5596_v53, %v2137_v23  ;;  %v2235_v29 = vld [vmem:[#allocation3 + $0xd1] sm:$0xff] }
 0x387   : > { %2716 = vmatmul.msk.bf16.gmra.mxu2 %vm496_vm0, %v2344_v1  ;;  %v2071_v43 = vadd.f32 %v2055_v33, %v2022_v55  ;;  %v2072_v10 = vadd.f32 %v2056_v14, %v2023_v46  ;;  %v1730_v8 = vadd.f32 %v1714_v38, %v1681_v54  ;;  %v1731_v25 = vadd.f32 %v1715_v40, %v1682_v3  ;;  %v2428_v38 = vld [vmem:[%s3475_s30] sm:$0xff]  ;;  %v2429_v33 = vld [vmem:[%s3475_s30 + $0x8] sm:$0xff]  ;;  %v2442_v1 = vld [vmem:[%s3475_s30 + $0x70] sm:$0xff] }
 0x388   : > { %v1763_v30 = vmul.f32 %v5681_v49, %v5702_v12  ;;  %v1764_v39 = vmul.f32 %v5681_v49, %v5703_v19  ;;  %v2202_v27 = vmul.f32 %v5597_v16, %v2185_v17  ;;  %v2203_v11 = vmul.f32 %v5597_v16, %v2186_v35  ;;  %v2443_v40 = vld [vmem:[%s3475_s30 + $0x78] sm:$0xff]  ;;  %v2430_v55 = vld [vmem:[%s3475_s30 + $0x10] sm:$0xff] }
 0x389   : > { %v2120_v41 = vadd.f32 %v2104_v13, %v2071_v43  ;;  %v2121_v37 = vadd.f32 %v2105_v47, %v2072_v10  ;;  %v2251_v53 = vmul.f32 %v5704_v50, %v2234_v22  ;;  %v2252_v60 = vmul.f32 %v5704_v50, %v2235_v29  ;;  %v2431_v47 = vld [vmem:[%s3475_s30 + $0x18] sm:$0xff]  ;;  %v2432_v43 = vld [vmem:[%s3475_s30 + $0x20] sm:$0xff]  ;;  %v2434_v12 = vld [vmem:[%s3475_s30 + $0x30] sm:$0xff] }
 0x38a   : > { %v1779_v58 = vadd.f32 %v1763_v30, %v1730_v8  ;;  %v1780_v57 = vadd.f32 %v1764_v39, %v1731_v25  ;;  %v2435_v39 = vld [vmem:[%s3475_s30 + $0x38] sm:$0xff] }
 0x38b   : > { %v2169_v44 = vadd.f32 %v2153_v26, %v2120_v41  ;;  %v2170_v6 = vadd.f32 %v2154_v9, %v2121_v37  ;;  %v2433_v9 = vld [vmem:[%s3475_s30 + $0x28] sm:$0xff]  ;;  %v2436_v41 = vld [vmem:[%s3475_s30 + $0x40] sm:$0xff] }
 0x38d   : > { %v2218_v28 = vadd.f32 %v2202_v27, %v2169_v44  ;;  %v2219_v49 = vadd.f32 %v2203_v11, %v2170_v6  ;;  %v2437_v11 = vld [vmem:[%s3475_s30 + $0x48] sm:$0xff] }
 0x38f   : > { %v2267_v52 = vadd.f32 %v2251_v53, %v2218_v28  ;;  %v2268_v61 = vadd.f32 %v2252_v60, %v2219_v49 }
 0x390   : > { %v2413_v62 = vpop.f32.mrf.mxu3 }
 0x391   : > { %v2283_v24 = vmul.f32 %v2267_v52, %v1779_v58  ;;  %v2284_v18 = vmul.f32 %v2268_v61, %v1780_v57  ;;  %v2454_v32 = vadd.f32 %v2438_v15, %v2413_v62 }
 0x393   : > { %v2299_v16 = vpack.c.bf16 %v2283_v24, %v2283_v24  ;;  %v2300_v2 = vpack.c.bf16 %v2284_v18, %v2284_v18  ;;  %2470 = vst.msk [vmem:[%s4092_s24 + $0x50] sm:$0xff] %vm496_vm0, %v2454_v32 }
 0x395   : > { %v2333_v63 = vunpack.c.l.b16 %v2299_v16  ;;  %v2334_v59 = vunpack.c.l.b16 %v2300_v2 }
 0x397   : > { %v2345_v31 = vpack.c.b16 %v2334_v59, %v2333_v63 }
 0x398   : > { %v2415_v45 = vpop.f32.mrf.mxu3 }
 0x399   : > { %2717 = vmatmul.msk.bf16.gmra.mxu2 %vm496_vm0, %v2345_v31  ;;  %v2455_v48 = vadd.f32 %v2439_v7, %v2415_v45 }
 0x39b   : > { %2471 = vst.msk [vmem:[%s4092_s24 + $0x58] sm:$0xff] %vm496_vm0, %v2455_v48 }
 0x3a5   : > { %v2418_v56 = vpop.f32.mrf.mxu3 }
 0x3a6   : > { %v2456_v42 = vadd.f32 %v2440_v36, %v2418_v56 }
 0x3a8   : > { %2472 = vst.msk [vmem:[%s4092_s24 + $0x60] sm:$0xff] %vm496_vm0, %v2456_v42 }
 0x3ad   : > { %v2420_v20 = vpop.f32.mrf.mxu3 }
 0x3ae   : > { %v2457_v5 = vadd.f32 %v2441_v21, %v2420_v20 }
 0x3b0   : > { %2473 = vst.msk [vmem:[%s4092_s24 + $0x68] sm:$0xff] %vm496_vm0, %v2457_v5 }
 0x3c8   : > { %v2388_v0 = vpop.f32.mrf.mxu2 }
 0x3c9   : > { %v2444_v51 = vadd.f32 %v2428_v38, %v2388_v0 }
 0x3cb   : > { %2460 = vst.msk [vmem:[%s4092_s24] sm:$0xff] %vm496_vm0, %v2444_v51 }
 0x3d0   : > { %v2390_v14 = vpop.f32.mrf.mxu2 }
 0x3d1   : > { %v2445_v54 = vadd.f32 %v2429_v33, %v2390_v14  ;;  %v2423_v3 = vpop.f32.mrf.mxu3 }
 0x3d2   : > { %v2458_v4 = vadd.f32 %v2442_v1, %v2423_v3 }
 0x3d3   : > { %2461 = vst.msk [vmem:[%s4092_s24 + $0x8] sm:$0xff] %vm496_vm0, %v2445_v54 }
 0x3d4   : > { %2474 = vst.msk [vmem:[%s4092_s24 + $0x70] sm:$0xff] %vm496_vm0, %v2458_v4 }
 0x3d9   : > { %v2425_v34 = vpop.f32.mrf.mxu3 }
 0x3da   : > { %v2459_v23 = vadd.f32 %v2443_v40, %v2425_v34 }
 0x3dc   : > { %2475 = vst.msk [vmem:[%s4092_s24 + $0x78] sm:$0xff] %vm496_vm0, %v2459_v23 }
 0x3e6   : > { %v2393_v46 = vpop.f32.mrf.mxu2 }
 0x3e7   : > { %v2446_v13 = vadd.f32 %v2430_v55, %v2393_v46 }
 0x3e9   : > { %2462 = vst.msk [vmem:[%s4092_s24 + $0x10] sm:$0xff] %vm496_vm0, %v2446_v13 }
 0x3ee   : > { %v2395_v17 = vpop.f32.mrf.mxu2 }
 0x3ef   : > { %v2447_v35 = vadd.f32 %v2431_v47, %v2395_v17 }
 0x3f1   : > { %2463 = vst.msk [vmem:[%s4092_s24 + $0x18] sm:$0xff] %vm496_vm0, %v2447_v35 }
 0x3f7   : > { %v2398_v10 = vpop.f32.mrf.mxu2 }
 0x3f8   : > { %v2448_v26 = vadd.f32 %v2432_v43, %v2398_v10 }
 0x3fa   : > { %2464 = vst.msk [vmem:[%s4092_s24 + $0x20] sm:$0xff] %vm496_vm0, %v2448_v26 }
 0x3ff   : > { %v2400_v8 = vpop.f32.mrf.mxu2 }
 0x400   : > { %v2449_v25 = vadd.f32 %v2433_v9, %v2400_v8 }
 0x402   : > { %2465 = vst.msk [vmem:[%s4092_s24 + $0x28] sm:$0xff] %vm496_vm0, %v2449_v25 }
 0x40a   : > { %v2403_v30 = vpop.f32.mrf.mxu2 }
 0x40b   : > { %v2450_v19 = vadd.f32 %v2434_v12, %v2403_v30 }
 0x40d   : > { %2466 = vst.msk [vmem:[%s4092_s24 + $0x30] sm:$0xff] %vm496_vm0, %v2450_v19 }
 0x412   : > { %v2405_v22 = vpop.f32.mrf.mxu2 }
 0x413   : > { %v2451_v29 = vadd.f32 %v2435_v39, %v2405_v22 }
 0x415   : > { %2467 = vst.msk [vmem:[%s4092_s24 + $0x38] sm:$0xff] %vm496_vm0, %v2451_v29 }
 0x41c   : > { %v2408_v37 = vpop.f32.mrf.mxu2 }
 0x41d   : > { %v2452_v27 = vadd.f32 %v2436_v41, %v2408_v37 }
 0x41f   : > { %2468 = vst.msk [vmem:[%s4092_s24 + $0x40] sm:$0xff] %vm496_vm0, %v2452_v27 }
 0x424   : > { %v2410_v44 = vpop.f32.mrf.mxu2 }
 0x425   : > { %v2453_v6 = vadd.f32 %v2437_v11, %v2410_v44 }
 0x427   : > { %2469 = vst.msk [vmem:[%s4092_s24 + $0x48] sm:$0xff] %vm496_vm0, %v2453_v6 }
 0x428   : > { %3176 = shalt.err (!%p3173_p0)
}
 0x429   : > { %s3278_s5 = smov 128   ;;  %s3279_s24 = smov 8  }
 0x42a   : > { %2760 = dma.vmem_to_hbm [thread:$0]  (%p3444_p2), %s2493_s7, 2048, %s2495_s16, %s2477_s12, %s3278_s5, %s3278_s5, %s3279_s24  }
 0x42b PF: > { %s5706_s27 = sld [smem:[#allocation31_spill]] }
 0x42c   : > { %s5707_s1 = sld [smem:[#allocation30_spill]] }
 0x431   : > { %p2797_p5 = scmp.ge.s32.totalorder %s5706_s27, 2 }
 0x432   : > { %s2509_s29 = sand.u32 1, %s5707_s1  }
 0x433   : > { %p2783_p6 = pnand %p2797_p5, %p3450_p4  ;;  %s2510_s6 = scalar_lea.sflag [#allocation7], %s2509_s29 }
 0x435   : > { %p2784_p7 = pneg %p2783_p6 }
 0x437   : > { %3230 = dma.done.wait (%p2784_p7), %s2510_s6, 2048  }
 0x438   : > { %3232 = vsyncadd (%p2784_p7), %s2510_s6, 4294965248  ;;  %s28_s16 = sadd.s32 1, %s5706_s27   ;;  %s5709_s4 = sld [smem:[#allocation32_spill]] }
 0x439   : > { %p25_p1 = scmp.ge.s32.totalorder %s28_s16, 6   ;;  %s5710_s28 = sld [smem:[#allocation33_spill]] }
 0x43a   : > { %s5711_s30 = smov %s3239_s10  ;;  %s5712_s10 = smov %s3243_s11 }
 0x43b   : > { %s5713_s11 = smov %s3457_s23  ;;  %s5714_s12 = smov %s3255_s14 }
 0x43c   : > { %s5715_s13 = smov %s3259_s15  ;;  %27 = sbr.rel (!%p25_p1) target bundleno = 18 (0x12), region = 133 }
 0x43e   : > { %s5716_s14 = smov %s5709_s4 }
 0x43f   : > { %s5717_s15 = smov %s5710_s28 }
 0x441   :  { %2516 = vsyncpa [#allocation6], 1 }
 0x442   :  { %2518 = vsyncpa [#allocation6 + $0x1], 1 }
 0x443   :  { %2519 = vsyncpa [#allocation9], 1 }
 0x444   :  { %2520 = vsyncpa [#allocation12], 1 }
 0x445   :  { %2521 = vsyncpa [#allocation15], 1 }
 0x446   :  { %2522 = vsyncpa [#allocation7], 1 }
 0x447   :  { %2524 = vsyncpa [#allocation7 + $0x1], 1 }
 0x448   :  { %2525 = vsyncmov [#allocation4] }
 0x44b   :  { %s2526_s23 = vpop.sfrf %2525 }
 0x44c   :  { %p2728_p2 = scmp.ne.s32.totalorder %s2526_s23, 0 }
 0x44e   :  { %2530 = shalt.err (%p2728_p2)  }
 0x44f   :  { %2532 = vsyncmov [#allocation4 + $0x1] }
 0x452   :  { %s2533_s18 = vpop.sfrf %2532 }
 0x453   :  { %p2729_p4 = scmp.ne.s32.totalorder %s2533_s18, 0 }
 0x455   :  { %2537 = shalt.err (%p2729_p4)  }

</bundles_post_ra>
